<compile_context>
chip_gen: v6e
topology: v6e:2x2x1
jax: 0.10.0
libtpu: 0.0.40
codegen_flags: <defaults>
</compile_context>

<pallas_src>
import functools

import jax
import jax.numpy as jnp
from jax.experimental import pallas as pl
from jax.experimental.pallas import tpu as pltpu


def _round_up(v, m):
    return ((v + m - 1) // m) * m


def _num_tensorcores():
    """Best-effort TensorCores-per-chip count (defaults to 1 => no split)."""
    try:
        info = pltpu.get_tpu_info()
        for name in ("num_cores", "num_tensorcores", "tensorcores_per_chip",
                     "cores_per_chip"):
            v = getattr(info, name, None)
            if isinstance(v, int) and v > 0:
                return v
    except Exception:
        pass
    try:
        v = getattr(jax.devices()[0], "num_cores", None)
        if isinstance(v, int) and v > 0:
            return v
    except Exception:
        pass
    return 1


def _vmem_capacity_bytes():
    """Physical VMEM per core; conservative 64 MiB (v7x) fallback."""
    try:
        v = getattr(pltpu.get_tpu_info(), "vmem_capacity_bytes", None)
        if isinstance(v, int) and v > 0:
            return v
    except Exception:
        pass
    return 64 * 1024 * 1024


def _pool_vmem_bytes(tile_n, f_pad, include_head):
    """Honest scoped-VMEM estimate for the pool kernel."""
    # x input block: (1, tile_n, 8) f32, lane-padded to 128, double-buffered.
    total = 2 * tile_n * 128 * 4
    # Resident weights / biases (assume the pipeliner double-buffers them).
    w_elems = 8 * 64 + 64 * 64 + 64 * 64 + 64 * 128 + 128 * f_pad
    b_elems = 3 * 64 + 128 + f_pad
    if include_head:
        w_elems += f_pad * f_pad
        b_elems += f_pad
    total += 2 * (2 * w_elems + 4 * b_elems)        # bf16 weights, f32 biases
    # Peak live activations per step: widest f32 pair plus bf16 casts.
    total += tile_n * (64 * 4 + 128 * 4 + f_pad * 4 + 128 * 2 + f_pad * 2)
    # Accumulator scratch + double-buffered output block.
    total += 8 * f_pad * 4 + 2 * f_pad * 4
    return total


# ---------------------------------------------------------------------------
# Stage 1: per-point MLP + max pool over points.  When `fuse_head` is set the
# final Linear + folded BN + ReLU also runs in the finalize step.
# ---------------------------------------------------------------------------
def _pool_kernel(x_ref, w1, b1, w2, b2, w3, b3, w4, b4, w5, b5, *rest,
                 fuse_head):
    """grid = (B, n_splits, chunks); the chunk axis is the max-pool reduction."""
    if fuse_head:
        wm, bm, out_ref, acc_ref = rest
    else:
        out_ref, acc_ref = rest

    c = pl.program_id(2)
    x = x_ref[0]                                  # (TN, 8) f32, channels 3..7 = 0
    tn = x.shape[0]
    f = acc_ref.shape[1]

    def mm(a, w_ref):
        # LHS cast to the (pre-cast, resident) weight dtype; MXU matmul with
        # f32 accumulation.  Layer 1 (K=8) also uses the MXU: lane-broadcast
        # FMAs were XLU-bound on v6e/v7x's 2 XLU units.
        return jnp.dot(a.astype(w_ref.dtype), w_ref[...],
                       preferred_element_type=jnp.float32)

    h = jnp.maximum(mm(x, w1) + b1[...], 0.0)
    h = jnp.maximum(mm(h, w2) + b2[...], 0.0)
    h = jnp.maximum(mm(h, w3) + b3[...], 0.0)
    h = jnp.maximum(mm(h, w4) + b4[...], 0.0)
    h = jnp.maximum(mm(h, w5) + b5[...], 0.0)     # (TN, F_pad) f32

    # Running max kept at sublane depth 8 (pure VPU per chunk); the 8-row XLU
    # collapse happens once per (batch, split) in the finalize.
    tile_max = jnp.max(h.reshape(tn // 8, 8, f), axis=0)          # (8, F_pad)

    @pl.when(c == 0)
    def _():
        acc_ref[...] = tile_max

    @pl.when(c > 0)
    def _():
        acc_ref[...] = jnp.maximum(acc_ref[...], tile_max)

    @pl.when(c == pl.num_programs(2) - 1)
    def _():
        g = jnp.max(acc_ref[...], axis=0, keepdims=True)          # (1, F_pad)
        if fuse_head:
            # Fused head: saves a dispatch and an HBM round trip of the
            # pooled features (the pipeline is dispatch-bound at small B/N).
            y = jnp.dot(g.astype(wm.dtype), wm[...],
                        preferred_element_type=jnp.float32) + bm[...]
            out_ref[0] = jnp.maximum(y, 0.0)
        else:
            out_ref[0] = g


# ---------------------------------------------------------------------------
# Stage 2 (only when the point axis is split across cores): cross-split max +
# final Linear + folded BN + ReLU, batched over all B in one grid step.
# ---------------------------------------------------------------------------
def _head_kernel(g_ref, wm, bm, o_ref):
    g = jnp.max(g_ref[...], axis=1)                               # (B, F_pad)
    y = jnp.dot(g.astype(wm.dtype), wm[...],
                preferred_element_type=jnp.float32) + bm[...]
    o_ref[...] = jnp.maximum(y, 0.0)


def prepare_params(params, *, use_bf16=True):
    """One-time parameter prep (hoisted out of the per-call path):
    pre-cast matmul weights (bf16 by default), zero-pad out_features to a
    multiple of 128 (lane-dense stores) and the layer-1 K dim to 8."""
    f = params["wm"].shape[1]
    f_pad = _round_up(f, 128)
    wdt = jnp.bfloat16 if use_bf16 else jnp.float32

    def pad_to(a, shape):
        return jnp.pad(a, [(0, s - d) for d, s in zip(a.shape, shape)])

    return {
        "w1": pad_to(params["w1"], (8, 64)).astype(wdt),
        "b1": params["b1"].astype(jnp.float32),
        "w2": params["w2"].astype(wdt), "b2": params["b2"].astype(jnp.float32),
        "w3": params["w3"].astype(wdt), "b3": params["b3"].astype(jnp.float32),
        "w4": params["w4"].astype(wdt), "b4": params["b4"].astype(jnp.float32),
        "w5": pad_to(params["w5"], (128, f_pad)).astype(wdt),
        "b5": pad_to(params["b5"], (1, f_pad)).astype(jnp.float32),
        "wm": pad_to(params["wm"], (f_pad, f_pad)).astype(wdt),
        "bm": pad_to(params["bm"], (1, f_pad)).astype(jnp.float32),
    }


def pointnet_lite_feat(x, params, *, out_features=None, tile_n=None,
                       n_splits=None):
    """x: (B, N, 3) float32; params from `prepare_params`.
    Returns a 1-tuple with (B, 1, out_features) float32."""
    B, N, Cin = x.shape
    assert Cin == 3
    cin_pad = params["w1"].shape[0]                 # 8
    f_pad = params["wm"].shape[1]
    f_out = f_pad if out_features is None else out_features

    # Point-axis split only on multi-TensorCore chips (v7x) and only when it
    # evens out the parallel work (odd B); single-TC v5e/v6e never pay for it.
    if n_splits is None:
        n_splits = 2 if (_num_tensorcores() >= 2 and B % 2 == 1
                         and N >= 256) else 1

    # Fuse the head into the pool finalize when there is no cross-split max
    # and wm's resident footprint is modest.
    fuse_head = (n_splits == 1 and
                 2 * f_pad * f_pad * params["wm"].dtype.itemsize <= (8 << 20))

    # Generation-aware tile cap: large tiles amortize the ~0.35us/grid-step
    # overhead; shrink only if the honest VMEM estimate exceeds the budget.
    capacity = _vmem_capacity_bytes()
    vmem_ceiling = (40 << 20) if capacity <= (64 << 20) else (80 << 20)
    n_split = -(-N // n_splits)
    if tile_n is None:
        cap = 2048
        while cap > 256 and _pool_vmem_bytes(cap, f_pad, fuse_head) > vmem_ceiling:
            cap //= 2
        chunks = -(-n_split // cap)
        tile_n = _round_up(-(-n_split // chunks), 8)
    else:
        assert tile_n % 8 == 0
        chunks = -(-n_split // tile_n)
    n_pad = n_splits * chunks * tile_n

    # Replicate the last point up to the tile grid (duplicates never change
    # the max) and zero-pad channels 3 -> 8 for an aligned layer-1 K dim.
    if n_pad != N:
        x = jnp.pad(x, ((0, 0), (0, n_pad - N), (0, 0)), mode="edge")
    x = jnp.pad(x, ((0, 0), (0, 0), (0, cin_pad - Cin)))

    vmem_limit = min(max(int(_pool_vmem_bytes(tile_n, f_pad, fuse_head) * 1.25),
                         32 << 20),
                     vmem_ceiling)

    weight_keys = ["w1", "b1", "w2", "b2", "w3", "b3", "w4", "b4", "w5", "b5"]
    if fuse_head:
        weight_keys += ["wm", "bm"]
    weight_args = [params[k] for k in weight_keys]

    def full_spec(a):
        return pl.BlockSpec(a.shape, lambda b, s, c: (0,) * a.ndim)

    pool_out = pl.pallas_call(
        functools.partial(_pool_kernel, fuse_head=fuse_head),
        out_shape=jax.ShapeDtypeStruct((B * n_splits, 1, f_pad), jnp.float32),
        grid_spec=pltpu.PrefetchScalarGridSpec(
            num_scalar_prefetch=0,
            grid=(B, n_splits, chunks),
            in_specs=[pl.BlockSpec((1, tile_n, cin_pad),
                                   lambda b, s, c: (b, s * chunks + c, 0))]
                     + [full_spec(a) for a in weight_args],
            out_specs=pl.BlockSpec((1, 1, f_pad),
                                   lambda b, s, c: (b * n_splits + s, 0, 0)),
            scratch_shapes=[pltpu.VMEM((8, f_pad), jnp.float32)],
        ),
        compiler_params=pltpu.CompilerParams(
            dimension_semantics=("parallel", "parallel", "arbitrary"),
            vmem_limit_bytes=vmem_limit),
    )(x, *weight_args)

    if fuse_head:
        return (pool_out[:, :, :f_out],)            # (B, 1, F)

    pooled = pool_out.reshape(B, n_splits, f_pad)
    out = pl.pallas_call(
        _head_kernel,
        out_shape=jax.ShapeDtypeStruct((B, f_pad), jnp.float32),
        grid=(1,),
        in_specs=[pl.BlockSpec((B, n_splits, f_pad), lambda i: (0, 0, 0)),
                  pl.BlockSpec((f_pad, f_pad), lambda i: (0, 0)),
                  pl.BlockSpec((1, f_pad), lambda i: (0, 0))],
        out_specs=pl.BlockSpec((B, f_pad), lambda i: (0, 0)),
    )(pooled, params["wm"], params["bm"])
    return (out[:, None, :f_out],)


def _make_params(key, out_features):
    """Deterministic synthetic params; BN (eval mode) folded into each layer."""
    dims = [(3, 64), (64, 64), (64, 64), (64, 128), (128, out_features),
            (out_features, out_features)]
    names = ["1", "2", "3", "4", "5", "m"]
    eps = 1e-5
    params = {}
    keys = jax.random.split(key, len(dims) * 6)
    ki = 0
    for (cin, cout), name in zip(dims, names):
        w = jax.random.normal(keys[ki], (cin, cout), jnp.float32) * 0.1; ki += 1
        b = jax.random.normal(keys[ki], (1, cout), jnp.float32) * 0.1; ki += 1
        gamma = 1.0 + 0.1 * jax.random.normal(keys[ki], (cout,), jnp.float32); ki += 1
        beta = 0.1 * jax.random.normal(keys[ki], (cout,), jnp.float32); ki += 1
        rmean = 0.1 * jax.random.normal(keys[ki], (cout,), jnp.float32); ki += 1
        rvar = jnp.abs(jax.random.normal(keys[ki], (cout,), jnp.float32)) + 0.5; ki += 1
        scale = gamma / jnp.sqrt(rvar + eps)
        shift = beta - rmean * scale
        params["w" + name] = w * scale[None, :]
        params["b" + name] = b * scale[None, :] + shift[None, :]
    return params


def _reference_f32(x, params):
    """Full-f32 reference of the PyTorch forward (eval-mode BN folded)."""
    hp = jax.lax.Precision.HIGHEST
    h = jnp.maximum(jnp.dot(x, params["w1"], precision=hp) + params["b1"], 0.0)
    for n in ("2", "3", "4", "5"):
        h = jnp.maximum(jnp.dot(h, params["w" + n], precision=hp)
                        + params["b" + n], 0.0)
    g = jnp.max(h, axis=1)                                        # (B, F)
    g = jnp.maximum(jnp.dot(g, params["wm"], precision=hp) + params["bm"], 0.0)
    return g[:, None, :]


def _reference_matched(x, pp, f_out):
    """Plain-JAX reference using the kernel's exact dtype choices."""
    xx = jnp.pad(x, ((0, 0), (0, 0), (0, pp["w1"].shape[0] - x.shape[-1])))

    def mm(a, w):
        return jnp.dot(a.astype(w.dtype), w, preferred_element_type=jnp.float32)

    h = jnp.maximum(mm(xx, pp["w1"]) + pp["b1"], 0.0)
    for n in ("2", "3", "4", "5"):
        h = jnp.maximum(mm(h, pp["w" + n]) + pp["b" + n], 0.0)
    g = jnp.max(h, axis=1)
    g = jnp.maximum(mm(g, pp["wm"]) + pp["bm"], 0.0)
    return g[:, None, :f_out]


if __name__ == "__main__":
    B, N, F = 2, 512, 256        # small shapes; PointNetLiteFeat(out_features=256)
    key = jax.random.PRNGKey(0)
    kx, kp = jax.random.split(key)
    x = jax.random.normal(kx, (B, N, 3), jnp.float32)
    raw = _make_params(kp, F)

    prepared = prepare_params(raw, use_bf16=True)   # one-time cast/pad (hoisted)
    fwd = jax.jit(lambda inp: pointnet_lite_feat(inp, prepared, out_features=F))

    (y,) = fwd(x)
    y = jax.block_until_ready(y)
    assert y.shape == (B, 1, F), y.shape

    # Tight check vs. a reference with identical dtype choices (bf16 operands,
    # f32 accumulation, folded eval-mode BN).
    y_match = _reference_matched(x, prepared, F)
    err_match = float(jnp.max(jnp.abs(y - y_match)))
    assert jnp.allclose(y, y_match, atol=2e-3, rtol=2e-3), err_match

    # Loose check vs. the full-f32 PyTorch-faithful forward: measures the true
    # bf16 deviation of the fast path.
    y_f32 = _reference_f32(x, raw)
    err_f32 = float(jnp.max(jnp.abs(y - y_f32)))
    assert jnp.allclose(y, y_f32, atol=5e-2, rtol=5e-2), err_f32

    print("KERNEL_OK")
</pallas_src>

<mosaic_0001>
module attributes {stable_mosaic.version = 11 : i64} {
  func.func @_pool_kernel(%arg0: i32, %arg1: i32, %arg2: i32, %arg3: memref<1x512x8xf32, #tpu.memory_space<vmem>>, %arg4: memref<8x64xbf16, #tpu.memory_space<vmem>>, %arg5: memref<1x64xf32, #tpu.memory_space<vmem>>, %arg6: memref<64x64xbf16, #tpu.memory_space<vmem>>, %arg7: memref<1x64xf32, #tpu.memory_space<vmem>>, %arg8: memref<64x64xbf16, #tpu.memory_space<vmem>>, %arg9: memref<1x64xf32, #tpu.memory_space<vmem>>, %arg10: memref<64x128xbf16, #tpu.memory_space<vmem>>, %arg11: memref<1x128xf32, #tpu.memory_space<vmem>>, %arg12: memref<128x256xbf16, #tpu.memory_space<vmem>>, %arg13: memref<1x256xf32, #tpu.memory_space<vmem>>, %arg14: memref<256x256xbf16, #tpu.memory_space<vmem>>, %arg15: memref<1x256xf32, #tpu.memory_space<vmem>>, %arg16: memref<1x1x256xf32, #tpu.memory_space<vmem>>, %arg17: memref<8x256xf32, #tpu.memory_space<vmem>>) attributes {dimension_semantics = [#tpu.dimension_semantics<parallel>, #tpu.dimension_semantics<parallel>, #tpu.dimension_semantics<arbitrary>], iteration_bounds = array<i64: 2, 1, 1>, scalar_prefetch = 0 : i64, scratch_operands = 1 : i64, tpu.core_type = #tpu.core_type<tc>, window_params = [{transform_indices = @transform_0, window_bounds = array<i64: 1, 512, 8>}, {pipeline_mode = #tpu.pipeline_mode<synchronous>, transform_indices = @transform_1, window_bounds = array<i64: 8, 64>}, {pipeline_mode = #tpu.pipeline_mode<synchronous>, transform_indices = @transform_2, window_bounds = array<i64: 1, 64>}, {pipeline_mode = #tpu.pipeline_mode<synchronous>, transform_indices = @transform_3, window_bounds = array<i64: 64, 64>}, {pipeline_mode = #tpu.pipeline_mode<synchronous>, transform_indices = @transform_4, window_bounds = array<i64: 1, 64>}, {pipeline_mode = #tpu.pipeline_mode<synchronous>, transform_indices = @transform_5, window_bounds = array<i64: 64, 64>}, {pipeline_mode = #tpu.pipeline_mode<synchronous>, transform_indices = @transform_6, window_bounds = array<i64: 1, 64>}, {pipeline_mode = #tpu.pipeline_mode<synchronous>, transform_indices = @transform_7, window_bounds = array<i64: 64, 128>}, {pipeline_mode = #tpu.pipeline_mode<synchronous>, transform_indices = @transform_8, window_bounds = array<i64: 1, 128>}, {pipeline_mode = #tpu.pipeline_mode<synchronous>, transform_indices = @transform_9, window_bounds = array<i64: 128, 256>}, {pipeline_mode = #tpu.pipeline_mode<synchronous>, transform_indices = @transform_10, window_bounds = array<i64: 1, 256>}, {pipeline_mode = #tpu.pipeline_mode<synchronous>, transform_indices = @transform_11, window_bounds = array<i64: 256, 256>}, {pipeline_mode = #tpu.pipeline_mode<synchronous>, transform_indices = @transform_12, window_bounds = array<i64: 1, 256>}, {transform_indices = @transform_13, window_bounds = array<i64: 1, 1, 256>}]} {
    %c0 = arith.constant 0 : index
    %c0_0 = arith.constant 0 : index
    %c0_1 = arith.constant 0 : index
    %0 = vector.load %arg3[%c0, %c0_0, %c0_1] : memref<1x512x8xf32, #tpu.memory_space<vmem>>, vector<1x512x8xf32>
    %1 = vector.shape_cast %0 : vector<1x512x8xf32> to vector<512x8xf32>
    %2 = arith.truncf %1 : vector<512x8xf32> to vector<512x8xbf16>
    %c0_2 = arith.constant 0 : index
    %c0_3 = arith.constant 0 : index
    %3 = vector.load %arg4[%c0_2, %c0_3] : memref<8x64xbf16, #tpu.memory_space<vmem>>, vector<8x64xbf16>
    %cst = arith.constant dense<0.000000e+00> : vector<512x64xf32>
    %4 = tpu.matmul %2, %3, %cst {dimension_numbers = #tpu.dot_dimension_numbers<[1], [0], [0], [1], [0, 0, 1, 1], [], []>} : vector<512x8xbf16>, vector<8x64xbf16>, vector<512x64xf32> -> vector<512x64xf32>
    %c0_4 = arith.constant 0 : index
    %c0_5 = arith.constant 0 : index
    %5 = vector.load %arg5[%c0_4, %c0_5] : memref<1x64xf32, #tpu.memory_space<vmem>>, vector<1x64xf32>
    %6 = vector.broadcast %5 : vector<1x64xf32> to vector<512x64xf32>
    %7 = arith.addf %4, %6 : vector<512x64xf32>
    %cst_6 = arith.constant 0.000000e+00 : f32
    %8 = vector.broadcast %cst_6 : f32 to vector<512x64xf32>
    %9 = arith.maximumf %7, %8 : vector<512x64xf32>
    %10 = arith.truncf %9 : vector<512x64xf32> to vector<512x64xbf16>
    %c0_7 = arith.constant 0 : index
    %c0_8 = arith.constant 0 : index
    %11 = vector.load %arg6[%c0_7, %c0_8] : memref<64x64xbf16, #tpu.memory_space<vmem>>, vector<64x64xbf16>
    %cst_9 = arith.constant dense<0.000000e+00> : vector<512x64xf32>
    %12 = tpu.matmul %10, %11, %cst_9 {dimension_numbers = #tpu.dot_dimension_numbers<[1], [0], [0], [1], [0, 0, 1, 1], [], []>} : vector<512x64xbf16>, vector<64x64xbf16>, vector<512x64xf32> -> vector<512x64xf32>
    %c0_10 = arith.constant 0 : index
    %c0_11 = arith.constant 0 : index
    %13 = vector.load %arg7[%c0_10, %c0_11] : memref<1x64xf32, #tpu.memory_space<vmem>>, vector<1x64xf32>
    %14 = vector.broadcast %13 : vector<1x64xf32> to vector<512x64xf32>
    %15 = arith.addf %12, %14 : vector<512x64xf32>
    %cst_12 = arith.constant 0.000000e+00 : f32
    %16 = vector.broadcast %cst_12 : f32 to vector<512x64xf32>
    %17 = arith.maximumf %15, %16 : vector<512x64xf32>
    %18 = arith.truncf %17 : vector<512x64xf32> to vector<512x64xbf16>
    %c0_13 = arith.constant 0 : index
    %c0_14 = arith.constant 0 : index
    %19 = vector.load %arg8[%c0_13, %c0_14] : memref<64x64xbf16, #tpu.memory_space<vmem>>, vector<64x64xbf16>
    %cst_15 = arith.constant dense<0.000000e+00> : vector<512x64xf32>
    %20 = tpu.matmul %18, %19, %cst_15 {dimension_numbers = #tpu.dot_dimension_numbers<[1], [0], [0], [1], [0, 0, 1, 1], [], []>} : vector<512x64xbf16>, vector<64x64xbf16>, vector<512x64xf32> -> vector<512x64xf32>
    %c0_16 = arith.constant 0 : index
    %c0_17 = arith.constant 0 : index
    %21 = vector.load %arg9[%c0_16, %c0_17] : memref<1x64xf32, #tpu.memory_space<vmem>>, vector<1x64xf32>
    %22 = vector.broadcast %21 : vector<1x64xf32> to vector<512x64xf32>
    %23 = arith.addf %20, %22 : vector<512x64xf32>
    %cst_18 = arith.constant 0.000000e+00 : f32
    %24 = vector.broadcast %cst_18 : f32 to vector<512x64xf32>
    %25 = arith.maximumf %23, %24 : vector<512x64xf32>
    %26 = arith.truncf %25 : vector<512x64xf32> to vector<512x64xbf16>
    %c0_19 = arith.constant 0 : index
    %c0_20 = arith.constant 0 : index
    %27 = vector.load %arg10[%c0_19, %c0_20] : memref<64x128xbf16, #tpu.memory_space<vmem>>, vector<64x128xbf16>
    %cst_21 = arith.constant dense<0.000000e+00> : vector<512x128xf32>
    %28 = tpu.matmul %26, %27, %cst_21 {dimension_numbers = #tpu.dot_dimension_numbers<[1], [0], [0], [1], [0, 0, 1, 1], [], []>} : vector<512x64xbf16>, vector<64x128xbf16>, vector<512x128xf32> -> vector<512x128xf32>
    %c0_22 = arith.constant 0 : index
    %c0_23 = arith.constant 0 : index
    %29 = vector.load %arg11[%c0_22, %c0_23] : memref<1x128xf32, #tpu.memory_space<vmem>>, vector<1x128xf32>
    %30 = vector.broadcast %29 : vector<1x128xf32> to vector<512x128xf32>
    %31 = arith.addf %28, %30 : vector<512x128xf32>
    %cst_24 = arith.constant 0.000000e+00 : f32
    %32 = vector.broadcast %cst_24 : f32 to vector<512x128xf32>
    %33 = arith.maximumf %31, %32 : vector<512x128xf32>
    %34 = arith.truncf %33 : vector<512x128xf32> to vector<512x128xbf16>
    %c0_25 = arith.constant 0 : index
    %c0_26 = arith.constant 0 : index
    %35 = vector.load %arg12[%c0_25, %c0_26] : memref<128x256xbf16, #tpu.memory_space<vmem>>, vector<128x256xbf16>
    %cst_27 = arith.constant dense<0.000000e+00> : vector<512x256xf32>
    %36 = tpu.matmul %34, %35, %cst_27 {dimension_numbers = #tpu.dot_dimension_numbers<[1], [0], [0], [1], [0, 0, 1, 1], [], []>} : vector<512x128xbf16>, vector<128x256xbf16>, vector<512x256xf32> -> vector<512x256xf32>
    %c0_28 = arith.constant 0 : index
    %c0_29 = arith.constant 0 : index
    %37 = vector.load %arg13[%c0_28, %c0_29] : memref<1x256xf32, #tpu.memory_space<vmem>>, vector<1x256xf32>
    %38 = vector.broadcast %37 : vector<1x256xf32> to vector<512x256xf32>
    %39 = arith.addf %36, %38 : vector<512x256xf32>
    %cst_30 = arith.constant 0.000000e+00 : f32
    %40 = vector.broadcast %cst_30 : f32 to vector<512x256xf32>
    %41 = arith.maximumf %39, %40 : vector<512x256xf32>
    %42 = vector.shape_cast %41 : vector<512x256xf32> to vector<64x8x256xf32>
    %cst_31 = arith.constant dense<0xFF800000> : vector<8x256xf32>
    %43 = vector.multi_reduction <maximumf>, %42, %cst_31 [0] : vector<64x8x256xf32> to vector<8x256xf32>
    %c0_i32 = arith.constant 0 : i32
    %44 = arith.cmpi eq, %arg2, %c0_i32 : i32
    %45 = arith.extui %44 : i1 to i32
    %c0_i32_32 = arith.constant 0 : i32
    %46 = arith.cmpi ne, %45, %c0_i32_32 : i32
    scf.if %46 {
      %c0_37 = arith.constant 0 : index
      %c0_38 = arith.constant 0 : index
      %53 = vector.load %arg17[%c0_37, %c0_38] : memref<8x256xf32, #tpu.memory_space<vmem>>, vector<8x256xf32>
      tpu.vector_store %arg17[%c0_37, %c0_38], %43 {strides = array<i32>} : memref<8x256xf32, #tpu.memory_space<vmem>>, vector<8x256xf32>,
    } else {
    }
    %c0_i32_33 = arith.constant 0 : i32
    %47 = arith.cmpi sgt, %arg2, %c0_i32_33 : i32
    %48 = arith.extui %47 : i1 to i32
    %c0_i32_34 = arith.constant 0 : i32
    %49 = arith.cmpi ne, %48, %c0_i32_34 : i32
    scf.if %49 {
      %c0_37 = arith.constant 0 : index
      %c0_38 = arith.constant 0 : index
      %53 = vector.load %arg17[%c0_37, %c0_38] : memref<8x256xf32, #tpu.memory_space<vmem>>, vector<8x256xf32>
      %54 = arith.maximumf %53, %43 : vector<8x256xf32>
      %c0_39 = arith.constant 0 : index
      %c0_40 = arith.constant 0 : index
      %55 = vector.load %arg17[%c0_39, %c0_40] : memref<8x256xf32, #tpu.memory_space<vmem>>, vector<8x256xf32>
      tpu.vector_store %arg17[%c0_39, %c0_40], %54 {strides = array<i32>} : memref<8x256xf32, #tpu.memory_space<vmem>>, vector<8x256xf32>,
    } else {
    }
    %c0_i32_35 = arith.constant 0 : i32
    %50 = arith.cmpi eq, %arg2, %c0_i32_35 : i32
    %51 = arith.extui %50 : i1 to i32
    %c0_i32_36 = arith.constant 0 : i32
    %52 = arith.cmpi ne, %51, %c0_i32_36 : i32
    scf.if %52 {
      %c0_37 = arith.constant 0 : index
      %c0_38 = arith.constant 0 : index
      %53 = vector.load %arg17[%c0_37, %c0_38] : memref<8x256xf32, #tpu.memory_space<vmem>>, vector<8x256xf32>
      %cst_39 = arith.constant dense<0xFF800000> : vector<256xf32>
      %54 = vector.multi_reduction <maximumf>, %53, %cst_39 [0] : vector<8x256xf32> to vector<256xf32>
      %55 = vector.shape_cast %54 : vector<256xf32> to vector<1x256xf32>
      %56 = arith.truncf %55 : vector<1x256xf32> to vector<1x256xbf16>
      %c0_40 = arith.constant 0 : index
      %c0_41 = arith.constant 0 : index
      %57 = vector.load %arg14[%c0_40, %c0_41] : memref<256x256xbf16, #tpu.memory_space<vmem>>, vector<256x256xbf16>
      %cst_42 = arith.constant dense<0.000000e+00> : vector<1x256xf32>
      %58 = tpu.matmul %56, %57, %cst_42 {dimension_numbers = #tpu.dot_dimension_numbers<[1], [0], [0], [1], [0, 0, 1, 1], [], []>} : vector<1x256xbf16>, vector<256x256xbf16>, vector<1x256xf32> -> vector<1x256xf32>
      %c0_43 = arith.constant 0 : index
      %c0_44 = arith.constant 0 : index
      %59 = vector.load %arg15[%c0_43, %c0_44] : memref<1x256xf32, #tpu.memory_space<vmem>>, vector<1x256xf32>
      %60 = arith.addf %58, %59 : vector<1x256xf32>
      %cst_45 = arith.constant 0.000000e+00 : f32
      %61 = vector.broadcast %cst_45 : f32 to vector<1x256xf32>
      %62 = arith.maximumf %60, %61 : vector<1x256xf32>
      %c0_46 = arith.constant 0 : index
      %c0_47 = arith.constant 0 : index
      %c0_48 = arith.constant 0 : index
      %63 = vector.load %arg16[%c0_46, %c0_47, %c0_48] : memref<1x1x256xf32, #tpu.memory_space<vmem>>, vector<1x1x256xf32>
      %64 = vector.shape_cast %63 : vector<1x1x256xf32> to vector<1x256xf32>
      %65 = vector.shape_cast %62 : vector<1x256xf32> to vector<1x1x256xf32>
      tpu.vector_store %arg16[%c0_46, %c0_47, %c0_48], %65 {strides = array<i32>} : memref<1x1x256xf32, #tpu.memory_space<vmem>>, vector<1x1x256xf32>,
    } else {
    }
    return
  }
  func.func @transform_0(%arg0: i32, %arg1: i32, %arg2: i32) -> (i32, i32, i32) {
    %c1_i32 = arith.constant 1 : i32
    %0 = arith.muli %arg1, %c1_i32 : i32
    %1 = arith.addi %0, %arg2 : i32
    %c0_i32 = arith.constant 0 : i32
    %c0_i32_0 = arith.constant 0 : i32
    return %arg0, %1, %c0_i32 : i32, i32, i32
  }
  func.func @transform_1(%arg0: i32, %arg1: i32, %arg2: i32) -> (i32, i32) {
    %c0_i32 = arith.constant 0 : i32
    %c0_i32_0 = arith.constant 0 : i32
    %c0_i32_1 = arith.constant 0 : i32
    return %c0_i32, %c0_i32_0 : i32, i32
  }
  func.func @transform_2(%arg0: i32, %arg1: i32, %arg2: i32) -> (i32, i32) {
    %c0_i32 = arith.constant 0 : i32
    %c0_i32_0 = arith.constant 0 : i32
    %c0_i32_1 = arith.constant 0 : i32
    return %c0_i32, %c0_i32_0 : i32, i32
  }
  func.func @transform_3(%arg0: i32, %arg1: i32, %arg2: i32) -> (i32, i32) {
    %c0_i32 = arith.constant 0 : i32
    %c0_i32_0 = arith.constant 0 : i32
    %c0_i32_1 = arith.constant 0 : i32
    return %c0_i32, %c0_i32_0 : i32, i32
  }
  func.func @transform_4(%arg0: i32, %arg1: i32, %arg2: i32) -> (i32, i32) {
    %c0_i32 = arith.constant 0 : i32
    %c0_i32_0 = arith.constant 0 : i32
    %c0_i32_1 = arith.constant 0 : i32
    return %c0_i32, %c0_i32_0 : i32, i32
  }
  func.func @transform_5(%arg0: i32, %arg1: i32, %arg2: i32) -> (i32, i32) {
    %c0_i32 = arith.constant 0 : i32
    %c0_i32_0 = arith.constant 0 : i32
    %c0_i32_1 = arith.constant 0 : i32
    return %c0_i32, %c0_i32_0 : i32, i32
  }
  func.func @transform_6(%arg0: i32, %arg1: i32, %arg2: i32) -> (i32, i32) {
    %c0_i32 = arith.constant 0 : i32
    %c0_i32_0 = arith.constant 0 : i32
    %c0_i32_1 = arith.constant 0 : i32
    return %c0_i32, %c0_i32_0 : i32, i32
  }
  func.func @transform_7(%arg0: i32, %arg1: i32, %arg2: i32) -> (i32, i32) {
    %c0_i32 = arith.constant 0 : i32
    %c0_i32_0 = arith.constant 0 : i32
    %c0_i32_1 = arith.constant 0 : i32
    return %c0_i32, %c0_i32_0 : i32, i32
  }
  func.func @transform_8(%arg0: i32, %arg1: i32, %arg2: i32) -> (i32, i32) {
    %c0_i32 = arith.constant 0 : i32
    %c0_i32_0 = arith.constant 0 : i32
    %c0_i32_1 = arith.constant 0 : i32
    return %c0_i32, %c0_i32_0 : i32, i32
  }
  func.func @transform_9(%arg0: i32, %arg1: i32, %arg2: i32) -> (i32, i32) {
    %c0_i32 = arith.constant 0 : i32
    %c0_i32_0 = arith.constant 0 : i32
    %c0_i32_1 = arith.constant 0 : i32
    return %c0_i32, %c0_i32_0 : i32, i32
  }
  func.func @transform_10(%arg0: i32, %arg1: i32, %arg2: i32) -> (i32, i32) {
    %c0_i32 = arith.constant 0 : i32
    %c0_i32_0 = arith.constant 0 : i32
    %c0_i32_1 = arith.constant 0 : i32
    return %c0_i32, %c0_i32_0 : i32, i32
  }
  func.func @transform_11(%arg0: i32, %arg1: i32, %arg2: i32) -> (i32, i32) {
    %c0_i32 = arith.constant 0 : i32
    %c0_i32_0 = arith.constant 0 : i32
    %c0_i32_1 = arith.constant 0 : i32
    return %c0_i32, %c0_i32_0 : i32, i32
  }
  func.func @transform_12(%arg0: i32, %arg1: i32, %arg2: i32) -> (i32, i32) {
    %c0_i32 = arith.constant 0 : i32
    %c0_i32_0 = arith.constant 0 : i32
    %c0_i32_1 = arith.constant 0 : i32
    return %c0_i32, %c0_i32_0 : i32, i32
  }
  func.func @transform_13(%arg0: i32, %arg1: i32, %arg2: i32) -> (i32, i32, i32) {
    %c1_i32 = arith.constant 1 : i32
    %0 = arith.muli %arg0, %c1_i32 : i32
    %1 = arith.addi %0, %arg1 : i32
    %c0_i32 = arith.constant 0 : i32
    %c0_i32_0 = arith.constant 0 : i32
    %c0_i32_1 = arith.constant 0 : i32
    return %1, %c0_i32, %c0_i32_0 : i32, i32, i32
  }
}

</mosaic_0001>

<bundles_post_ra>
// kernel: _lambda_.1
= control target key start
LH: loop header
LB: loop body
LE: loop exit
PB: predicated region body
PF: predicated region fallthrough
CT: control target
= control target key end

     0   :  { %s5633_s0 = inlined_call_operand.vmem [shape: f32[2,512,8], index: 0, kind: input, shape index: {}]   ;;  %s5634_s1 = inlined_call_operand.vmem [shape: bf16[8,64], index: 1, kind: input, shape index: {}]   ;;  %s5635_s2 = inlined_call_operand.vmem [shape: f32[1,64], index: 2, kind: input, shape index: {}]   ;;  %s5636_s3 = inlined_call_operand.vmem [shape: bf16[64,64], index: 3, kind: input, shape index: {}]   ;;  %s5637_s4 = inlined_call_operand.vmem [shape: f32[1,64], index: 4, kind: input, shape index: {}]   ;;  %s5638_s5 = inlined_call_operand.vmem [shape: bf16[64,64], index: 5, kind: input, shape index: {}]   ;;  %s5639_s6 = inlined_call_operand.vmem [shape: f32[1,64], index: 6, kind: input, shape index: {}]   ;;  %s5640_s7 = inlined_call_operand.vmem [shape: bf16[64,128], index: 7, kind: input, shape index: {}]   ;;  %s5641_s8 = inlined_call_operand.vmem [shape: f32[1,128], index: 8, kind: input, shape index: {}]   ;;  %s5642_s9 = inlined_call_operand.vmem [shape: bf16[128,256], index: 9, kind: input, shape index: {}]   ;;  %s5643_s10 = inlined_call_operand.vmem [shape: f32[1,256], index: 10, kind: input, shape index: {}]   ;;  %s5644_s11 = inlined_call_operand.vmem [shape: bf16[256,256], index: 11, kind: input, shape index: {}]   ;;  %s5645_s12 = inlined_call_operand.vmem [shape: f32[1,256], index: 12, kind: input, shape index: {}]   ;;  %s5646_s13 = inlined_call_operand.hbm [shape: f32[2,1,256], index: 13, kind: output, shape index: {}]  }
   0x1   :  { %5649 = sst [smem:[#allocation8_spill]] %s5633_s0 }
   0x2   :  { %5650 = sst [smem:[#allocation9_spill]] %s5634_s1 }
   0x3   :  { %5651 = sst [smem:[#allocation10_spill]] %s5635_s2 }
   0x4   :  { %18 = vsyncpa [#allocation4], 0 }
   0x5   :  { %20 = vsyncpa [#allocation4 + $0x1], 0  ;;  %s4672_s25 = smov 0   ;;  %s4674_s26 = smov 0  }
   0x6   :  { %s4676_s27 = smov 0   ;;  %s4678_s28 = smov 0  }
   0x7   :  { %s4680_s29 = smov 0   ;;  %s4682_s30 = smov 0  }
   0x8 LB: > { %5652 = sst [smem:[#allocation6_spill]] %s4593_s29  ;;  %s3749_s14 = sadd.s32 4294967295, %s4597_s30   ;;  %s4597_s30 = sphi %s4682_s30, %s26_s30   ;;  %s4593_s29 = sphi %s4680_s29, %s5660_s29   ;;  %s4589_s28 = sphi %s4678_s28, %s5659_s28   ;;  %s4585_s27 = sphi %s4676_s27, %s5663_s27   ;;  %s4581_s26 = sphi %s4674_s26, %s5662_s26   ;;  %s4577_s25 = sphi %s4672_s25, %s5661_s25  }
   0x9   : > { %s3750_s15 = sadd.s32 4294967294, %s4597_s30   ;;  %s45_s16 = sadd.s32 1, %s4593_s29 }
   0xa   : > { %s336_s17 = sadd.s32 1, %s4585_s27  ;;  %p47_p0 = scmp.ge.s32.totalorder %s45_s16, 2 }
   0xb   : > { %p346_p1 = scmp.ne.s32.totalorder %s4585_s27, %s4581_s26  ;;  %p347_p2 = scmp.eq.s32.totalorder %s3749_s14, 1 }
   0xc   : > { %p352_p3 = scmp.ne.s32.totalorder %s4581_s26, %s4577_s25  ;;  %s5665_s16 = smov (%p47_p0, %s45_s16), 0 }
   0xd   : > { %5653 = sst [smem:[#allocation7_spill]] %s5665_s16  ;;  %p4712_p4 = por %p347_p2, %p346_p1 }
   0xe   : > { %p353_p5 = scmp.eq.s32.totalorder %s3750_s15, 1  ;;  %s333_s19 = ssub.s32 %s4593_s29, %s5665_s16 }
   0xf   : > { %p3753_p6 = scmp.ge.s32.totalorder %s4597_s30, 1  ;;  %p334_p7 = scmp.eq.s32.totalorder %s333_s19, 0 }
  0x10   : > { %p4719_p8 = por %p353_p5, %p352_p3  ;;  %p422_p9 = scmp.lt.s32.totalorder %s4597_s30, 3 }
  0x11   : > { %s4725_s21 = scalar_select %p334_p7, %s4585_s27, %s336_s17  }
  0x12   : > { %p423_p10 = pnand %p3753_p6, %p422_p9 }
  0x13   : > { %s5656_s1 = sld [smem:[#allocation9_spill]] (!%p423_p10)  ;;  %p473_p11 = scmp.lt.s32.totalorder (!%p423_p10), %s4589_s28, 1 }
  0x14   : > { %426 = sbr.rel (%p423_p10) target bundleno = 1544 (0x608), region = 72  ;;  %s5657_s0 = sld [smem:[#allocation8_spill]] (!%p423_p10) }
  0x15   : > { %s5658_s2 = sld [smem:[#allocation10_spill]] (!%p423_p10)  ;;  %s468_s24 = sand.u32 (!%p423_p10), 1, %s4581_s26  }
  0x16   : > { %s3754_s14 = sshll.u32 (!%p423_p10), %s468_s24, 1  ;;  %s3657_s22 = scalar_lea.sflag (!%p423_p10), [#allocation4], %s468_s24 }
  0x19   : > { %v581_v0 = vld [vmem:[%s5656_s1] sm:$0xf]  ;;  %vm686_vm0 = vcmask 1043456   ;;  %v4437_v1 = vld [vmem:[%s5636_s3 + $0x18] sm:$0xff]   ;;  %s474_s15 = scalar_select %p473_p11, %s4589_s28, 1  ;;  %vm589_vm1 = vcmask 64512  }
  0x1a   : > { %4379 = vmatprep.subr.msk.bf16.mxu1 %vm686_vm0, %v581_v0  ;;  %v688_v2 = vsel %vm686_vm0, %v581_v0, 0  ;;  %v4438_v12 = vld [vmem:[%s5636_s3 + $0x10] sm:$0xff]   ;;  %v4439_v17 = vld [vmem:[%s5636_s3 + $0x8] sm:$0xff]   ;;  %v4440_v20 = vld [vmem:[%s5636_s3] sm:$0xff]   ;;  %vm1114_vm2 = vcmask 523264   ;;  %s4601_s1 = smov [#allocation3]  }
  0x1b   : > { %4098 = vmatpush3.bf16.msra.mxu1 %v688_v2  ;;  %s3954_s17 = sshll.u32 %s474_s15, 9  ;;  %s3955_s15 = sshll.u32 %s4589_s28, 5 }
  0x1c   : > { %4163 = vmatprep.subr.bf16.mxu1 %v4437_v1  ;;  %s4738_s29 = scalar_lea.vmem %s5657_s0, %s3954_s17  ;;  %s470_s17 = scalar_lea.vmem [#allocation3], %s3754_s14 }
  0x1d   : > { %v485_v3 = vld [vmem:[%s4738_s29] sm:$0xff]  ;;  %v486_v4 = vld [vmem:[%s4738_s29 + $0x8] sm:$0xff]  ;;  %v487_v5 = vld [vmem:[%s4738_s29 + $0x10] sm:$0xff]  ;;  %s3672_s0 = sshll.u32 %s470_s17, 4  ;;  %s4525_s28 = sshll.u32 %s4601_s1, 4  ;;  %s3673_s0 = int_to_ptr.vmem [resolvable:$true] %s3672_s0  ;;  %s4526_s28 = int_to_ptr.vmem [resolvable:$false] %s4525_s28 }
  0x1e   : > { %v549_v6 = vpack.c.bf16 %v486_v4, %v485_v3  ;;  %v488_v7 = vld [vmem:[%s4738_s29 + $0x18] sm:$0xff]  ;;  %v489_v8 = vld [vmem:[%s4738_s29 + $0x20] sm:$0xff]  ;;  %v490_v9 = vld [vmem:[%s4738_s29 + $0x28] sm:$0xff]  ;;  %s4521_s23 = scalar_lea.vmem %s3673_s0, 32  ;;  %s4527_s14 = scalar_lea.vmem %s4526_s28, 64 }
  0x1f   : > { %v550_v10 = vpack.c.bf16 %v488_v7, %v487_v5  ;;  %v551_v11 = vpack.c.bf16 %v490_v9, %v489_v8  ;;  %v491_v13 = vld [vmem:[%s4738_s29 + $0x30] sm:$0xff]  ;;  %v492_v14 = vld [vmem:[%s4738_s29 + $0x38] sm:$0xff]  ;;  %v493_v15 = vld [vmem:[%s4738_s29 + $0x40] sm:$0xff]  ;;  %p4522_p12 = scmp.ne.s32.totalorder %s3673_s0, %s4521_s23  ;;  %p4528_p1 = scmp.lt.s32.totalorder %s3673_s0, %s4526_s28 }
  0x20   : > { %4099 = vmatprep.mubr.msk.bf16.mxu1 %vm589_vm1, %v549_v6  ;;  %v494_v16 = vld [vmem:[%s4738_s29 + $0x48] sm:$0xff]  ;;  %v552_v18 = vpack.c.bf16 %v492_v14, %v491_v13  ;;  %v495_v21 = vld [vmem:[%s4738_s29 + $0x50] sm:$0xff]  ;;  %v496_v22 = vld [vmem:[%s4738_s29 + $0x58] sm:$0xff]  ;;  %p4529_p2 = scmp.lt.s32.totalorder %s4527_s14, %s4521_s23 }
  0x21   : > { %4100 = vmatmul.mubr.msk.bf16.vlgmr.msra.gmra.mxu1 %vm589_vm1, %v550_v10  ;;  %v553_v19 = vpack.c.bf16 %v494_v16, %v493_v15  ;;  %v497_v23 = vld [vmem:[%s4738_s29 + $0x60] sm:$0xff]  ;;  %v498_v24 = vld [vmem:[%s4738_s29 + $0x68] sm:$0xff]  ;;  %v554_v25 = vpack.c.bf16 %v496_v22, %v495_v21  ;;  %v499_v27 = vld [vmem:[%s4738_s29 + $0x70] sm:$0xff]  ;;  %p4523_p13 = pnand %p4522_p12, %p4712_p4 }
  0x22   : > { %4103 = vmatprep.mubr.msk.bf16.mxu1 %vm589_vm1, %v551_v11  ;;  %4164 = vmatpush3.bf16.msra.mxu1 %v4437_v1  ;;  %v555_v26 = vpack.c.bf16 %v498_v24, %v497_v23  ;;  %v500_v28 = vld [vmem:[%s4738_s29 + $0x78] sm:$0xff]  ;;  %v501_v29 = vld [vmem:[%s4738_s29 + $0x80] sm:$0xff]  ;;  %v502_v30 = vld [vmem:[%s4738_s29 + $0x88] sm:$0xff]  ;;  %p4530_p3 = por %p4529_p2, %p4528_p1 }
  0x23   : > { %4165 = vmatprep.subr.bf16.mxu1 %v4438_v12  ;;  %v556_v31 = vpack.c.bf16 %v500_v28, %v499_v27  ;;  %v557_v32 = vpack.c.bf16 %v502_v30, %v501_v29  ;;  %v503_v33 = vld [vmem:[%s4738_s29 + $0x90] sm:$0xff]  ;;  %v504_v34 = vld [vmem:[%s4738_s29 + $0x98] sm:$0xff]  ;;  %v505_v35 = vld [vmem:[%s4738_s29 + $0xa0] sm:$0xff]  ;;  %p4524_p0 = pneg %p4523_p13 }
  0x24   : > { %v506_v36 = vld [vmem:[%s4738_s29 + $0xa8] sm:$0xff]  ;;  %v558_v37 = vpack.c.bf16 %v504_v34, %v503_v33  ;;  %v507_v39 = vld [vmem:[%s4738_s29 + $0xb0] sm:$0xff]  ;;  %v508_v40 = vld [vmem:[%s4738_s29 + $0xb8] sm:$0xff] }
  0x25   : > { %v559_v38 = vpack.c.bf16 %v506_v36, %v505_v35  ;;  %v509_v41 = vld [vmem:[%s4738_s29 + $0xc0] sm:$0xff]  ;;  %v510_v42 = vld [vmem:[%s4738_s29 + $0xc8] sm:$0xff]  ;;  %v560_v43 = vpack.c.bf16 %v508_v40, %v507_v39  ;;  %v511_v45 = vld [vmem:[%s4738_s29 + $0xd0] sm:$0xff]  ;;  %p4531_p5 = pnand %p4530_p3, %p4524_p0 }
  0x26   : > { %4166 = vmatpush3.bf16.msra.mxu1 %v4438_v12  ;;  %v561_v44 = vpack.c.bf16 %v510_v42, %v509_v41  ;;  %v512_v46 = vld [vmem:[%s4738_s29 + $0xd8] sm:$0xff]  ;;  %v513_v47 = vld [vmem:[%s4738_s29 + $0xe0] sm:$0xff]  ;;  %v514_v48 = vld [vmem:[%s4738_s29 + $0xe8] sm:$0xff] }
  0x27   : > { %4167 = vmatprep.subr.bf16.mxu1 %v4439_v17  ;;  %v562_v49 = vpack.c.bf16 %v512_v46, %v511_v45  ;;  %v563_v50 = vpack.c.bf16 %v514_v48, %v513_v47  ;;  %v515_v51 = vld [vmem:[%s4738_s29 + $0xf0] sm:$0xff]  ;;  %v516_v52 = vld [vmem:[%s4738_s29 + $0xf8] sm:$0xff]  ;;  %v517_v53 = vld [vmem:[%s4738_s29 + $0x100] sm:$0xff] }
  0x28   : > { %v518_v54 = vld [vmem:[%s4738_s29 + $0x108] sm:$0xff]  ;;  %v564_v55 = vpack.c.bf16 %v516_v52, %v515_v51  ;;  %v519_v57 = vld [vmem:[%s4738_s29 + $0x110] sm:$0xff]  ;;  %v520_v58 = vld [vmem:[%s4738_s29 + $0x118] sm:$0xff] }
  0x29   : > { %4104 = vmatmul.mubr.msk.bf16.gmra.mxu1 %vm589_vm1, %v552_v18  ;;  %v565_v56 = vpack.c.bf16 %v518_v54, %v517_v53  ;;  %v521_v59 = vld [vmem:[%s4738_s29 + $0x120] sm:$0xff]  ;;  %v522_v60 = vld [vmem:[%s4738_s29 + $0x128] sm:$0xff]  ;;  %v566_v61 = vpack.c.bf16 %v520_v58, %v519_v57  ;;  %v523_v63 = vld [vmem:[%s4738_s29 + $0x130] sm:$0xff] }
  0x2a   : > { %4107 = vmatprep.mubr.msk.bf16.mxu1 %vm589_vm1, %v553_v19  ;;  %4168 = vmatpush3.bf16.msra.mxu1 %v4439_v17  ;;  %v567_v62 = vpack.c.bf16 %v522_v60, %v521_v59  ;;  %v524_v0 = vld [vmem:[%s4738_s29 + $0x138] sm:$0xff]  ;;  %v525_v1 = vld [vmem:[%s4738_s29 + $0x140] sm:$0xff]  ;;  %v526_v2 = vld [vmem:[%s4738_s29 + $0x148] sm:$0xff] }
  0x2b   : > { %4169 = vmatprep.subr.bf16.mxu1 %v4440_v20  ;;  %v568_v3 = vpack.c.bf16 %v524_v0, %v523_v63  ;;  %v569_v4 = vpack.c.bf16 %v526_v2, %v525_v1  ;;  %v527_v5 = vld [vmem:[%s4738_s29 + $0x150] sm:$0xff]  ;;  %v528_v6 = vld [vmem:[%s4738_s29 + $0x158] sm:$0xff]  ;;  %v529_v7 = vld [vmem:[%s4738_s29 + $0x160] sm:$0xff] }
  0x2c   : > { %v530_v8 = vld [vmem:[%s4738_s29 + $0x168] sm:$0xff]  ;;  %v570_v9 = vpack.c.bf16 %v528_v6, %v527_v5  ;;  %v531_v11 = vld [vmem:[%s4738_s29 + $0x170] sm:$0xff]  ;;  %v532_v12 = vld [vmem:[%s4738_s29 + $0x178] sm:$0xff] }
  0x2d   : > { %v571_v10 = vpack.c.bf16 %v530_v8, %v529_v7  ;;  %v533_v13 = vld [vmem:[%s4738_s29 + $0x180] sm:$0xff]  ;;  %v534_v14 = vld [vmem:[%s4738_s29 + $0x188] sm:$0xff]  ;;  %v572_v15 = vpack.c.bf16 %v532_v12, %v531_v11  ;;  %v535_v17 = vld [vmem:[%s4738_s29 + $0x190] sm:$0xff] }
  0x2e   : > { %4170 = vmatpush3.bf16.msra.mxu1 %v4440_v20  ;;  %v573_v16 = vpack.c.bf16 %v534_v14, %v533_v13  ;;  %v536_v18 = vld [vmem:[%s4738_s29 + $0x198] sm:$0xff]  ;;  %v537_v19 = vld [vmem:[%s4738_s29 + $0x1a0] sm:$0xff]  ;;  %v538_v20 = vld [vmem:[%s4738_s29 + $0x1a8] sm:$0xff] }
  0x2f   : > { %v574_v21 = vpack.c.bf16 %v536_v18, %v535_v17  ;;  %v575_v22 = vpack.c.bf16 %v538_v20, %v537_v19  ;;  %v539_v23 = vld [vmem:[%s4738_s29 + $0x1b0] sm:$0xff]  ;;  %v540_v24 = vld [vmem:[%s4738_s29 + $0x1b8] sm:$0xff]  ;;  %v4848_v40 = vld [vmem:[%s5658_s2] ss:$0 sm:$0xff] }
  0x30   : > { %v576_v27 = vpack.c.bf16 %v540_v24, %v539_v23  ;;  %v543_v29 = vld [vmem:[%s4738_s29 + $0x1d0] sm:$0xff]  ;;  %v544_v30 = vld [vmem:[%s4738_s29 + $0x1d8] sm:$0xff] }
  0x31   : > { %4108 = vmatmul.mubr.msk.bf16.gmra.mxu1 %vm589_vm1, %v554_v25  ;;  %v541_v25 = vld [vmem:[%s4738_s29 + $0x1c0] sm:$0xff]  ;;  %v578_v33 = vpack.c.bf16 %v544_v30, %v543_v29  ;;  %v547_v35 = vld [vmem:[%s4738_s29 + $0x1f0] sm:$0xff]  ;;  %v548_v36 = vld [vmem:[%s4738_s29 + $0x1f8] sm:$0xff] }
  0x32   : > { %4111 = vmatprep.mubr.msk.bf16.mxu1 %vm589_vm1, %v555_v26  ;;  %v542_v26 = vld [vmem:[%s4738_s29 + $0x1c8] sm:$0xff]  ;;  %v4441_v46 = vld [vmem:[%s5638_s5 + $0x18] sm:$0xff]  }
  0x33   : > { %v577_v28 = vpack.c.bf16 %v542_v26, %v541_v25  ;;  %4235 = vmatprep.subr.bf16.mxu0 %v4441_v46 }
  0x34   : > { %4236 = vmatpush3.bf16.msra.mxu0 %v4441_v46 }
  0x39   : > { %4112 = vmatmul.mubr.msk.bf16.gmra.mxu1 %vm589_vm1, %v556_v31  ;;  %v545_v31 = vld [vmem:[%s4738_s29 + $0x1e0] sm:$0xff] }
  0x3a   : > { %4115 = vmatprep.mubr.msk.bf16.mxu1 %vm589_vm1, %v557_v32  ;;  %v546_v32 = vld [vmem:[%s4738_s29 + $0x1e8] sm:$0xff]  ;;  %s3670_s29 = scalar_lea.hbm %s5646_s13, %s3955_s15 }
  0x3b   : > { %v579_v34 = vpack.c.bf16 %v546_v32, %v545_v31 }
  0x41   : > { %4116 = vmatmul.mubr.msk.bf16.gmra.mxu1 %vm589_vm1, %v558_v37  ;;  %v580_v37 = vpack.c.bf16 %v548_v36, %v547_v35 }
  0x42   : > { %4119 = vmatprep.mubr.msk.bf16.mxu1 %vm589_vm1, %v559_v38 }
  0x49   : > { %4120 = vmatmul.mubr.msk.bf16.gmra.mxu1 %vm589_vm1, %v560_v43 }
  0x4a   : > { %4123 = vmatprep.mubr.msk.bf16.mxu1 %vm589_vm1, %v561_v44 }
  0x51   : > { %4124 = vmatmul.mubr.msk.bf16.gmra.mxu1 %vm589_vm1, %v562_v49 }
  0x52   : > { %4127 = vmatprep.mubr.msk.bf16.mxu1 %vm589_vm1, %v563_v50 }
  0x59   : > { %4128 = vmatmul.mubr.msk.bf16.gmra.mxu1 %vm589_vm1, %v564_v55 }
  0x5a   : > { %4131 = vmatprep.mubr.msk.bf16.mxu1 %vm589_vm1, %v565_v56 }
  0x61   : > { %4132 = vmatmul.mubr.msk.bf16.gmra.mxu1 %vm589_vm1, %v566_v61 }
  0x62   : > { %4135 = vmatprep.mubr.msk.bf16.mxu1 %vm589_vm1, %v567_v62 }
  0x69   : > { %4136 = vmatmul.mubr.msk.bf16.gmra.mxu1 %vm589_vm1, %v568_v3 }
  0x6a   : > { %4139 = vmatprep.mubr.msk.bf16.mxu1 %vm589_vm1, %v569_v4 }
  0x71   : > { %4140 = vmatmul.mubr.msk.bf16.gmra.mxu1 %vm589_vm1, %v570_v9 }
  0x72   : > { %4143 = vmatprep.mubr.msk.bf16.mxu1 %vm589_vm1, %v571_v10 }
  0x79   : > { %4144 = vmatmul.mubr.msk.bf16.gmra.mxu1 %vm589_vm1, %v572_v15 }
  0x7a   : > { %4147 = vmatprep.mubr.msk.bf16.mxu1 %vm589_vm1, %v573_v16 }
  0x81   : > { %4148 = vmatmul.mubr.msk.bf16.gmra.mxu1 %vm589_vm1, %v574_v21 }
  0x82   : > { %4151 = vmatprep.mubr.msk.bf16.mxu1 %vm589_vm1, %v575_v22 }
  0x89   : > { %4152 = vmatmul.mubr.msk.bf16.gmra.mxu1 %vm589_vm1, %v576_v27 }
  0x8a   : > { %4155 = vmatprep.mubr.msk.bf16.mxu1 %vm589_vm1, %v577_v28 }
  0x91   : > { %4156 = vmatmul.mubr.msk.bf16.gmra.mxu1 %vm589_vm1, %v578_v33 }
  0x92   : > { %4159 = vmatprep.mubr.msk.bf16.mxu1 %vm589_vm1, %v579_v34 }
  0x99   : > { %4160 = vmatmul.mubr.msk.bf16.gmra.mxu1 %vm589_vm1, %v580_v37 }
  0xe1   : > { %v4101_v38 = vpop.f32.mrf.mxu1 }
  0xe2   : > { %v733_v44 = vadd.f32 %v4101_v38, %v4848_v40 }
  0xe3   : > { %v724_v39 = vpop.f32.mrf.mxu1 }
  0xe4   : > { %v725_v42 = vadd.f32 %v4848_v40, %v724_v39  ;;  %v981_v52 = vmax.f32 %v733_v44, 0.0 }
  0xe5   : > { %v4102_v41 = vpop.f32.mrf.mxu1 }
  0xe6   : > { %v736_v43 = vadd.f32 %v4102_v41, %v4848_v40  ;;  %v979_v50 = vmax.f32 %v725_v42, 0.0 }
  0xe7   : > { %v727_v45 = vpop.f32.mrf.mxu1 }
  0xe8   : > { %v728_v47 = vadd.f32 %v4848_v40, %v727_v45  ;;  %v982_v48 = vmax.f32 %v736_v43, 0.0 }
  0xe9   : > { %v4105_v49 = vpop.f32.mrf.mxu1 }
  0xea   : > { %v980_v51 = vmax.f32 %v728_v47, 0.0  ;;  %v749_v53 = vadd.f32 %v4105_v49, %v4848_v40  ;;  %v1044_v57 = vpack.c.bf16 %v982_v48, %v981_v52 }
  0xeb   : > { %v740_v54 = vpop.f32.mrf.mxu1 }
  0xec   : > { %v1043_v55 = vpack.c.bf16 %v980_v51, %v979_v50  ;;  %v741_v56 = vadd.f32 %v4848_v40, %v740_v54  ;;  %v985_v60 = vmax.f32 %v749_v53, 0.0 }
  0xed   : > { %v4106_v58 = vpop.f32.mrf.mxu1 }
  0xee   : > { %v752_v59 = vadd.f32 %v4106_v58, %v4848_v40  ;;  %4171 = vmatprep.mubr.msk.bf16.mxu1 %vm1114_vm2, %v1043_v55  ;;  %v983_v62 = vmax.f32 %v741_v56, 0.0 }
  0xef   : > { %v743_v61 = vpop.f32.mrf.mxu1  ;;  %4172 = vmatmul.mubr.msk.bf16.vlgmr.msra.gmra.mxu1 %vm1114_vm2, %v1044_v57 }
  0xf0   : > { %v986_v63 = vmax.f32 %v752_v59, 0.0  ;;  %v744_v0 = vadd.f32 %v4848_v40, %v743_v61 }
  0xf1   : > { %v4109_v1 = vpop.f32.mrf.mxu1 }
  0xf2   : > { %v984_v2 = vmax.f32 %v744_v0, 0.0  ;;  %v1046_v3 = vpack.c.bf16 %v986_v63, %v985_v60  ;;  %v765_v4 = vadd.f32 %v4109_v1, %v4848_v40 }
  0xf3   : > { %v756_v5 = vpop.f32.mrf.mxu1 }
  0xf4   : > { %v1045_v6 = vpack.c.bf16 %v984_v2, %v983_v62  ;;  %v757_v7 = vadd.f32 %v4848_v40, %v756_v5  ;;  %v989_v10 = vmax.f32 %v765_v4, 0.0 }
  0xf5   : > { %v4110_v8 = vpop.f32.mrf.mxu1 }
  0xf6   : > { %v768_v9 = vadd.f32 %v4110_v8, %v4848_v40  ;;  %4175 = vmatprep.mubr.msk.bf16.mxu1 %vm1114_vm2, %v1045_v6  ;;  %v987_v12 = vmax.f32 %v757_v7, 0.0 }
  0xf7   : > { %v759_v11 = vpop.f32.mrf.mxu1  ;;  %4176 = vmatmul.mubr.msk.bf16.gmra.mxu1 %vm1114_vm2, %v1046_v3 }
  0xf8   : > { %v990_v13 = vmax.f32 %v768_v9, 0.0  ;;  %v760_v14 = vadd.f32 %v4848_v40, %v759_v11 }
  0xf9   : > { %v4113_v15 = vpop.f32.mrf.mxu1 }
  0xfa   : > { %v988_v16 = vmax.f32 %v760_v14, 0.0  ;;  %v1048_v17 = vpack.c.bf16 %v990_v13, %v989_v10  ;;  %v781_v18 = vadd.f32 %v4113_v15, %v4848_v40 }
  0xfb   : > { %v772_v19 = vpop.f32.mrf.mxu1 }
  0xfc   : > { %v1047_v20 = vpack.c.bf16 %v988_v16, %v987_v12  ;;  %v773_v21 = vadd.f32 %v4848_v40, %v772_v19  ;;  %v993_v24 = vmax.f32 %v781_v18, 0.0 }
  0xfd   : > { %v4114_v22 = vpop.f32.mrf.mxu1 }
  0xfe   : > { %v784_v23 = vadd.f32 %v4114_v22, %v4848_v40  ;;  %4179 = vmatprep.mubr.msk.bf16.mxu1 %vm1114_vm2, %v1047_v20  ;;  %v991_v26 = vmax.f32 %v773_v21, 0.0 }
  0xff   : > { %v775_v25 = vpop.f32.mrf.mxu1  ;;  %4180 = vmatmul.mubr.msk.bf16.gmra.mxu1 %vm1114_vm2, %v1048_v17 }
 0x100   : > { %v994_v27 = vmax.f32 %v784_v23, 0.0  ;;  %v776_v28 = vadd.f32 %v4848_v40, %v775_v25 }
 0x101   : > { %v4117_v29 = vpop.f32.mrf.mxu1 }
 0x102   : > { %v992_v30 = vmax.f32 %v776_v28, 0.0  ;;  %v1050_v31 = vpack.c.bf16 %v994_v27, %v993_v24  ;;  %v797_v32 = vadd.f32 %v4117_v29, %v4848_v40 }
 0x103   : > { %v788_v33 = vpop.f32.mrf.mxu1 }
 0x104   : > { %v1049_v34 = vpack.c.bf16 %v992_v30, %v991_v26  ;;  %v789_v35 = vadd.f32 %v4848_v40, %v788_v33  ;;  %v997_v38 = vmax.f32 %v797_v32, 0.0 }
 0x105   : > { %v4118_v36 = vpop.f32.mrf.mxu1 }
 0x106   : > { %4183 = vmatprep.mubr.msk.bf16.mxu1 %vm1114_vm2, %v1049_v34  ;;  %v800_v37 = vadd.f32 %v4118_v36, %v4848_v40  ;;  %v995_v41 = vmax.f32 %v789_v35, 0.0 }
 0x107   : > { %4184 = vmatmul.mubr.msk.bf16.gmra.mxu1 %vm1114_vm2, %v1050_v31  ;;  %v791_v39 = vpop.f32.mrf.mxu1 }
 0x108   : > { %v998_v42 = vmax.f32 %v800_v37, 0.0  ;;  %v792_v43 = vadd.f32 %v4848_v40, %v791_v39 }
 0x109   : > { %v4121_v44 = vpop.f32.mrf.mxu1 }
 0x10a   : > { %v996_v45 = vmax.f32 %v792_v43, 0.0  ;;  %v1052_v46 = vpack.c.bf16 %v998_v42, %v997_v38  ;;  %v813_v47 = vadd.f32 %v4121_v44, %v4848_v40 }
 0x10b   : > { %v804_v48 = vpop.f32.mrf.mxu1 }
 0x10c   : > { %v1051_v49 = vpack.c.bf16 %v996_v45, %v995_v41  ;;  %v805_v50 = vadd.f32 %v4848_v40, %v804_v48  ;;  %v1001_v53 = vmax.f32 %v813_v47, 0.0  ;;  %v4442_v48 = vld [vmem:[%s5638_s5 + $0x10] sm:$0xff]  }
 0x10d   : > { %v4122_v51 = vpop.f32.mrf.mxu1  ;;  %4237 = vmatprep.subr.bf16.mxu0 %v4442_v48 }
 0x10e   : > { %4187 = vmatprep.mubr.msk.bf16.mxu1 %vm1114_vm2, %v1051_v49  ;;  %v816_v52 = vadd.f32 %v4122_v51, %v4848_v40  ;;  %v999_v55 = vmax.f32 %v805_v50, 0.0  ;;  %4238 = vmatpush3.bf16.msra.mxu0 %v4442_v48 }
 0x10f   : > { %4188 = vmatmul.mubr.msk.bf16.gmra.mxu1 %vm1114_vm2, %v1052_v46  ;;  %v807_v54 = vpop.f32.mrf.mxu1 }
 0x110   : > { %v1002_v56 = vmax.f32 %v816_v52, 0.0  ;;  %v808_v57 = vadd.f32 %v4848_v40, %v807_v54 }
 0x111   : > { %v4125_v58 = vpop.f32.mrf.mxu1 }
 0x112   : > { %v1000_v59 = vmax.f32 %v808_v57, 0.0  ;;  %v1054_v60 = vpack.c.bf16 %v1002_v56, %v1001_v53  ;;  %v829_v61 = vadd.f32 %v4125_v58, %v4848_v40  ;;  %v4443_v57 = vld [vmem:[%s5638_s5 + $0x8] sm:$0xff]  }
 0x113   : > { %v820_v62 = vpop.f32.mrf.mxu1  ;;  %4239 = vmatprep.subr.bf16.mxu0 %v4443_v57 }
 0x114   : > { %v1053_v63 = vpack.c.bf16 %v1000_v59, %v999_v55  ;;  %v821_v0 = vadd.f32 %v4848_v40, %v820_v62  ;;  %v1005_v3 = vmax.f32 %v829_v61, 0.0  ;;  %4240 = vmatpush3.bf16.msra.mxu0 %v4443_v57 }
 0x115   : > { %v4126_v1 = vpop.f32.mrf.mxu1 }
 0x116   : > { %4191 = vmatprep.mubr.msk.bf16.mxu1 %vm1114_vm2, %v1053_v63  ;;  %v832_v2 = vadd.f32 %v4126_v1, %v4848_v40  ;;  %v1003_v5 = vmax.f32 %v821_v0, 0.0  ;;  %v4444_v0 = vld [vmem:[%s5638_s5] sm:$0xff]  }
 0x117   : > { %4192 = vmatmul.mubr.msk.bf16.gmra.mxu1 %vm1114_vm2, %v1054_v60  ;;  %v823_v4 = vpop.f32.mrf.mxu1  ;;  %4241 = vmatprep.subr.bf16.mxu0 %v4444_v0 }
 0x118   : > { %v1006_v6 = vmax.f32 %v832_v2, 0.0  ;;  %v824_v7 = vadd.f32 %v4848_v40, %v823_v4  ;;  %4242 = vmatpush3.bf16.msra.mxu0 %v4444_v0 }
 0x119   : > { %v4129_v8 = vpop.f32.mrf.mxu1 }
 0x11a   : > { %v1004_v9 = vmax.f32 %v824_v7, 0.0  ;;  %v1056_v10 = vpack.c.bf16 %v1006_v6, %v1005_v3  ;;  %v845_v11 = vadd.f32 %v4129_v8, %v4848_v40 }
 0x11b   : > { %v836_v12 = vpop.f32.mrf.mxu1 }
 0x11c   : > { %v1055_v13 = vpack.c.bf16 %v1004_v9, %v1003_v5  ;;  %v837_v14 = vadd.f32 %v4848_v40, %v836_v12  ;;  %v1009_v17 = vmax.f32 %v845_v11, 0.0 }
 0x11d   : > { %v4130_v15 = vpop.f32.mrf.mxu1 }
 0x11e   : > { %4195 = vmatprep.mubr.msk.bf16.mxu1 %vm1114_vm2, %v1055_v13  ;;  %v848_v16 = vadd.f32 %v4130_v15, %v4848_v40  ;;  %v1007_v19 = vmax.f32 %v837_v14, 0.0 }
 0x11f   : > { %4196 = vmatmul.mubr.msk.bf16.gmra.mxu1 %vm1114_vm2, %v1056_v10  ;;  %v839_v18 = vpop.f32.mrf.mxu1 }
 0x120   : > { %v1010_v20 = vmax.f32 %v848_v16, 0.0  ;;  %v840_v21 = vadd.f32 %v4848_v40, %v839_v18 }
 0x121   : > { %v4133_v22 = vpop.f32.mrf.mxu1 }
 0x122   : > { %v1008_v23 = vmax.f32 %v840_v21, 0.0  ;;  %v1058_v24 = vpack.c.bf16 %v1010_v20, %v1009_v17  ;;  %v861_v25 = vadd.f32 %v4133_v22, %v4848_v40 }
 0x123   : > { %v852_v26 = vpop.f32.mrf.mxu1 }
 0x124   : > { %v1057_v27 = vpack.c.bf16 %v1008_v23, %v1007_v19  ;;  %v853_v28 = vadd.f32 %v4848_v40, %v852_v26  ;;  %v1013_v31 = vmax.f32 %v861_v25, 0.0 }
 0x125   : > { %v4134_v29 = vpop.f32.mrf.mxu1 }
 0x126   : > { %4199 = vmatprep.mubr.msk.bf16.mxu1 %vm1114_vm2, %v1057_v27  ;;  %v864_v30 = vadd.f32 %v4134_v29, %v4848_v40  ;;  %v1011_v33 = vmax.f32 %v853_v28, 0.0 }
 0x127   : > { %4200 = vmatmul.mubr.msk.bf16.gmra.mxu1 %vm1114_vm2, %v1058_v24  ;;  %v855_v32 = vpop.f32.mrf.mxu1 }
 0x128   : > { %v1014_v34 = vmax.f32 %v864_v30, 0.0  ;;  %v856_v35 = vadd.f32 %v4848_v40, %v855_v32 }
 0x129   : > { %v4137_v36 = vpop.f32.mrf.mxu1 }
 0x12a   : > { %v1012_v37 = vmax.f32 %v856_v35, 0.0  ;;  %v1060_v38 = vpack.c.bf16 %v1014_v34, %v1013_v31  ;;  %v877_v39 = vadd.f32 %v4137_v36, %v4848_v40 }
 0x12b   : > { %v868_v41 = vpop.f32.mrf.mxu1 }
 0x12c   : > { %v1059_v42 = vpack.c.bf16 %v1012_v37, %v1011_v33  ;;  %v869_v43 = vadd.f32 %v4848_v40, %v868_v41  ;;  %v1017_v46 = vmax.f32 %v877_v39, 0.0 }
 0x12d   : > { %v4138_v44 = vpop.f32.mrf.mxu1 }
 0x12e   : > { %4203 = vmatprep.mubr.msk.bf16.mxu1 %vm1114_vm2, %v1059_v42  ;;  %v880_v45 = vadd.f32 %v4138_v44, %v4848_v40  ;;  %v1015_v49 = vmax.f32 %v869_v43, 0.0 }
 0x12f   : > { %4204 = vmatmul.mubr.msk.bf16.gmra.mxu1 %vm1114_vm2, %v1060_v38  ;;  %v871_v47 = vpop.f32.mrf.mxu1 }
 0x130   : > { %v1018_v50 = vmax.f32 %v880_v45, 0.0  ;;  %v872_v51 = vadd.f32 %v4848_v40, %v871_v47 }
 0x131   : > { %v4141_v52 = vpop.f32.mrf.mxu1 }
 0x132   : > { %v1016_v53 = vmax.f32 %v872_v51, 0.0  ;;  %v1062_v54 = vpack.c.bf16 %v1018_v50, %v1017_v46  ;;  %v893_v55 = vadd.f32 %v4141_v52, %v4848_v40 }
 0x133   : > { %v884_v56 = vpop.f32.mrf.mxu1 }
 0x134   : > { %v1061_v58 = vpack.c.bf16 %v1016_v53, %v1015_v49  ;;  %v885_v59 = vadd.f32 %v4848_v40, %v884_v56  ;;  %v1021_v62 = vmax.f32 %v893_v55, 0.0 }
 0x135   : > { %v4142_v60 = vpop.f32.mrf.mxu1 }
 0x136   : > { %4207 = vmatprep.mubr.msk.bf16.mxu1 %vm1114_vm2, %v1061_v58  ;;  %v896_v61 = vadd.f32 %v4142_v60, %v4848_v40  ;;  %v1019_v1 = vmax.f32 %v885_v59, 0.0 }
 0x137   : > { %4208 = vmatmul.mubr.msk.bf16.gmra.mxu1 %vm1114_vm2, %v1062_v54  ;;  %v887_v63 = vpop.f32.mrf.mxu1 }
 0x138   : > { %v1022_v2 = vmax.f32 %v896_v61, 0.0  ;;  %v888_v3 = vadd.f32 %v4848_v40, %v887_v63 }
 0x139   : > { %v4145_v4 = vpop.f32.mrf.mxu1 }
 0x13a   : > { %v1020_v5 = vmax.f32 %v888_v3, 0.0  ;;  %v1064_v6 = vpack.c.bf16 %v1022_v2, %v1021_v62  ;;  %v909_v7 = vadd.f32 %v4145_v4, %v4848_v40 }
 0x13b   : > { %v900_v8 = vpop.f32.mrf.mxu1 }
 0x13c   : > { %v1063_v9 = vpack.c.bf16 %v1020_v5, %v1019_v1  ;;  %v901_v10 = vadd.f32 %v4848_v40, %v900_v8  ;;  %v1025_v13 = vmax.f32 %v909_v7, 0.0 }
 0x13d   : > { %v4146_v11 = vpop.f32.mrf.mxu1 }
 0x13e   : > { %v912_v12 = vadd.f32 %v4146_v11, %v4848_v40  ;;  %4211 = vmatprep.mubr.msk.bf16.mxu1 %vm1114_vm2, %v1063_v9  ;;  %v1023_v15 = vmax.f32 %v901_v10, 0.0 }
 0x13f   : > { %v903_v14 = vpop.f32.mrf.mxu1  ;;  %4212 = vmatmul.mubr.msk.bf16.gmra.mxu1 %vm1114_vm2, %v1064_v6 }
 0x140   : > { %v1026_v16 = vmax.f32 %v912_v12, 0.0  ;;  %v904_v17 = vadd.f32 %v4848_v40, %v903_v14  ;;  %v4445_v14 = vld [vmem:[%s5640_s7 + $0x18] sm:$0xff]  }
 0x141   : > { %v4149_v18 = vpop.f32.mrf.mxu1  ;;  %4307 = vmatprep.subr.bf16.mxu1 %v4445_v14 }
 0x142   : > { %v1024_v19 = vmax.f32 %v904_v17, 0.0  ;;  %v1066_v20 = vpack.c.bf16 %v1026_v16, %v1025_v13  ;;  %v925_v21 = vadd.f32 %v4149_v18, %v4848_v40  ;;  %4308 = vmatpush3.bf16.msra.mxu1 %v4445_v14  ;;  %v4970_v18 = vld [vmem:[%s5637_s4] ss:$0 sm:$0xff] }
 0x143   : > { %v916_v22 = vpop.f32.mrf.mxu1 }
 0x144   : > { %v1065_v23 = vpack.c.bf16 %v1024_v19, %v1023_v15  ;;  %v917_v24 = vadd.f32 %v4848_v40, %v916_v22  ;;  %v1029_v27 = vmax.f32 %v925_v21, 0.0  ;;  %v4446_v15 = vld [vmem:[%s5640_s7 + $0x10] sm:$0xff]  }
 0x145   : > { %v4150_v25 = vpop.f32.mrf.mxu1  ;;  %4309 = vmatprep.subr.bf16.mxu1 %v4446_v15 }
 0x146   : > { %v928_v26 = vadd.f32 %v4150_v25, %v4848_v40  ;;  %4215 = vmatprep.mubr.msk.bf16.mxu1 %vm1114_vm2, %v1065_v23  ;;  %v1027_v29 = vmax.f32 %v917_v24, 0.0  ;;  %4310 = vmatpush3.bf16.msra.mxu1 %v4446_v15  ;;  %v4448_v24 = vld [vmem:[%s5640_s7] sm:$0xff]  }
 0x147   : > { %v919_v28 = vpop.f32.mrf.mxu1  ;;  %4216 = vmatmul.mubr.msk.bf16.gmra.mxu1 %vm1114_vm2, %v1066_v20 }
 0x148   : > { %v1030_v30 = vmax.f32 %v928_v26, 0.0  ;;  %v920_v31 = vadd.f32 %v4848_v40, %v919_v28 }
 0x149   : > { %v4153_v32 = vpop.f32.mrf.mxu1 }
 0x14a   : > { %v1028_v33 = vmax.f32 %v920_v31, 0.0  ;;  %v1068_v34 = vpack.c.bf16 %v1030_v30, %v1029_v27  ;;  %v941_v35 = vadd.f32 %v4153_v32, %v4848_v40 }
 0x14b   : > { %v932_v36 = vpop.f32.mrf.mxu1 }
 0x14c   : > { %v1067_v37 = vpack.c.bf16 %v1028_v33, %v1027_v29  ;;  %v933_v38 = vadd.f32 %v4848_v40, %v932_v36  ;;  %v1033_v42 = vmax.f32 %v941_v35, 0.0 }
 0x14d   : > { %v4154_v39 = vpop.f32.mrf.mxu1 }
 0x14e   : > { %v944_v41 = vadd.f32 %v4154_v39, %v4848_v40  ;;  %4219 = vmatprep.mubr.msk.bf16.mxu1 %vm1114_vm2, %v1067_v37  ;;  %v1031_v44 = vmax.f32 %v933_v38, 0.0 }
 0x14f   : > { %v935_v43 = vpop.f32.mrf.mxu1  ;;  %4220 = vmatmul.mubr.msk.bf16.gmra.mxu1 %vm1114_vm2, %v1068_v34 }
 0x150   : > { %v1034_v45 = vmax.f32 %v944_v41, 0.0  ;;  %v936_v46 = vadd.f32 %v4848_v40, %v935_v43 }
 0x151   : > { %v4157_v47 = vpop.f32.mrf.mxu1 }
 0x152   : > { %v1032_v48 = vmax.f32 %v936_v46, 0.0  ;;  %v1070_v49 = vpack.c.bf16 %v1034_v45, %v1033_v42  ;;  %v957_v50 = vadd.f32 %v4157_v47, %v4848_v40 }
 0x153   : > { %v948_v51 = vpop.f32.mrf.mxu1 }
 0x154   : > { %v1069_v52 = vpack.c.bf16 %v1032_v48, %v1031_v44  ;;  %v949_v53 = vadd.f32 %v4848_v40, %v948_v51  ;;  %v1037_v56 = vmax.f32 %v957_v50, 0.0 }
 0x155   : > { %v4158_v54 = vpop.f32.mrf.mxu1 }
 0x156   : > { %v960_v55 = vadd.f32 %v4158_v54, %v4848_v40  ;;  %4223 = vmatprep.mubr.msk.bf16.mxu1 %vm1114_vm2, %v1069_v52  ;;  %v1035_v58 = vmax.f32 %v949_v53, 0.0 }
 0x157   : > { %v951_v57 = vpop.f32.mrf.mxu1  ;;  %4224 = vmatmul.mubr.msk.bf16.gmra.mxu1 %vm1114_vm2, %v1070_v49 }
 0x158   : > { %v1038_v59 = vmax.f32 %v960_v55, 0.0  ;;  %v952_v60 = vadd.f32 %v4848_v40, %v951_v57 }
 0x159   : > { %v4161_v61 = vpop.f32.mrf.mxu1 }
 0x15a   : > { %v1036_v62 = vmax.f32 %v952_v60, 0.0  ;;  %v1072_v63 = vpack.c.bf16 %v1038_v59, %v1037_v56  ;;  %v973_v0 = vadd.f32 %v4161_v61, %v4848_v40 }
 0x15b   : > { %v964_v1 = vpop.f32.mrf.mxu1 }
 0x15c   : > { %v1071_v2 = vpack.c.bf16 %v1036_v62, %v1035_v58  ;;  %v965_v3 = vadd.f32 %v4848_v40, %v964_v1  ;;  %v1041_v6 = vmax.f32 %v973_v0, 0.0 }
 0x15d   : > { %v4162_v4 = vpop.f32.mrf.mxu1 }
 0x15e   : > { %v976_v5 = vadd.f32 %v4162_v4, %v4848_v40  ;;  %4227 = vmatprep.mubr.msk.bf16.mxu1 %vm1114_vm2, %v1071_v2  ;;  %v1039_v8 = vmax.f32 %v965_v3, 0.0 }
 0x15f   : > { %v967_v7 = vpop.f32.mrf.mxu1  ;;  %4228 = vmatmul.mubr.msk.bf16.gmra.mxu1 %vm1114_vm2, %v1072_v63 }
 0x160   : > { %v1042_v9 = vmax.f32 %v976_v5, 0.0  ;;  %v968_v10 = vadd.f32 %v4848_v40, %v967_v7  ;;  %v4447_v40 = vld [vmem:[%s5640_s7 + $0x8] sm:$0xff]  }
 0x161   : > { %4311 = vmatprep.subr.bf16.mxu1 %v4447_v40 }
 0x162   : > { %v1040_v11 = vmax.f32 %v968_v10, 0.0  ;;  %v1074_v12 = vpack.c.bf16 %v1042_v9, %v1041_v6  ;;  %4312 = vmatpush3.bf16.msra.mxu1 %v4447_v40 }
 0x163   : > { %4313 = vmatprep.subr.bf16.mxu1 %v4448_v24 }
 0x164   : > { %v1073_v13 = vpack.c.bf16 %v1040_v11, %v1039_v8 }
 0x166   : > { %4231 = vmatprep.mubr.msk.bf16.mxu1 %vm1114_vm2, %v1073_v13  ;;  %4314 = vmatpush3.bf16.msra.mxu1 %v4448_v24 }
 0x167   : > { %4232 = vmatmul.mubr.msk.bf16.gmra.mxu1 %vm1114_vm2, %v1074_v12 }
 0x1af   : > { %v4173_v16 = vpop.f32.mrf.mxu1 }
 0x1b0   : > { %v1254_v22 = vadd.f32 %v4173_v16, %v4970_v18 }
 0x1b1   : > { %v1245_v17 = vpop.f32.mrf.mxu1 }
 0x1b2   : > { %v1246_v20 = vadd.f32 %v4970_v18, %v1245_v17  ;;  %v1502_v30 = vmax.f32 %v1254_v22, 0.0 }
 0x1b3   : > { %v4174_v19 = vpop.f32.mrf.mxu1 }
 0x1b4   : > { %v1257_v21 = vadd.f32 %v4174_v19, %v4970_v18  ;;  %v1500_v28 = vmax.f32 %v1246_v20, 0.0 }
 0x1b5   : > { %v1248_v23 = vpop.f32.mrf.mxu1 }
 0x1b6   : > { %v1249_v25 = vadd.f32 %v4970_v18, %v1248_v23  ;;  %v1503_v26 = vmax.f32 %v1257_v21, 0.0 }
 0x1b7   : > { %v4177_v27 = vpop.f32.mrf.mxu1 }
 0x1b8   : > { %v1501_v29 = vmax.f32 %v1249_v25, 0.0  ;;  %v1565_v33 = vpack.c.bf16 %v1503_v26, %v1502_v30  ;;  %v1270_v37 = vadd.f32 %v4177_v27, %v4970_v18 }
 0x1b9   : > { %v1261_v31 = vpop.f32.mrf.mxu1 }
 0x1ba   : > { %v1564_v32 = vpack.c.bf16 %v1501_v29, %v1500_v28  ;;  %v1262_v35 = vadd.f32 %v4970_v18, %v1261_v31  ;;  %v1506_v45 = vmax.f32 %v1270_v37, 0.0 }
 0x1bb   : > { %v4178_v34 = vpop.f32.mrf.mxu1 }
 0x1bc   : > { %v1273_v36 = vadd.f32 %v4178_v34, %v4970_v18  ;;  %4243 = vmatprep.mubr.msk.bf16.mxu0 %vm1114_vm2, %v1564_v32  ;;  %v1504_v43 = vmax.f32 %v1262_v35, 0.0 }
 0x1bd   : > { %v1264_v38 = vpop.f32.mrf.mxu1  ;;  %4244 = vmatmul.mubr.msk.bf16.vlgmr.msra.gmra.mxu0 %vm1114_vm2, %v1565_v33 }
 0x1be   : > { %v1265_v39 = vadd.f32 %v4970_v18, %v1264_v38  ;;  %v1507_v41 = vmax.f32 %v1273_v36, 0.0 }
 0x1bf   : > { %v4181_v42 = vpop.f32.mrf.mxu1 }
 0x1c0   : > { %v1505_v44 = vmax.f32 %v1265_v39, 0.0  ;;  %v1286_v46 = vadd.f32 %v4181_v42, %v4970_v18  ;;  %v1567_v50 = vpack.c.bf16 %v1507_v41, %v1506_v45 }
 0x1c1   : > { %v1277_v47 = vpop.f32.mrf.mxu1 }
 0x1c2   : > { %v1566_v48 = vpack.c.bf16 %v1505_v44, %v1504_v43  ;;  %v1278_v49 = vadd.f32 %v4970_v18, %v1277_v47  ;;  %v1510_v53 = vmax.f32 %v1286_v46, 0.0 }
 0x1c3   : > { %v4182_v51 = vpop.f32.mrf.mxu1 }
 0x1c4   : > { %v1289_v52 = vadd.f32 %v4182_v51, %v4970_v18  ;;  %4247 = vmatprep.mubr.msk.bf16.mxu0 %vm1114_vm2, %v1566_v48  ;;  %v1508_v55 = vmax.f32 %v1278_v49, 0.0 }
 0x1c5   : > { %v1280_v54 = vpop.f32.mrf.mxu1  ;;  %4248 = vmatmul.mubr.msk.bf16.gmra.mxu0 %vm1114_vm2, %v1567_v50 }
 0x1c6   : > { %v1511_v56 = vmax.f32 %v1289_v52, 0.0  ;;  %v1281_v57 = vadd.f32 %v4970_v18, %v1280_v54 }
 0x1c7   : > { %v4185_v58 = vpop.f32.mrf.mxu1 }
 0x1c8   : > { %v1509_v59 = vmax.f32 %v1281_v57, 0.0  ;;  %v1569_v60 = vpack.c.bf16 %v1511_v56, %v1510_v53  ;;  %v1302_v61 = vadd.f32 %v4185_v58, %v4970_v18 }
 0x1c9   : > { %v1293_v62 = vpop.f32.mrf.mxu1 }
 0x1ca   : > { %v1568_v63 = vpack.c.bf16 %v1509_v59, %v1508_v55  ;;  %v1294_v0 = vadd.f32 %v4970_v18, %v1293_v62  ;;  %v1514_v3 = vmax.f32 %v1302_v61, 0.0 }
 0x1cb   : > { %v4186_v1 = vpop.f32.mrf.mxu1 }
 0x1cc   : > { %v1305_v2 = vadd.f32 %v4186_v1, %v4970_v18  ;;  %4251 = vmatprep.mubr.msk.bf16.mxu0 %vm1114_vm2, %v1568_v63  ;;  %v1512_v5 = vmax.f32 %v1294_v0, 0.0 }
 0x1cd   : > { %v1296_v4 = vpop.f32.mrf.mxu1  ;;  %4252 = vmatmul.mubr.msk.bf16.gmra.mxu0 %vm1114_vm2, %v1569_v60 }
 0x1ce   : > { %v1515_v6 = vmax.f32 %v1305_v2, 0.0  ;;  %v1297_v7 = vadd.f32 %v4970_v18, %v1296_v4 }
 0x1cf   : > { %v4189_v8 = vpop.f32.mrf.mxu1 }
 0x1d0   : > { %v1513_v9 = vmax.f32 %v1297_v7, 0.0  ;;  %v1571_v10 = vpack.c.bf16 %v1515_v6, %v1514_v3  ;;  %v1318_v11 = vadd.f32 %v4189_v8, %v4970_v18 }
 0x1d1   : > { %v1309_v12 = vpop.f32.mrf.mxu1 }
 0x1d2   : > { %v1570_v13 = vpack.c.bf16 %v1513_v9, %v1512_v5  ;;  %v1310_v14 = vadd.f32 %v4970_v18, %v1309_v12  ;;  %v1518_v16 = vmax.f32 %v1318_v11, 0.0 }
 0x1d3   : > { %v4190_v15 = vpop.f32.mrf.mxu1 }
 0x1d4   : > { %4255 = vmatprep.mubr.msk.bf16.mxu0 %vm1114_vm2, %v1570_v13  ;;  %v1321_v40 = vadd.f32 %v4190_v15, %v4970_v18  ;;  %v1516_v19 = vmax.f32 %v1310_v14, 0.0 }
 0x1d5   : > { %4256 = vmatmul.mubr.msk.bf16.gmra.mxu0 %vm1114_vm2, %v1571_v10  ;;  %v1312_v17 = vpop.f32.mrf.mxu1 }
 0x1d6   : > { %v1519_v20 = vmax.f32 %v1321_v40, 0.0  ;;  %v1313_v21 = vadd.f32 %v4970_v18, %v1312_v17 }
 0x1d7   : > { %v4193_v22 = vpop.f32.mrf.mxu1 }
 0x1d8   : > { %v1517_v23 = vmax.f32 %v1313_v21, 0.0  ;;  %v1573_v24 = vpack.c.bf16 %v1519_v20, %v1518_v16  ;;  %v1334_v25 = vadd.f32 %v4193_v22, %v4970_v18 }
 0x1d9   : > { %v1325_v26 = vpop.f32.mrf.mxu1 }
 0x1da   : > { %v1572_v27 = vpack.c.bf16 %v1517_v23, %v1516_v19  ;;  %v1326_v28 = vadd.f32 %v4970_v18, %v1325_v26  ;;  %v1522_v31 = vmax.f32 %v1334_v25, 0.0 }
 0x1db   : > { %v4194_v29 = vpop.f32.mrf.mxu1 }
 0x1dc   : > { %4259 = vmatprep.mubr.msk.bf16.mxu0 %vm1114_vm2, %v1572_v27  ;;  %v1337_v30 = vadd.f32 %v4194_v29, %v4970_v18  ;;  %v1520_v33 = vmax.f32 %v1326_v28, 0.0 }
 0x1dd   : > { %4260 = vmatmul.mubr.msk.bf16.gmra.mxu0 %vm1114_vm2, %v1573_v24  ;;  %v1328_v32 = vpop.f32.mrf.mxu1 }
 0x1de   : > { %v1523_v34 = vmax.f32 %v1337_v30, 0.0  ;;  %v1329_v35 = vadd.f32 %v4970_v18, %v1328_v32 }
 0x1df   : > { %v4197_v36 = vpop.f32.mrf.mxu1 }
 0x1e0   : > { %v1521_v37 = vmax.f32 %v1329_v35, 0.0  ;;  %v1575_v38 = vpack.c.bf16 %v1523_v34, %v1522_v31  ;;  %v1350_v39 = vadd.f32 %v4197_v36, %v4970_v18 }
 0x1e1   : > { %v1341_v41 = vpop.f32.mrf.mxu1 }
 0x1e2   : > { %v1574_v42 = vpack.c.bf16 %v1521_v37, %v1520_v33  ;;  %v1342_v43 = vadd.f32 %v4970_v18, %v1341_v41  ;;  %v1526_v46 = vmax.f32 %v1350_v39, 0.0 }
 0x1e3   : > { %v4198_v44 = vpop.f32.mrf.mxu1 }
 0x1e4   : > { %4263 = vmatprep.mubr.msk.bf16.mxu0 %vm1114_vm2, %v1574_v42  ;;  %v1353_v45 = vadd.f32 %v4198_v44, %v4970_v18  ;;  %v1524_v48 = vmax.f32 %v1342_v43, 0.0 }
 0x1e5   : > { %4264 = vmatmul.mubr.msk.bf16.gmra.mxu0 %vm1114_vm2, %v1575_v38  ;;  %v1344_v47 = vpop.f32.mrf.mxu1 }
 0x1e6   : > { %v1527_v49 = vmax.f32 %v1353_v45, 0.0  ;;  %v1345_v50 = vadd.f32 %v4970_v18, %v1344_v47 }
 0x1e7   : > { %v4201_v51 = vpop.f32.mrf.mxu1 }
 0x1e8   : > { %v1525_v52 = vmax.f32 %v1345_v50, 0.0  ;;  %v1577_v53 = vpack.c.bf16 %v1527_v49, %v1526_v46  ;;  %v1366_v54 = vadd.f32 %v4201_v51, %v4970_v18 }
 0x1e9   : > { %v1357_v55 = vpop.f32.mrf.mxu1 }
 0x1ea   : > { %v1576_v56 = vpack.c.bf16 %v1525_v52, %v1524_v48  ;;  %v1358_v57 = vadd.f32 %v4970_v18, %v1357_v55  ;;  %v1530_v60 = vmax.f32 %v1366_v54, 0.0 }
 0x1eb   : > { %v4202_v58 = vpop.f32.mrf.mxu1 }
 0x1ec   : > { %4267 = vmatprep.mubr.msk.bf16.mxu0 %vm1114_vm2, %v1576_v56  ;;  %v1369_v59 = vadd.f32 %v4202_v58, %v4970_v18  ;;  %v1528_v62 = vmax.f32 %v1358_v57, 0.0 }
 0x1ed   : > { %4268 = vmatmul.mubr.msk.bf16.gmra.mxu0 %vm1114_vm2, %v1577_v53  ;;  %v1360_v61 = vpop.f32.mrf.mxu1 }
 0x1ee   : > { %v1531_v63 = vmax.f32 %v1369_v59, 0.0  ;;  %v1361_v0 = vadd.f32 %v4970_v18, %v1360_v61 }
 0x1ef   : > { %v4205_v1 = vpop.f32.mrf.mxu1 }
 0x1f0   : > { %v1529_v2 = vmax.f32 %v1361_v0, 0.0  ;;  %v1579_v3 = vpack.c.bf16 %v1531_v63, %v1530_v60  ;;  %v1382_v4 = vadd.f32 %v4205_v1, %v4970_v18 }
 0x1f1   : > { %v1373_v5 = vpop.f32.mrf.mxu1 }
 0x1f2   : > { %v1578_v6 = vpack.c.bf16 %v1529_v2, %v1528_v62  ;;  %v1374_v7 = vadd.f32 %v4970_v18, %v1373_v5  ;;  %v1534_v10 = vmax.f32 %v1382_v4, 0.0 }
 0x1f3   : > { %v4206_v8 = vpop.f32.mrf.mxu1 }
 0x1f4   : > { %4271 = vmatprep.mubr.msk.bf16.mxu0 %vm1114_vm2, %v1578_v6  ;;  %v1385_v9 = vadd.f32 %v4206_v8, %v4970_v18  ;;  %v1532_v12 = vmax.f32 %v1374_v7, 0.0 }
 0x1f5   : > { %4272 = vmatmul.mubr.msk.bf16.gmra.mxu0 %vm1114_vm2, %v1579_v3  ;;  %v1376_v11 = vpop.f32.mrf.mxu1 }
 0x1f6   : > { %v1535_v13 = vmax.f32 %v1385_v9, 0.0  ;;  %v1377_v14 = vadd.f32 %v4970_v18, %v1376_v11 }
 0x1f7   : > { %v4209_v15 = vpop.f32.mrf.mxu1 }
 0x1f8   : > { %v1533_v40 = vmax.f32 %v1377_v14, 0.0  ;;  %v1581_v16 = vpack.c.bf16 %v1535_v13, %v1534_v10  ;;  %v1398_v17 = vadd.f32 %v4209_v15, %v4970_v18 }
 0x1f9   : > { %v1389_v19 = vpop.f32.mrf.mxu1 }
 0x1fa   : > { %v1580_v20 = vpack.c.bf16 %v1533_v40, %v1532_v12  ;;  %v1390_v21 = vadd.f32 %v4970_v18, %v1389_v19  ;;  %v1538_v24 = vmax.f32 %v1398_v17, 0.0 }
 0x1fb   : > { %v4210_v22 = vpop.f32.mrf.mxu1 }
 0x1fc   : > { %4275 = vmatprep.mubr.msk.bf16.mxu0 %vm1114_vm2, %v1580_v20  ;;  %v1401_v23 = vadd.f32 %v4210_v22, %v4970_v18  ;;  %v1536_v26 = vmax.f32 %v1390_v21, 0.0 }
 0x1fd   : > { %4276 = vmatmul.mubr.msk.bf16.gmra.mxu0 %vm1114_vm2, %v1581_v16  ;;  %v1392_v25 = vpop.f32.mrf.mxu1 }
 0x1fe   : > { %v1539_v27 = vmax.f32 %v1401_v23, 0.0  ;;  %v1393_v28 = vadd.f32 %v4970_v18, %v1392_v25 }
 0x1ff   : > { %v4213_v29 = vpop.f32.mrf.mxu1 }
 0x200   : > { %v1537_v30 = vmax.f32 %v1393_v28, 0.0  ;;  %v1583_v31 = vpack.c.bf16 %v1539_v27, %v1538_v24  ;;  %v1414_v32 = vadd.f32 %v4213_v29, %v4970_v18 }
 0x201   : > { %v1405_v33 = vpop.f32.mrf.mxu1 }
 0x202   : > { %v1582_v34 = vpack.c.bf16 %v1537_v30, %v1536_v26  ;;  %v1406_v35 = vadd.f32 %v4970_v18, %v1405_v33  ;;  %v1542_v38 = vmax.f32 %v1414_v32, 0.0 }
 0x203   : > { %v4214_v36 = vpop.f32.mrf.mxu1 }
 0x204   : > { %4279 = vmatprep.mubr.msk.bf16.mxu0 %vm1114_vm2, %v1582_v34  ;;  %v1417_v37 = vadd.f32 %v4214_v36, %v4970_v18  ;;  %v1540_v41 = vmax.f32 %v1406_v35, 0.0 }
 0x205   : > { %4280 = vmatmul.mubr.msk.bf16.gmra.mxu0 %vm1114_vm2, %v1583_v31  ;;  %v1408_v39 = vpop.f32.mrf.mxu1 }
 0x206   : > { %v1543_v42 = vmax.f32 %v1417_v37, 0.0  ;;  %v1409_v43 = vadd.f32 %v4970_v18, %v1408_v39 }
 0x207   : > { %v4217_v44 = vpop.f32.mrf.mxu1 }
 0x208   : > { %v1541_v45 = vmax.f32 %v1409_v43, 0.0  ;;  %v1585_v46 = vpack.c.bf16 %v1543_v42, %v1542_v38  ;;  %v1430_v47 = vadd.f32 %v4217_v44, %v4970_v18 }
 0x209   : > { %v1421_v48 = vpop.f32.mrf.mxu1 }
 0x20a   : > { %v1584_v49 = vpack.c.bf16 %v1541_v45, %v1540_v41  ;;  %v1422_v50 = vadd.f32 %v4970_v18, %v1421_v48  ;;  %v1546_v53 = vmax.f32 %v1430_v47, 0.0 }
 0x20b   : > { %v4218_v51 = vpop.f32.mrf.mxu1 }
 0x20c   : > { %v1433_v52 = vadd.f32 %v4218_v51, %v4970_v18  ;;  %4283 = vmatprep.mubr.msk.bf16.mxu0 %vm1114_vm2, %v1584_v49  ;;  %v1544_v55 = vmax.f32 %v1422_v50, 0.0 }
 0x20d   : > { %v1424_v54 = vpop.f32.mrf.mxu1  ;;  %4284 = vmatmul.mubr.msk.bf16.gmra.mxu0 %vm1114_vm2, %v1585_v46 }
 0x20e   : > { %v1547_v56 = vmax.f32 %v1433_v52, 0.0  ;;  %v1425_v57 = vadd.f32 %v4970_v18, %v1424_v54  ;;  %v4449_v54 = vld [vmem:[%s5642_s9 + $0x70] ss:$8 sps:$4 sm:$0xff]  }
 0x20f   : > { %v4221_v58 = vpop.f32.mrf.mxu1 }
 0x210   : > { %v1545_v59 = vmax.f32 %v1425_v57, 0.0  ;;  %v1587_v60 = vpack.c.bf16 %v1547_v56, %v1546_v53  ;;  %v1446_v61 = vadd.f32 %v4221_v58, %v4970_v18  ;;  %v4454_v56 = vld [vmem:[%s5642_s9 + $0x64] ss:$8 sps:$4 sm:$0xff]   ;;  %v4455_v57 = vld [vmem:[%s5642_s9 + $0x50] ss:$8 sps:$4 sm:$0xff]  }
 0x211   : > { %v1437_v62 = vpop.f32.mrf.mxu1  ;;  %v4457_v58 = vld [vmem:[%s5642_s9 + $0x54] ss:$8 sps:$4 sm:$0xff]  }
 0x212   : > { %v1586_v63 = vpack.c.bf16 %v1545_v59, %v1544_v55  ;;  %v1438_v0 = vadd.f32 %v4970_v18, %v1437_v62  ;;  %v1550_v3 = vmax.f32 %v1446_v61, 0.0  ;;  %v4451_v55 = vld [vmem:[%s5642_s9 + $0x74] ss:$8 sps:$4 sm:$0xff]   ;;  %v4458_v59 = vld [vmem:[%s5642_s9 + $0x40] ss:$8 sps:$4 sm:$0xff]  }
 0x213   : > { %v4222_v1 = vpop.f32.mrf.mxu1  ;;  %2744 = vmatprep.subr.bf16.mxu0 %v4451_v55  ;;  %v4461_v61 = vld [vmem:[%s5642_s9 + $0x30] ss:$8 sps:$4 sm:$0xff]   ;;  %v4463_v62 = vld [vmem:[%s5642_s9 + $0x34] ss:$8 sps:$4 sm:$0xff]  }
 0x214   : > { %v1449_v2 = vadd.f32 %v4222_v1, %v4970_v18  ;;  %4287 = vmatprep.mubr.msk.bf16.mxu0 %vm1114_vm2, %v1586_v63  ;;  %v1548_v5 = vmax.f32 %v1438_v0, 0.0  ;;  %2745 = vmatpush1.bf16.msra.mxu0 %v4449_v54  ;;  %v4464_v63 = vld [vmem:[%s5642_s9 + $0x20] ss:$8 sps:$4 sm:$0xff]   ;;  %v4466_v0 = vld [vmem:[%s5642_s9 + $0x24] ss:$8 sps:$4 sm:$0xff]  }
 0x215   : > { %v1440_v4 = vpop.f32.mrf.mxu1  ;;  %4288 = vmatmul.mubr.msk.bf16.gmra.mxu0 %vm1114_vm2, %v1587_v60  ;;  %2746 = vmatprep.subr.bf16.mxu0 %v4454_v56  ;;  %v4460_v60 = vld [vmem:[%s5642_s9 + $0x44] ss:$8 sps:$4 sm:$0xff]  }
 0x216   : > { %v1551_v6 = vmax.f32 %v1449_v2, 0.0  ;;  %v1441_v7 = vadd.f32 %v4970_v18, %v1440_v4 }
 0x217   : > { %v4225_v8 = vpop.f32.mrf.mxu1 }
 0x218   : > { %v1549_v9 = vmax.f32 %v1441_v7, 0.0  ;;  %v1589_v10 = vpack.c.bf16 %v1551_v6, %v1550_v3  ;;  %v1462_v11 = vadd.f32 %v4225_v8, %v4970_v18  ;;  %v5110_v3 = vld [vmem:[%s5639_s6] ss:$0 sm:$0xff] }
 0x219   : > { %v1453_v12 = vpop.f32.mrf.mxu1 }
 0x21a   : > { %v1588_v13 = vpack.c.bf16 %v1549_v9, %v1548_v5  ;;  %v1454_v14 = vadd.f32 %v4970_v18, %v1453_v12  ;;  %v1554_v16 = vmax.f32 %v1462_v11, 0.0  ;;  %v4467_v9 = vld [vmem:[%s5642_s9 + $0x10] ss:$8 sps:$4 sm:$0xff]   ;;  %v4472_v12 = vld [vmem:[%s5642_s9 + $0x4] ss:$8 sps:$4 sm:$0xff]  }
 0x21b   : > { %v4226_v15 = vpop.f32.mrf.mxu1 }
 0x21c   : > { %v1465_v40 = vadd.f32 %v4226_v15, %v4970_v18  ;;  %4291 = vmatprep.mubr.msk.bf16.mxu0 %vm1114_vm2, %v1588_v13  ;;  %v1552_v19 = vmax.f32 %v1454_v14, 0.0 }
 0x21d   : > { %v1456_v17 = vpop.f32.mrf.mxu1  ;;  %4292 = vmatmul.mubr.msk.bf16.gmra.mxu0 %vm1114_vm2, %v1589_v10  ;;  %v4469_v10 = vld [vmem:[%s5642_s9 + $0x14] ss:$8 sps:$4 sm:$0xff]  }
 0x21e   : > { %v1555_v20 = vmax.f32 %v1465_v40, 0.0  ;;  %v1457_v21 = vadd.f32 %v4970_v18, %v1456_v17 }
 0x21f   : > { %v4229_v22 = vpop.f32.mrf.mxu1 }
 0x220   : > { %v1553_v23 = vmax.f32 %v1457_v21, 0.0  ;;  %v1591_v24 = vpack.c.bf16 %v1555_v20, %v1554_v16  ;;  %v1478_v25 = vadd.f32 %v4229_v22, %v4970_v18  ;;  %v4470_v16 = vld [vmem:[%s5642_s9] ss:$8 sps:$4 sm:$0xff]  }
 0x221   : > { %v1469_v26 = vpop.f32.mrf.mxu1 }
 0x222   : > { %v1590_v27 = vpack.c.bf16 %v1553_v23, %v1552_v19  ;;  %v1470_v28 = vadd.f32 %v4970_v18, %v1469_v26  ;;  %v1558_v31 = vmax.f32 %v1478_v25, 0.0 }
 0x223   : > { %v4230_v29 = vpop.f32.mrf.mxu1 }
 0x224   : > { %v1481_v30 = vadd.f32 %v4230_v29, %v4970_v18  ;;  %4295 = vmatprep.mubr.msk.bf16.mxu0 %vm1114_vm2, %v1590_v27  ;;  %v1556_v33 = vmax.f32 %v1470_v28, 0.0 }
 0x225   : > { %v1472_v32 = vpop.f32.mrf.mxu1  ;;  %4296 = vmatmul.mubr.msk.bf16.gmra.mxu0 %vm1114_vm2, %v1591_v24 }
 0x226   : > { %v1559_v34 = vmax.f32 %v1481_v30, 0.0  ;;  %v1473_v35 = vadd.f32 %v4970_v18, %v1472_v32 }
 0x227   : > { %v4233_v36 = vpop.f32.mrf.mxu1 }
 0x228   : > { %v1557_v37 = vmax.f32 %v1473_v35, 0.0  ;;  %v1593_v38 = vpack.c.bf16 %v1559_v34, %v1558_v31  ;;  %v1494_v39 = vadd.f32 %v4233_v36, %v4970_v18 }
 0x229   : > { %v1485_v41 = vpop.f32.mrf.mxu1 }
 0x22a   : > { %v1592_v42 = vpack.c.bf16 %v1557_v37, %v1556_v33  ;;  %v1486_v43 = vadd.f32 %v4970_v18, %v1485_v41  ;;  %v1562_v46 = vmax.f32 %v1494_v39, 0.0 }
 0x22b   : > { %v4234_v44 = vpop.f32.mrf.mxu1 }
 0x22c   : > { %v1497_v45 = vadd.f32 %v4234_v44, %v4970_v18  ;;  %4299 = vmatprep.mubr.msk.bf16.mxu0 %vm1114_vm2, %v1592_v42  ;;  %v1560_v48 = vmax.f32 %v1486_v43, 0.0 }
 0x22d   : > { %v1488_v47 = vpop.f32.mrf.mxu1  ;;  %4300 = vmatmul.mubr.msk.bf16.gmra.mxu0 %vm1114_vm2, %v1593_v38 }
 0x22e   : > { %v1563_v49 = vmax.f32 %v1497_v45, 0.0  ;;  %v1489_v50 = vadd.f32 %v4970_v18, %v1488_v47  ;;  %v4452_v18 = vld [vmem:[%s5642_s9 + $0x60] ss:$8 sps:$4 sm:$0xff]  }
 0x22f   : > { %2747 = vmatpush1.bf16.msra.mxu0 %v4452_v18 }
 0x230   : > { %v1561_v51 = vmax.f32 %v1489_v50, 0.0  ;;  %v1595_v52 = vpack.c.bf16 %v1563_v49, %v1562_v46  ;;  %2748 = vmatprep.subr.bf16.mxu0 %v4457_v58 }
 0x232   : > { %v1594_v53 = vpack.c.bf16 %v1561_v51, %v1560_v48 }
 0x233   : > { %2749 = vmatpush1.bf16.msra.mxu0 %v4455_v57 }
 0x234   : > { %4303 = vmatprep.mubr.msk.bf16.mxu0 %vm1114_vm2, %v1594_v53  ;;  %2750 = vmatprep.subr.bf16.mxu0 %v4460_v60 }
 0x235   : > { %4304 = vmatmul.mubr.msk.bf16.gmra.mxu0 %vm1114_vm2, %v1595_v52 }
 0x237   : > { %2751 = vmatpush1.bf16.msra.mxu0 %v4458_v59 }
 0x238   : > { %2752 = vmatprep.subr.bf16.mxu0 %v4463_v62 }
 0x23b   : > { %2753 = vmatpush1.bf16.msra.mxu0 %v4461_v61 }
 0x23c   : > { %2754 = vmatprep.subr.bf16.mxu0 %v4466_v0 }
 0x23f   : > { %2755 = vmatpush1.bf16.msra.mxu0 %v4464_v63 }
 0x240   : > { %2756 = vmatprep.subr.bf16.mxu0 %v4469_v10 }
 0x243   : > { %2757 = vmatpush1.bf16.msra.mxu0 %v4467_v9 }
 0x244   : > { %2758 = vmatprep.subr.bf16.mxu0 %v4472_v12 }
 0x247   : > { %2759 = vmatpush1.bf16.msra.mxu0 %v4470_v16 }
 0x27d   : > { %v4245_v1 = vpop.f32.mrf.mxu0 }
 0x27e   : > { %v1774_v7 = vadd.f32 %v4245_v1, %v5110_v3 }
 0x27f   : > { %v1765_v2 = vpop.f32.mrf.mxu0 }
 0x280   : > { %v1766_v5 = vadd.f32 %v5110_v3, %v1765_v2  ;;  %v2022_v17 = vmax.f32 %v1774_v7, 0.0 }
 0x281   : > { %v4246_v4 = vpop.f32.mrf.mxu0 }
 0x282   : > { %v1777_v6 = vadd.f32 %v4246_v4, %v5110_v3  ;;  %v2020_v15 = vmax.f32 %v1766_v5, 0.0 }
 0x283   : > { %v1768_v8 = vpop.f32.mrf.mxu0 }
 0x284   : > { %v1769_v11 = vadd.f32 %v5110_v3, %v1768_v8  ;;  %v2023_v13 = vmax.f32 %v1777_v6, 0.0 }
 0x285   : > { %v4249_v14 = vpop.f32.mrf.mxu0 }
 0x286   : > { %v2021_v40 = vmax.f32 %v1769_v11, 0.0  ;;  %v2085_v21 = vpack.c.bf16 %v2023_v13, %v2022_v17  ;;  %v1790_v25 = vadd.f32 %v4249_v14, %v5110_v3 }
 0x287   : > { %v1781_v19 = vpop.f32.mrf.mxu0 }
 0x288   : > { %v2084_v20 = vpack.c.bf16 %v2021_v40, %v2020_v15  ;;  %v1782_v23 = vadd.f32 %v5110_v3, %v1781_v19  ;;  %v2026_v32 = vmax.f32 %v1790_v25, 0.0 }
 0x289   : > { %v4250_v22 = vpop.f32.mrf.mxu0 }
 0x28a   : > { %v1793_v24 = vadd.f32 %v4250_v22, %v5110_v3  ;;  %4315 = vmatprep.mubr.msk.bf16.mxu1 %vm1114_vm2, %v2084_v20  ;;  %v2024_v30 = vmax.f32 %v1782_v23, 0.0 }
 0x28b   : > { %v1784_v26 = vpop.f32.mrf.mxu0  ;;  %4316 = vmatmul.mubr.msk.bf16.vlgmr.msra.gmra.mxu1 %vm1114_vm2, %v2085_v21 }
 0x28c   : > { %v1785_v27 = vadd.f32 %v5110_v3, %v1784_v26  ;;  %v2027_v28 = vmax.f32 %v1793_v24, 0.0 }
 0x28d   : > { %v4253_v29 = vpop.f32.mrf.mxu0 }
 0x28e   : > { %v2025_v31 = vmax.f32 %v1785_v27, 0.0  ;;  %v2087_v35 = vpack.c.bf16 %v2027_v28, %v2026_v32  ;;  %v1806_v39 = vadd.f32 %v4253_v29, %v5110_v3 }
 0x28f   : > { %v1797_v33 = vpop.f32.mrf.mxu0 }
 0x290   : > { %v2086_v34 = vpack.c.bf16 %v2025_v31, %v2024_v30  ;;  %v1798_v37 = vadd.f32 %v5110_v3, %v1797_v33  ;;  %v2030_v47 = vmax.f32 %v1806_v39, 0.0 }
 0x291   : > { %v4254_v36 = vpop.f32.mrf.mxu0 }
 0x292   : > { %v1809_v38 = vadd.f32 %v4254_v36, %v5110_v3  ;;  %4319 = vmatprep.mubr.msk.bf16.mxu1 %vm1114_vm2, %v2086_v34  ;;  %v2028_v45 = vmax.f32 %v1798_v37, 0.0 }
 0x293   : > { %v1800_v41 = vpop.f32.mrf.mxu0  ;;  %4320 = vmatmul.mubr.msk.bf16.gmra.mxu1 %vm1114_vm2, %v2087_v35 }
 0x294   : > { %v1801_v42 = vadd.f32 %v5110_v3, %v1800_v41  ;;  %v2031_v43 = vmax.f32 %v1809_v38, 0.0 }
 0x295   : > { %v4257_v44 = vpop.f32.mrf.mxu0 }
 0x296   : > { %v2029_v46 = vmax.f32 %v1801_v42, 0.0  ;;  %v1822_v48 = vadd.f32 %v4257_v44, %v5110_v3  ;;  %v2089_v52 = vpack.c.bf16 %v2031_v43, %v2030_v47 }
 0x297   : > { %v1813_v49 = vpop.f32.mrf.mxu0 }
 0x298   : > { %v2088_v50 = vpack.c.bf16 %v2029_v46, %v2028_v45  ;;  %v1814_v51 = vadd.f32 %v5110_v3, %v1813_v49  ;;  %v2034_v55 = vmax.f32 %v1822_v48, 0.0 }
 0x299   : > { %v4258_v53 = vpop.f32.mrf.mxu0 }
 0x29a   : > { %v1825_v54 = vadd.f32 %v4258_v53, %v5110_v3  ;;  %4323 = vmatprep.mubr.msk.bf16.mxu1 %vm1114_vm2, %v2088_v50  ;;  %v2032_v56 = vmax.f32 %v1814_v51, 0.0 }
 0x29b   : > { %v1816_v18 = vpop.f32.mrf.mxu0  ;;  %4324 = vmatmul.mubr.msk.bf16.gmra.mxu1 %vm1114_vm2, %v2089_v52 }
 0x29c   : > { %v2035_v57 = vmax.f32 %v1825_v54, 0.0  ;;  %v1817_v58 = vadd.f32 %v5110_v3, %v1816_v18 }
 0x29d   : > { %v4261_v59 = vpop.f32.mrf.mxu0 }
 0x29e   : > { %v2033_v60 = vmax.f32 %v1817_v58, 0.0  ;;  %v2091_v61 = vpack.c.bf16 %v2035_v57, %v2034_v55  ;;  %v1838_v62 = vadd.f32 %v4261_v59, %v5110_v3 }
 0x29f   : > { %v1829_v63 = vpop.f32.mrf.mxu0 }
 0x2a0   : > { %v2090_v0 = vpack.c.bf16 %v2033_v60, %v2032_v56  ;;  %v1830_v1 = vadd.f32 %v5110_v3, %v1829_v63  ;;  %v2038_v5 = vmax.f32 %v1838_v62, 0.0 }
 0x2a1   : > { %v4262_v2 = vpop.f32.mrf.mxu0 }
 0x2a2   : > { %4327 = vmatprep.mubr.msk.bf16.mxu1 %vm1114_vm2, %v2090_v0  ;;  %v1841_v4 = vadd.f32 %v4262_v2, %v5110_v3  ;;  %v2036_v7 = vmax.f32 %v1830_v1, 0.0 }
 0x2a3   : > { %4328 = vmatmul.mubr.msk.bf16.gmra.mxu1 %vm1114_vm2, %v2091_v61  ;;  %v1832_v6 = vpop.f32.mrf.mxu0 }
 0x2a4   : > { %v2039_v8 = vmax.f32 %v1841_v4, 0.0  ;;  %v1833_v9 = vadd.f32 %v5110_v3, %v1832_v6 }
 0x2a5   : > { %v4265_v10 = vpop.f32.mrf.mxu0 }
 0x2a6   : > { %v2037_v11 = vmax.f32 %v1833_v9, 0.0  ;;  %v2093_v12 = vpack.c.bf16 %v2039_v8, %v2038_v5  ;;  %v1854_v13 = vadd.f32 %v4265_v10, %v5110_v3 }
 0x2a7   : > { %v1845_v14 = vpop.f32.mrf.mxu0 }
 0x2a8   : > { %v2092_v15 = vpack.c.bf16 %v2037_v11, %v2036_v7  ;;  %v1846_v40 = vadd.f32 %v5110_v3, %v1845_v14  ;;  %v2042_v19 = vmax.f32 %v1854_v13, 0.0 }
 0x2a9   : > { %v4266_v16 = vpop.f32.mrf.mxu0 }
 0x2aa   : > { %4331 = vmatprep.mubr.msk.bf16.mxu1 %vm1114_vm2, %v2092_v15  ;;  %v1857_v17 = vadd.f32 %v4266_v16, %v5110_v3  ;;  %v2040_v21 = vmax.f32 %v1846_v40, 0.0 }
 0x2ab   : > { %4332 = vmatmul.mubr.msk.bf16.gmra.mxu1 %vm1114_vm2, %v2093_v12  ;;  %v1848_v20 = vpop.f32.mrf.mxu0 }
 0x2ac   : > { %v2043_v22 = vmax.f32 %v1857_v17, 0.0  ;;  %v1849_v23 = vadd.f32 %v5110_v3, %v1848_v20 }
 0x2ad   : > { %v4269_v24 = vpop.f32.mrf.mxu0 }
 0x2ae   : > { %v2041_v25 = vmax.f32 %v1849_v23, 0.0  ;;  %v2095_v26 = vpack.c.bf16 %v2043_v22, %v2042_v19  ;;  %v1870_v27 = vadd.f32 %v4269_v24, %v5110_v3 }
 0x2af   : > { %v1861_v28 = vpop.f32.mrf.mxu0 }
 0x2b0   : > { %v2094_v29 = vpack.c.bf16 %v2041_v25, %v2040_v21  ;;  %v1862_v30 = vadd.f32 %v5110_v3, %v1861_v28  ;;  %v2046_v33 = vmax.f32 %v1870_v27, 0.0 }
 0x2b1   : > { %v4270_v31 = vpop.f32.mrf.mxu0 }
 0x2b2   : > { %4335 = vmatprep.mubr.msk.bf16.mxu1 %vm1114_vm2, %v2094_v29  ;;  %v1873_v32 = vadd.f32 %v4270_v31, %v5110_v3  ;;  %v2044_v35 = vmax.f32 %v1862_v30, 0.0 }
 0x2b3   : > { %4336 = vmatmul.mubr.msk.bf16.gmra.mxu1 %vm1114_vm2, %v2095_v26  ;;  %v1864_v34 = vpop.f32.mrf.mxu0 }
 0x2b4   : > { %v2047_v36 = vmax.f32 %v1873_v32, 0.0  ;;  %v1865_v37 = vadd.f32 %v5110_v3, %v1864_v34 }
 0x2b5   : > { %v4273_v38 = vpop.f32.mrf.mxu0 }
 0x2b6   : > { %v2045_v39 = vmax.f32 %v1865_v37, 0.0  ;;  %v2097_v41 = vpack.c.bf16 %v2047_v36, %v2046_v33  ;;  %v1886_v42 = vadd.f32 %v4273_v38, %v5110_v3  ;;  %v4599_v36 = vmov 0  }
 0x2b7   : > { %v1877_v43 = vpop.f32.mrf.mxu0  ;;  %2776 = vmatprep.mubr.bf16.mxu0 %v4599_v36 }
 0x2b8   : > { %v2096_v44 = vpack.c.bf16 %v2045_v39, %v2044_v35  ;;  %v1878_v45 = vadd.f32 %v5110_v3, %v1877_v43  ;;  %v2050_v48 = vmax.f32 %v1886_v42, 0.0 }
 0x2b9   : > { %v4274_v46 = vpop.f32.mrf.mxu0 }
 0x2ba   : > { %4339 = vmatprep.mubr.msk.bf16.mxu1 %vm1114_vm2, %v2096_v44  ;;  %v1889_v47 = vadd.f32 %v4274_v46, %v5110_v3  ;;  %v2048_v50 = vmax.f32 %v1878_v45, 0.0 }
 0x2bb   : > { %4340 = vmatmul.mubr.msk.bf16.gmra.mxu1 %vm1114_vm2, %v2097_v41  ;;  %v1880_v49 = vpop.f32.mrf.mxu0 }
 0x2bc   : > { %v2051_v51 = vmax.f32 %v1889_v47, 0.0  ;;  %v1881_v52 = vadd.f32 %v5110_v3, %v1880_v49 }
 0x2bd   : > { %v4277_v53 = vpop.f32.mrf.mxu0 }
 0x2be   : > { %v2049_v54 = vmax.f32 %v1881_v52, 0.0  ;;  %v2099_v55 = vpack.c.bf16 %v2051_v51, %v2050_v48  ;;  %v1902_v18 = vadd.f32 %v4277_v53, %v5110_v3 }
 0x2bf   : > { %v1893_v56 = vpop.f32.mrf.mxu0 }
 0x2c0   : > { %v2098_v57 = vpack.c.bf16 %v2049_v54, %v2048_v50  ;;  %v1894_v58 = vadd.f32 %v5110_v3, %v1893_v56  ;;  %v2054_v61 = vmax.f32 %v1902_v18, 0.0 }
 0x2c1   : > { %v4278_v59 = vpop.f32.mrf.mxu0 }
 0x2c2   : > { %4343 = vmatprep.mubr.msk.bf16.mxu1 %vm1114_vm2, %v2098_v57  ;;  %v1905_v60 = vadd.f32 %v4278_v59, %v5110_v3  ;;  %v2052_v63 = vmax.f32 %v1894_v58, 0.0 }
 0x2c3   : > { %4344 = vmatmul.mubr.msk.bf16.gmra.mxu1 %vm1114_vm2, %v2099_v55  ;;  %v1896_v62 = vpop.f32.mrf.mxu0 }
 0x2c4   : > { %v2055_v0 = vmax.f32 %v1905_v60, 0.0  ;;  %v1897_v1 = vadd.f32 %v5110_v3, %v1896_v62 }
 0x2c5   : > { %v4281_v2 = vpop.f32.mrf.mxu0 }
 0x2c6   : > { %v2053_v4 = vmax.f32 %v1897_v1, 0.0  ;;  %v2101_v5 = vpack.c.bf16 %v2055_v0, %v2054_v61  ;;  %v1918_v6 = vadd.f32 %v4281_v2, %v5110_v3 }
 0x2c7   : > { %v1909_v7 = vpop.f32.mrf.mxu0 }
 0x2c8   : > { %v2100_v8 = vpack.c.bf16 %v2053_v4, %v2052_v63  ;;  %v1910_v9 = vadd.f32 %v5110_v3, %v1909_v7  ;;  %v2058_v12 = vmax.f32 %v1918_v6, 0.0 }
 0x2c9   : > { %v4282_v10 = vpop.f32.mrf.mxu0 }
 0x2ca   : > { %4347 = vmatprep.mubr.msk.bf16.mxu1 %vm1114_vm2, %v2100_v8  ;;  %v1921_v11 = vadd.f32 %v4282_v10, %v5110_v3  ;;  %v2056_v14 = vmax.f32 %v1910_v9, 0.0 }
 0x2cb   : > { %4348 = vmatmul.mubr.msk.bf16.gmra.mxu1 %vm1114_vm2, %v2101_v5  ;;  %v1912_v13 = vpop.f32.mrf.mxu0 }
 0x2cc   : > { %v2059_v15 = vmax.f32 %v1921_v11, 0.0  ;;  %v1913_v40 = vadd.f32 %v5110_v3, %v1912_v13 }
 0x2cd   : > { %v4285_v16 = vpop.f32.mrf.mxu0 }
 0x2ce   : > { %v2057_v17 = vmax.f32 %v1913_v40, 0.0  ;;  %v2103_v19 = vpack.c.bf16 %v2059_v15, %v2058_v12  ;;  %v1934_v20 = vadd.f32 %v4285_v16, %v5110_v3 }
 0x2cf   : > { %v1925_v21 = vpop.f32.mrf.mxu0 }
 0x2d0   : > { %v2102_v22 = vpack.c.bf16 %v2057_v17, %v2056_v14  ;;  %v1926_v23 = vadd.f32 %v5110_v3, %v1925_v21  ;;  %v2062_v26 = vmax.f32 %v1934_v20, 0.0 }
 0x2d1   : > { %v4286_v24 = vpop.f32.mrf.mxu0 }
 0x2d2   : > { %4351 = vmatprep.mubr.msk.bf16.mxu1 %vm1114_vm2, %v2102_v22  ;;  %v1937_v25 = vadd.f32 %v4286_v24, %v5110_v3  ;;  %v2060_v28 = vmax.f32 %v1926_v23, 0.0 }
 0x2d3   : > { %4352 = vmatmul.mubr.msk.bf16.gmra.mxu1 %vm1114_vm2, %v2103_v19  ;;  %v1928_v27 = vpop.f32.mrf.mxu0 }
 0x2d4   : > { %v2063_v29 = vmax.f32 %v1937_v25, 0.0  ;;  %v1929_v30 = vadd.f32 %v5110_v3, %v1928_v27 }
 0x2d5   : > { %v4289_v31 = vpop.f32.mrf.mxu0 }
 0x2d6   : > { %v2061_v32 = vmax.f32 %v1929_v30, 0.0  ;;  %v2105_v33 = vpack.c.bf16 %v2063_v29, %v2062_v26  ;;  %v1950_v34 = vadd.f32 %v4289_v31, %v5110_v3 }
 0x2d7   : > { %v1941_v35 = vpop.f32.mrf.mxu0 }
 0x2d8   : > { %v2104_v37 = vpack.c.bf16 %v2061_v32, %v2060_v28  ;;  %v1942_v38 = vadd.f32 %v5110_v3, %v1941_v35  ;;  %v2066_v42 = vmax.f32 %v1950_v34, 0.0 }
 0x2d9   : > { %v4290_v39 = vpop.f32.mrf.mxu0 }
 0x2da   : > { %v1953_v41 = vadd.f32 %v4290_v39, %v5110_v3  ;;  %4355 = vmatprep.mubr.msk.bf16.mxu1 %vm1114_vm2, %v2104_v37  ;;  %v2064_v44 = vmax.f32 %v1942_v38, 0.0 }
 0x2db   : > { %v1944_v43 = vpop.f32.mrf.mxu0  ;;  %4356 = vmatmul.mubr.msk.bf16.gmra.mxu1 %vm1114_vm2, %v2105_v33 }
 0x2dc   : > { %v2067_v45 = vmax.f32 %v1953_v41, 0.0  ;;  %v1945_v46 = vadd.f32 %v5110_v3, %v1944_v43 }
 0x2dd   : > { %v4293_v47 = vpop.f32.mrf.mxu0 }
 0x2de   : > { %v2065_v48 = vmax.f32 %v1945_v46, 0.0  ;;  %v2107_v49 = vpack.c.bf16 %v2067_v45, %v2066_v42  ;;  %v1966_v50 = vadd.f32 %v4293_v47, %v5110_v3  ;;  %v5224_v46 = vld [vmem:[%s5641_s8] ss:$0 sm:$0xff] }
 0x2df   : > { %v1957_v51 = vpop.f32.mrf.mxu0 }
 0x2e0   : > { %v2106_v52 = vpack.c.bf16 %v2065_v48, %v2064_v44  ;;  %v1958_v53 = vadd.f32 %v5110_v3, %v1957_v51  ;;  %v2070_v18 = vmax.f32 %v1966_v50, 0.0 }
 0x2e1   : > { %v4294_v54 = vpop.f32.mrf.mxu0 }
 0x2e2   : > { %v1969_v55 = vadd.f32 %v4294_v54, %v5110_v3  ;;  %4359 = vmatprep.mubr.msk.bf16.mxu1 %vm1114_vm2, %v2106_v52  ;;  %v2068_v57 = vmax.f32 %v1958_v53, 0.0 }
 0x2e3   : > { %v1960_v56 = vpop.f32.mrf.mxu0  ;;  %4360 = vmatmul.mubr.msk.bf16.gmra.mxu1 %vm1114_vm2, %v2107_v49 }
 0x2e4   : > { %v2071_v58 = vmax.f32 %v1969_v55, 0.0  ;;  %v1961_v59 = vadd.f32 %v5110_v3, %v1960_v56 }
 0x2e5   : > { %v4297_v60 = vpop.f32.mrf.mxu0 }
 0x2e6   : > { %v2069_v61 = vmax.f32 %v1961_v59, 0.0  ;;  %v2109_v62 = vpack.c.bf16 %v2071_v58, %v2070_v18  ;;  %v1982_v63 = vadd.f32 %v4297_v60, %v5110_v3 }
 0x2e7   : > { %v1973_v0 = vpop.f32.mrf.mxu0 }
 0x2e8   : > { %v2108_v1 = vpack.c.bf16 %v2069_v61, %v2068_v57  ;;  %v1974_v2 = vadd.f32 %v5110_v3, %v1973_v0  ;;  %v2074_v6 = vmax.f32 %v1982_v63, 0.0 }
 0x2e9   : > { %v4298_v4 = vpop.f32.mrf.mxu0 }
 0x2ea   : > { %v1985_v5 = vadd.f32 %v4298_v4, %v5110_v3  ;;  %4363 = vmatprep.mubr.msk.bf16.mxu1 %vm1114_vm2, %v2108_v1  ;;  %v2072_v8 = vmax.f32 %v1974_v2, 0.0 }
 0x2eb   : > { %v1976_v7 = vpop.f32.mrf.mxu0  ;;  %4364 = vmatmul.mubr.msk.bf16.gmra.mxu1 %vm1114_vm2, %v2109_v62 }
 0x2ec   : > { %v2075_v9 = vmax.f32 %v1985_v5, 0.0  ;;  %v1977_v10 = vadd.f32 %v5110_v3, %v1976_v7 }
 0x2ed   : > { %v4301_v11 = vpop.f32.mrf.mxu0 }
 0x2ee   : > { %v2073_v12 = vmax.f32 %v1977_v10, 0.0  ;;  %v2111_v13 = vpack.c.bf16 %v2075_v9, %v2074_v6  ;;  %v1998_v14 = vadd.f32 %v4301_v11, %v5110_v3 }
 0x2ef   : > { %v1989_v15 = vpop.f32.mrf.mxu0 }
 0x2f0   : > { %v2110_v40 = vpack.c.bf16 %v2073_v12, %v2072_v8  ;;  %v1990_v16 = vadd.f32 %v5110_v3, %v1989_v15  ;;  %v2078_v20 = vmax.f32 %v1998_v14, 0.0 }
 0x2f1   : > { %v4302_v17 = vpop.f32.mrf.mxu0 }
 0x2f2   : > { %v2001_v19 = vadd.f32 %v4302_v17, %v5110_v3  ;;  %4367 = vmatprep.mubr.msk.bf16.mxu1 %vm1114_vm2, %v2110_v40  ;;  %v2076_v22 = vmax.f32 %v1990_v16, 0.0 }
 0x2f3   : > { %v1992_v21 = vpop.f32.mrf.mxu0  ;;  %4368 = vmatmul.mubr.msk.bf16.gmra.mxu1 %vm1114_vm2, %v2111_v13 }
 0x2f4   : > { %v2079_v23 = vmax.f32 %v2001_v19, 0.0  ;;  %v1993_v24 = vadd.f32 %v5110_v3, %v1992_v21 }
 0x2f5   : > { %v4305_v25 = vpop.f32.mrf.mxu0 }
 0x2f6   : > { %v2077_v26 = vmax.f32 %v1993_v24, 0.0  ;;  %v2113_v27 = vpack.c.bf16 %v2079_v23, %v2078_v20  ;;  %v2014_v28 = vadd.f32 %v4305_v25, %v5110_v3 }
 0x2f7   : > { %v2005_v29 = vpop.f32.mrf.mxu0 }
 0x2f8   : > { %v2112_v30 = vpack.c.bf16 %v2077_v26, %v2076_v22  ;;  %v2006_v31 = vadd.f32 %v5110_v3, %v2005_v29  ;;  %v2082_v34 = vmax.f32 %v2014_v28, 0.0 }
 0x2f9   : > { %v4306_v32 = vpop.f32.mrf.mxu0 }
 0x2fa   : > { %v2017_v33 = vadd.f32 %v4306_v32, %v5110_v3  ;;  %4371 = vmatprep.mubr.msk.bf16.mxu1 %vm1114_vm2, %v2112_v30  ;;  %v2080_v37 = vmax.f32 %v2006_v31, 0.0 }
 0x2fb   : > { %v2008_v35 = vpop.f32.mrf.mxu0  ;;  %4372 = vmatmul.mubr.msk.bf16.gmra.mxu1 %vm1114_vm2, %v2113_v27 }
 0x2fc   : > { %v2083_v38 = vmax.f32 %v2017_v33, 0.0  ;;  %v2009_v39 = vadd.f32 %v5110_v3, %v2008_v35 }
 0x2fe   : > { %v2081_v41 = vmax.f32 %v2009_v39, 0.0  ;;  %v2115_v42 = vpack.c.bf16 %v2083_v38, %v2082_v34 }
 0x300   : > { %v2114_v43 = vpack.c.bf16 %v2081_v41, %v2080_v37 }
 0x302   : > { %4375 = vmatprep.mubr.msk.bf16.mxu1 %vm1114_vm2, %v2114_v43 }
 0x303   : > { %4376 = vmatmul.mubr.msk.bf16.gmra.mxu1 %vm1114_vm2, %v2115_v42 }
 0x34b   : > { %v4317_v44 = vpop.f32.mrf.mxu1 }
 0x34c   : > { %v2294_v56 = vadd.f32 %v4317_v44, %v5224_v46 }
 0x34d   : > { %v2285_v45 = vpop.f32.mrf.mxu1 }
 0x34e   : > { %v2286_v48 = vadd.f32 %v5224_v46, %v2285_v45  ;;  %v2542_v59 = vmax.f32 %v2294_v56, 0.0 }
 0x34f   : > { %v4318_v47 = vpop.f32.mrf.mxu1 }
 0x350   : > { %v2540_v51 = vmax.f32 %v2286_v48, 0.0  ;;  %v2297_v54 = vadd.f32 %v4318_v47, %v5224_v46 }
 0x351   : > { %v2288_v49 = vpop.f32.mrf.mxu1 }
 0x352   : > { %v2289_v3 = vadd.f32 %v5224_v46, %v2288_v49  ;;  %v2543_v57 = vmax.f32 %v2297_v54, 0.0 }
 0x353   : > { %v4321_v50 = vpop.f32.mrf.mxu1 }
 0x354   : > { %v2541_v52 = vmax.f32 %v2289_v3, 0.0  ;;  %v2605_v60 = vpack.c.bf16 %v2543_v57, %v2542_v59  ;;  %v2310_v7 = vadd.f32 %v4321_v50, %v5224_v46 }
 0x355   : > { %v2301_v53 = vpop.f32.mrf.mxu1 }
 0x356   : > { %v2604_v55 = vpack.c.bf16 %v2541_v52, %v2540_v51  ;;  %v2302_v63 = vadd.f32 %v5224_v46, %v2301_v53  ;;  %v2546_v10 = vmax.f32 %v2310_v7, 0.0 }
 0x357   : > { %v4322_v18 = vpop.f32.mrf.mxu1 }
 0x358   : > { %2777 = vmatmul.mubr.bf16.vlgmr.msra.gmra.mxu0 %v2604_v55  ;;  %v2544_v2 = vmax.f32 %v2302_v63, 0.0  ;;  %v2313_v4 = vadd.f32 %v4322_v18, %v5224_v46 }
 0x359   : > { %2786 = vmatprep.mubr.bf16.mxu0 %v4599_v36  ;;  %v2304_v58 = vpop.f32.mrf.mxu1 }
 0x35a   : > { %v2305_v61 = vadd.f32 %v5224_v46, %v2304_v58  ;;  %v2547_v8 = vmax.f32 %v2313_v4, 0.0 }
 0x35b   : > { %v4325_v62 = vpop.f32.mrf.mxu1 }
 0x35c   : > { %v2545_v0 = vmax.f32 %v2305_v61, 0.0  ;;  %v2607_v11 = vpack.c.bf16 %v2547_v8, %v2546_v10  ;;  %v2326_v21 = vadd.f32 %v4325_v62, %v5224_v46 }
 0x35d   : > { %v2317_v1 = vpop.f32.mrf.mxu1 }
 0x35e   : > { %v2606_v5 = vpack.c.bf16 %v2545_v0, %v2544_v2  ;;  %v2318_v14 = vadd.f32 %v5224_v46, %v2317_v1  ;;  %v2550_v24 = vmax.f32 %v2326_v21, 0.0 }
 0x35f   : > { %v4326_v6 = vpop.f32.mrf.mxu1 }
 0x360   : > { %2787 = vmatmul.mubr.bf16.gmra.mxu0 %v2605_v60  ;;  %v2548_v16 = vmax.f32 %v2318_v14, 0.0  ;;  %v2329_v17 = vadd.f32 %v4326_v6, %v5224_v46 }
 0x361   : > { %2796 = vmatprep.mubr.bf16.mxu0 %v4599_v36  ;;  %v2320_v9 = vpop.f32.mrf.mxu1 }
 0x362   : > { %v2321_v12 = vadd.f32 %v5224_v46, %v2320_v9  ;;  %v2551_v22 = vmax.f32 %v2329_v17, 0.0 }
 0x363   : > { %v4329_v13 = vpop.f32.mrf.mxu1 }
 0x364   : > { %v2549_v15 = vmax.f32 %v2321_v12, 0.0  ;;  %v2609_v25 = vpack.c.bf16 %v2551_v22, %v2550_v24  ;;  %v2342_v32 = vadd.f32 %v4329_v13, %v5224_v46 }
 0x365   : > { %v2333_v40 = vpop.f32.mrf.mxu1 }
 0x366   : > { %v2608_v19 = vpack.c.bf16 %v2549_v15, %v2548_v16  ;;  %v2334_v28 = vadd.f32 %v5224_v46, %v2333_v40  ;;  %v2554_v37 = vmax.f32 %v2342_v32, 0.0 }
 0x367   : > { %v4330_v20 = vpop.f32.mrf.mxu1 }
 0x368   : > { %2797 = vmatmul.mubr.bf16.gmra.mxu0 %v2606_v5  ;;  %v2552_v31 = vmax.f32 %v2334_v28, 0.0  ;;  %v2345_v33 = vadd.f32 %v4330_v20, %v5224_v46 }
 0x369   : > { %2806 = vmatprep.mubr.bf16.mxu0 %v4599_v36  ;;  %v2336_v23 = vpop.f32.mrf.mxu1 }
 0x36a   : > { %v2337_v26 = vadd.f32 %v5224_v46, %v2336_v23  ;;  %v2555_v38 = vmax.f32 %v2345_v33, 0.0 }
 0x36b   : > { %v4333_v27 = vpop.f32.mrf.mxu1 }
 0x36c   : > { %v2553_v29 = vmax.f32 %v2337_v26, 0.0  ;;  %v2611_v41 = vpack.c.bf16 %v2555_v38, %v2554_v37  ;;  %v2358_v49 = vadd.f32 %v4333_v27, %v5224_v46 }
 0x36d   : > { %v2349_v30 = vpop.f32.mrf.mxu1 }
 0x36e   : > { %v2610_v34 = vpack.c.bf16 %v2553_v29, %v2552_v31  ;;  %v2350_v42 = vadd.f32 %v5224_v46, %v2349_v30  ;;  %v2558_v52 = vmax.f32 %v2358_v49, 0.0 }
 0x36f   : > { %v4334_v35 = vpop.f32.mrf.mxu1 }
 0x370   : > { %2807 = vmatmul.mubr.bf16.gmra.mxu0 %v2607_v11  ;;  %v2556_v45 = vmax.f32 %v2350_v42, 0.0  ;;  %v2361_v3 = vadd.f32 %v4334_v35, %v5224_v46 }
 0x371   : > { %2816 = vmatprep.mubr.bf16.mxu0 %v4599_v36  ;;  %v2352_v39 = vpop.f32.mrf.mxu1 }
 0x372   : > { %v2353_v43 = vadd.f32 %v5224_v46, %v2352_v39  ;;  %v2559_v53 = vmax.f32 %v2361_v3, 0.0 }
 0x373   : > { %v4337_v44 = vpop.f32.mrf.mxu1 }
 0x374   : > { %v2557_v47 = vmax.f32 %v2353_v43, 0.0  ;;  %v2613_v55 = vpack.c.bf16 %v2559_v53, %v2558_v52  ;;  %v2374_v61 = vadd.f32 %v4337_v44, %v5224_v46 }
 0x375   : > { %v2365_v48 = vpop.f32.mrf.mxu1 }
 0x376   : > { %v2612_v50 = vpack.c.bf16 %v2557_v47, %v2556_v45  ;;  %v2366_v18 = vadd.f32 %v5224_v46, %v2365_v48  ;;  %v2562_v1 = vmax.f32 %v2374_v61, 0.0 }
 0x377   : > { %v4338_v51 = vpop.f32.mrf.mxu1 }
 0x378   : > { %2817 = vmatmul.mubr.bf16.gmra.mxu0 %v2608_v19  ;;  %v2560_v58 = vmax.f32 %v2366_v18, 0.0  ;;  %v2377_v62 = vadd.f32 %v4338_v51, %v5224_v46 }
 0x379   : > { %2826 = vmatprep.mubr.bf16.mxu0 %v4599_v36  ;;  %v2368_v54 = vpop.f32.mrf.mxu1 }
 0x37a   : > { %v2369_v56 = vadd.f32 %v5224_v46, %v2368_v54  ;;  %v2563_v2 = vmax.f32 %v2377_v62, 0.0 }
 0x37b   : > { %v4341_v57 = vpop.f32.mrf.mxu1 }
 0x37c   : > { %v2561_v59 = vmax.f32 %v2369_v56, 0.0  ;;  %v2615_v5 = vpack.c.bf16 %v2563_v2, %v2562_v1  ;;  %v2390_v12 = vadd.f32 %v4341_v57, %v5224_v46 }
 0x37d   : > { %v2381_v60 = vpop.f32.mrf.mxu1 }
 0x37e   : > { %v2614_v63 = vpack.c.bf16 %v2561_v59, %v2560_v58  ;;  %v2382_v6 = vadd.f32 %v5224_v46, %v2381_v60  ;;  %v2566_v40 = vmax.f32 %v2390_v12, 0.0 }
 0x37f   : > { %v4342_v0 = vpop.f32.mrf.mxu1 }
 0x380   : > { %2827 = vmatmul.mubr.bf16.gmra.mxu0 %v2609_v25  ;;  %v2564_v9 = vmax.f32 %v2382_v6, 0.0  ;;  %v2393_v13 = vadd.f32 %v4342_v0, %v5224_v46 }
 0x381   : > { %2836 = vmatprep.mubr.bf16.mxu0 %v4599_v36  ;;  %v2384_v4 = vpop.f32.mrf.mxu1 }
 0x382   : > { %v2385_v7 = vadd.f32 %v5224_v46, %v2384_v4  ;;  %v2567_v16 = vmax.f32 %v2393_v13, 0.0 }
 0x383   : > { %v4345_v8 = vpop.f32.mrf.mxu1 }
 0x384   : > { %v2565_v10 = vmax.f32 %v2385_v7, 0.0  ;;  %v2617_v19 = vpack.c.bf16 %v2567_v16, %v2566_v40  ;;  %v2406_v26 = vadd.f32 %v4345_v8, %v5224_v46 }
 0x385   : > { %v2397_v11 = vpop.f32.mrf.mxu1 }
 0x386   : > { %v2616_v14 = vpack.c.bf16 %v2565_v10, %v2564_v9  ;;  %v2398_v20 = vadd.f32 %v5224_v46, %v2397_v11  ;;  %v2570_v30 = vmax.f32 %v2406_v26, 0.0 }
 0x387   : > { %v4346_v15 = vpop.f32.mrf.mxu1 }
 0x388   : > { %2837 = vmatmul.mubr.bf16.gmra.mxu0 %v2610_v34  ;;  %v2568_v23 = vmax.f32 %v2398_v20, 0.0  ;;  %v2409_v27 = vadd.f32 %v4346_v15, %v5224_v46 }
 0x389   : > { %2846 = vmatprep.mubr.bf16.mxu0 %v4599_v36  ;;  %v2400_v17 = vpop.f32.mrf.mxu1 }
 0x38a   : > { %v2401_v21 = vadd.f32 %v5224_v46, %v2400_v17  ;;  %v2571_v31 = vmax.f32 %v2409_v27, 0.0 }
 0x38b   : > { %v4349_v22 = vpop.f32.mrf.mxu1 }
 0x38c   : > { %v2569_v24 = vmax.f32 %v2401_v21, 0.0  ;;  %v2619_v33 = vpack.c.bf16 %v2571_v31, %v2570_v30  ;;  %v2422_v42 = vadd.f32 %v4349_v22, %v5224_v46  ;;  %v2654_v31 = vlaneseq }
 0x38d   : > { %v2413_v25 = vpop.f32.mrf.mxu1 }
 0x38e   : > { %v2618_v28 = vpack.c.bf16 %v2569_v24, %v2568_v23  ;;  %v2414_v34 = vadd.f32 %v5224_v46, %v2413_v25  ;;  %v2574_v47 = vmax.f32 %v2422_v42, 0.0  ;;  %vm3653_vm3 = vcmp.lt.s32.totalorder %v2654_v31, 256 }
 0x38f   : > { %v4350_v29 = vpop.f32.mrf.mxu1 }
 0x390   : > { %2847 = vmatmul.mubr.bf16.gmra.mxu0 %v2611_v41  ;;  %v2572_v38 = vmax.f32 %v2414_v34, 0.0  ;;  %v2425_v43 = vadd.f32 %v4350_v29, %v5224_v46 }
 0x391   : > { %2856 = vmatprep.mubr.bf16.mxu0 %v4599_v36  ;;  %v2416_v32 = vpop.f32.mrf.mxu1 }
 0x392   : > { %v2417_v35 = vadd.f32 %v5224_v46, %v2416_v32  ;;  %v2575_v48 = vmax.f32 %v2425_v43, 0.0  ;;  %v2652_v43 = vld [vmem:[%s5643_s10] sm:$0x3] }
 0x393   : > { %v4353_v37 = vpop.f32.mrf.mxu1 }
 0x394   : > { %v2573_v39 = vmax.f32 %v2417_v35, 0.0  ;;  %v2621_v3 = vpack.c.bf16 %v2575_v48, %v2574_v47  ;;  %v2438_v18 = vadd.f32 %v4353_v37, %v5224_v46  ;;  %v5301_v35 = vshrl.u32 %v2654_v31, 7 }
 0x395   : > { %v2429_v41 = vpop.f32.mrf.mxu1 }
 0x396   : > { %v2620_v44 = vpack.c.bf16 %v2573_v39, %v2572_v38  ;;  %v2578_v59 = vmax.f32 %v2438_v18, 0.0  ;;  %v2656_v42 = vsub.s32 0, %v5301_v35 }
 0x397   : > { %v4354_v45 = vpop.f32.mrf.mxu1 }
 0x398   : > { %2857 = vmatmul.mubr.bf16.gmra.mxu0 %v2612_v50  ;;  %v2430_v50 = vadd.f32 %v5224_v46, %v2429_v41  ;;  %v2441_v56 = vadd.f32 %v4354_v45, %v5224_v46  ;;  %v2660_v45 = vsub.s32 1, %v5301_v35 }
 0x399   : > { %2866 = vmatprep.mubr.bf16.mxu0 %v4599_v36  ;;  %v2432_v49 = vpop.f32.mrf.mxu1 }
 0x39a   : > { %v2433_v51 = vadd.f32 %v5224_v46, %v2432_v49  ;;  %v2576_v53 = vmax.f32 %v2430_v50, 0.0  ;;  %v2579_v60 = vmax.f32 %v2441_v56, 0.0  ;;  %v5313_v50 = vrot.slane %v2652_v43, %v2656_v42 }
 0x39b   : > { %v4357_v52 = vpop.f32.mrf.mxu1 }
 0x39c   : > { %v2577_v54 = vmax.f32 %v2433_v51, 0.0  ;;  %v2623_v62 = vpack.c.bf16 %v2579_v60, %v2578_v59  ;;  %v2454_v6 = vadd.f32 %v4357_v52, %v5224_v46  ;;  %v5317_v51 = vrot.slane %v2652_v43, %v2660_v45 }
 0x39e   : > { %v2622_v57 = vpack.c.bf16 %v2577_v54, %v2576_v53  ;;  %v2582_v10 = vmax.f32 %v2454_v6, 0.0 }
 0x3a0   : > { %2867 = vmatmul.mubr.bf16.gmra.mxu0 %v2613_v55  ;;  %v2445_v55 = vpop.f32.mrf.mxu1 }
 0x3a1   : > { %2876 = vmatprep.mubr.bf16.mxu0 %v4599_v36 }
 0x3a2   : > { %v4358_v58 = vpop.f32.mrf.mxu1 }
 0x3a3   : > { %v2457_v7 = vadd.f32 %v4358_v58, %v5224_v46 }
 0x3a4   : > { %v2448_v61 = vpop.f32.mrf.mxu1 }
 0x3a5   : > { %v2449_v0 = vadd.f32 %v5224_v46, %v2448_v61  ;;  %v2583_v11 = vmax.f32 %v2457_v7, 0.0 }
 0x3a6   : > { %v4361_v1 = vpop.f32.mrf.mxu1 }
 0x3a7   : > { %v2581_v4 = vmax.f32 %v2449_v0, 0.0  ;;  %v2625_v13 = vpack.c.bf16 %v2583_v11, %v2582_v10  ;;  %v2470_v20 = vadd.f32 %v4361_v1, %v5224_v46 }
 0x3a8   : > { %2877 = vmatmul.mubr.bf16.gmra.mxu0 %v2614_v63  ;;  %v2446_v63 = vadd.f32 %v5224_v46, %v2445_v55 }
 0x3a9   : > { %2886 = vmatprep.mubr.bf16.mxu0 %v4599_v36  ;;  %v2586_v24 = vmax.f32 %v2470_v20, 0.0 }
 0x3aa   : > { %v2580_v2 = vmax.f32 %v2446_v63, 0.0 }
 0x3ac   : > { %v2624_v8 = vpack.c.bf16 %v2581_v4, %v2580_v2 }
 0x3b0   : > { %2887 = vmatmul.mubr.bf16.gmra.mxu0 %v2615_v5  ;;  %v2461_v5 = vpop.f32.mrf.mxu1 }
 0x3b1   : > { %2896 = vmatprep.mubr.bf16.mxu0 %v4599_v36 }
 0x3b2   : > { %v4362_v9 = vpop.f32.mrf.mxu1 }
 0x3b3   : > { %v2473_v21 = vadd.f32 %v4362_v9, %v5224_v46 }
 0x3b4   : > { %v2464_v12 = vpop.f32.mrf.mxu1 }
 0x3b5   : > { %v2465_v15 = vadd.f32 %v5224_v46, %v2464_v12  ;;  %v2587_v25 = vmax.f32 %v2473_v21, 0.0 }
 0x3b6   : > { %v4365_v40 = vpop.f32.mrf.mxu1 }
 0x3b7   : > { %v2585_v17 = vmax.f32 %v2465_v15, 0.0  ;;  %v2627_v27 = vpack.c.bf16 %v2587_v25, %v2586_v24  ;;  %v2486_v37 = vadd.f32 %v4365_v40, %v5224_v46 }
 0x3b8   : > { %2897 = vmatmul.mubr.bf16.gmra.mxu0 %v2616_v14  ;;  %v2462_v14 = vadd.f32 %v5224_v46, %v2461_v5 }
 0x3b9   : > { %2906 = vmatprep.mubr.bf16.mxu0 %v4599_v36  ;;  %v2590_v47 = vmax.f32 %v2486_v37, 0.0 }
 0x3ba   : > { %v2584_v16 = vmax.f32 %v2462_v14, 0.0 }
 0x3bc   : > { %v2626_v22 = vpack.c.bf16 %v2585_v17, %v2584_v16 }
 0x3c0   : > { %2907 = vmatmul.mubr.bf16.gmra.mxu0 %v2617_v19  ;;  %v2477_v19 = vpop.f32.mrf.mxu1 }
 0x3c1   : > { %2916 = vmatprep.mubr.bf16.mxu0 %v4599_v36 }
 0x3c2   : > { %v4366_v23 = vpop.f32.mrf.mxu1 }
 0x3c3   : > { %v2489_v38 = vadd.f32 %v4366_v23, %v5224_v46 }
 0x3c4   : > { %v2480_v26 = vpop.f32.mrf.mxu1 }
 0x3c5   : > { %v2481_v29 = vadd.f32 %v5224_v46, %v2480_v26  ;;  %v2591_v48 = vmax.f32 %v2489_v38, 0.0 }
 0x3c6   : > { %v4369_v30 = vpop.f32.mrf.mxu1 }
 0x3c7   : > { %v2629_v53 = vpack.c.bf16 %v2591_v48, %v2590_v47  ;;  %v2502_v12 = vadd.f32 %v4369_v30, %v5224_v46 }
 0x3c8   : > { %2917 = vmatmul.mubr.bf16.gmra.mxu0 %v2618_v28  ;;  %v2478_v28 = vadd.f32 %v5224_v46, %v2477_v19  ;;  %v2493_v34 = vpop.f32.mrf.mxu1 }
 0x3c9   : > { %2926 = vmatprep.mubr.bf16.mxu0 %v4599_v36  ;;  %v2494_v54 = vadd.f32 %v5224_v46, %v2493_v34  ;;  %v2594_v26 = vmax.f32 %v2502_v12, 0.0 }
 0x3ca   : > { %v2588_v32 = vmax.f32 %v2478_v28, 0.0  ;;  %v4370_v41 = vpop.f32.mrf.mxu1 }
 0x3cb   : > { %v2592_v61 = vmax.f32 %v2494_v54, 0.0 }
 0x3d0   : > { %2927 = vmatmul.mubr.bf16.gmra.mxu0 %v2619_v33  ;;  %v2589_v33 = vmax.f32 %v2481_v29, 0.0 }
 0x3d1   : > { %2936 = vmatprep.mubr.bf16.mxu0 %v4599_v36 }
 0x3d2   : > { %v2628_v39 = vpack.c.bf16 %v2589_v33, %v2588_v32 }
 0x3d8   : > { %2937 = vmatmul.mubr.bf16.gmra.mxu0 %v2620_v44 }
 0x3d9   : > { %2946 = vmatprep.mubr.bf16.mxu0 %v4599_v36 }
 0x3e0   : > { %2947 = vmatmul.mubr.bf16.gmra.mxu0 %v2621_v3  ;;  %v2496_v3 = vpop.f32.mrf.mxu1 }
 0x3e1   : > { %2956 = vmatprep.mubr.bf16.mxu0 %v4599_v36  ;;  %v2497_v55 = vadd.f32 %v5224_v46, %v2496_v3 }
 0x3e2   : > { %v5321_v56 = vpop.f32.mrf.mxu1 }
 0x3e4   : > { %v2509_v0 = vpop.f32.mrf.mxu1 }
 0x3e5   : > { %v2510_v43 = vadd.f32 %v5224_v46, %v2509_v0 }
 0x3e6   : > { %v4374_v40 = vpop.f32.mrf.mxu1 }
 0x3e8   : > { %2957 = vmatmul.mubr.bf16.gmra.mxu0 %v2622_v57  ;;  %v2512_v29 = vpop.f32.mrf.mxu1 }
 0x3e9   : > { %2966 = vmatprep.mubr.bf16.mxu0 %v4599_v36 }
 0x3ea   : > { %v5340_v48 = vpop.f32.mrf.mxu1 }
 0x3f0   : > { %2967 = vmatmul.mubr.bf16.gmra.mxu0 %v2623_v62  ;;  %v2593_v62 = vmax.f32 %v2497_v55, 0.0 }
 0x3f1   : > { %2976 = vmatprep.mubr.bf16.mxu0 %v4599_v36 }
 0x3f2   : > { %v2630_v14 = vpack.c.bf16 %v2593_v62, %v2592_v61  ;;  %v2525_v62 = vpop.f32.mrf.mxu1 }
 0x3f8   : > { %2977 = vmatmul.mubr.bf16.gmra.mxu0 %v2624_v8 }
 0x3f9   : > { %2986 = vmatprep.mubr.bf16.mxu0 %v4599_v36 }
 0x400   : > { %2987 = vmatmul.mubr.bf16.gmra.mxu0 %v2625_v13  ;;  %v2505_v13 = vadd.f32 %v4370_v41, %v5224_v46 }
 0x401   : > { %2996 = vmatprep.mubr.bf16.mxu0 %v4599_v36 }
 0x408   : > { %2997 = vmatmul.mubr.bf16.gmra.mxu0 %v2626_v22 }
 0x409   : > { %3006 = vmatprep.mubr.bf16.mxu0 %v4599_v36 }
 0x410   : > { %3007 = vmatmul.mubr.bf16.gmra.mxu0 %v2627_v27  ;;  %v2595_v27 = vmax.f32 %v2505_v13, 0.0 }
 0x411   : > { %3016 = vmatprep.mubr.bf16.mxu0 %v4599_v36 }
 0x412   : > { %v2631_v41 = vpack.c.bf16 %v2595_v27, %v2594_v26 }
 0x418   : > { %v2778_v44 = vpop.f32.mrf.mxu0  ;;  %3017 = vmatmul.mubr.bf16.gmra.mxu0 %v2628_v39 }
 0x419   : > { %3026 = vmatprep.mubr.bf16.mxu0 %v4599_v36  ;;  %v2779_v57 = vadd.f32 %v2778_v44, %v5313_v50  ;;  %v2513_v44 = vadd.f32 %v5224_v46, %v2512_v29 }
 0x41a   : > { %v2780_v49 = vpop.f32.mrf.mxu0 }
 0x41b   : > { %v2781_v58 = vadd.f32 %v2780_v49, %v5317_v51  ;;  %v3097_v1 = vmax.f32 %v2779_v57, 0.0  ;;  %v4473_v57 = vld [vmem:[%s5644_s11 + $0x70] ss:$8 sps:$4 sm:$0xff]  }
 0x41c   : > { %v2782_v52 = vpop.f32.mrf.mxu0 }
 0x41d   : > { %v2783_v2 = vadd.f32 %v2782_v52, %v5313_v50  ;;  %v3098_v6 = vmax.f32 %v2781_v58, 0.0  ;;  %v4475_v58 = vld [vmem:[%s5644_s11 + $0x74] ss:$8 sps:$4 sm:$0xff]  }
 0x41e   : > { %v2784_v18 = vpop.f32.mrf.mxu0  ;;  %3590 = vmatprep.subr.bf16.mxu1 %v4475_v58 }
 0x41f   : > { %v2785_v8 = vadd.f32 %v2784_v18, %v5317_v51  ;;  %v3099_v16 = vmax.f32 %v2783_v2, 0.0  ;;  %3591 = vmatpush1.bf16.msra.mxu1 %v4473_v57 }
 0x420   : > { %v2788_v59 = vpop.f32.mrf.mxu0  ;;  %3027 = vmatmul.mubr.bf16.gmra.mxu0 %v2629_v53 }
 0x421   : > { %v2789_v60 = vadd.f32 %v2788_v59, %v5313_v50  ;;  %3036 = vmatprep.mubr.bf16.mxu0 %v4599_v36  ;;  %v3100_v22 = vmax.f32 %v2785_v8, 0.0  ;;  %v2596_v59 = vmax.f32 %v2510_v43, 0.0  ;;  %v2521_v8 = vadd.f32 %v4374_v40, %v5224_v46  ;;  %v4478_v40 = vld [vmem:[%s5644_s11 + $0x64] ss:$8 sps:$4 sm:$0xff]  }
 0x422   : > { %v2790_v63 = vpop.f32.mrf.mxu0  ;;  %3592 = vmatprep.subr.bf16.mxu1 %v4478_v40 }
 0x423   : > { %v3101_v4 = vmax.f32 %v2789_v60, 0.0  ;;  %v2791_v5 = vadd.f32 %v2790_v63, %v5317_v51  ;;  %v2597_v60 = vmax.f32 %v2513_v44, 0.0 }
 0x424   : > { %v2792_v7 = vpop.f32.mrf.mxu0 }
 0x425   : > { %v3225_v9 = vmax.f32 %v3097_v1, %v3101_v4  ;;  %v3102_v10 = vmax.f32 %v2791_v5, 0.0  ;;  %v2793_v11 = vadd.f32 %v2792_v7, %v5313_v50  ;;  %v2518_v7 = vadd.f32 %v5321_v56, %v5224_v46  ;;  %v4476_v56 = vld [vmem:[%s5644_s11 + $0x60] ss:$8 sps:$4 sm:$0xff]  }
 0x426   : > { %v2794_v15 = vpop.f32.mrf.mxu0  ;;  %3593 = vmatpush1.bf16.msra.mxu1 %v4476_v56 }
 0x427   : > { %v3288_v17 = vmax.f32 %v3098_v6, %v3102_v10  ;;  %v3103_v19 = vmax.f32 %v2793_v11, 0.0  ;;  %v2795_v20 = vadd.f32 %v2794_v15, %v5317_v51  ;;  %v4378_v11 = vpop.f32.mrf.mxu1 }
 0x428   : > { %v2798_v21 = vpop.f32.mrf.mxu0  ;;  %3037 = vmatmul.mubr.bf16.gmra.mxu0 %v2630_v14 }
 0x429   : > { %v3226_v23 = vmax.f32 %v3099_v16, %v3103_v19  ;;  %v3104_v24 = vmax.f32 %v2795_v20, 0.0  ;;  %v2799_v25 = vadd.f32 %v2798_v21, %v5313_v50  ;;  %3046 = vmatprep.mubr.bf16.mxu0 %v4599_v36  ;;  %v2598_v20 = vmax.f32 %v2518_v7, 0.0 }
 0x42a   : > { %v2800_v28 = vpop.f32.mrf.mxu0  ;;  %v2599_v21 = vmax.f32 %v2521_v8, 0.0 }
 0x42b   : > { %v3289_v30 = vmax.f32 %v3100_v22, %v3104_v24  ;;  %v3105_v32 = vmax.f32 %v2799_v25, 0.0  ;;  %v2801_v33 = vadd.f32 %v2800_v28, %v5317_v51 }
 0x42c   : > { %v2802_v34 = vpop.f32.mrf.mxu0 }
 0x42d   : > { %v3227_v37 = vmax.f32 %v3225_v9, %v3105_v32  ;;  %v3106_v38 = vmax.f32 %v2801_v33, 0.0  ;;  %v2803_v39 = vadd.f32 %v2802_v34, %v5313_v50  ;;  %v2632_v9 = vpack.c.bf16 %v2597_v60, %v2596_v59 }
 0x42e   : > { %v2804_v47 = vpop.f32.mrf.mxu0  ;;  %v2633_v32 = vpack.c.bf16 %v2599_v21, %v2598_v20  ;;  %v2526_v33 = vadd.f32 %v5224_v46, %v2525_v62 }
 0x42f   : > { %v3290_v49 = vmax.f32 %v3288_v17, %v3106_v38  ;;  %v3107_v3 = vmax.f32 %v2803_v39, 0.0  ;;  %v2805_v52 = vadd.f32 %v2804_v47, %v5317_v51 }
 0x430   : > { %v2808_v53 = vpop.f32.mrf.mxu0  ;;  %3047 = vmatmul.mubr.bf16.gmra.mxu0 %v2631_v41 }
 0x431   : > { %v3228_v54 = vmax.f32 %v3226_v23, %v3107_v3  ;;  %v3108_v55 = vmax.f32 %v2805_v52, 0.0  ;;  %v2809_v18 = vadd.f32 %v2808_v53, %v5313_v50  ;;  %3056 = vmatprep.mubr.bf16.mxu0 %v4599_v36  ;;  %v2528_v23 = vpop.f32.mrf.mxu1  ;;  %v4479_v3 = vld [vmem:[%s5644_s11 + $0x50] ss:$8 sps:$4 sm:$0xff]   ;;  %v4481_v52 = vld [vmem:[%s5644_s11 + $0x54] ss:$8 sps:$4 sm:$0xff]   ;;  %v2600_v53 = vmax.f32 %v2526_v33, 0.0 }
 0x432   : > { %v2810_v61 = vpop.f32.mrf.mxu0  ;;  %v2529_v34 = vadd.f32 %v5224_v46, %v2528_v23  ;;  %3594 = vmatprep.subr.bf16.mxu1 %v4481_v52 }
 0x433   : > { %v3291_v63 = vmax.f32 %v3289_v30, %v3108_v55  ;;  %v3109_v0 = vmax.f32 %v2809_v18, 0.0  ;;  %v2811_v1 = vadd.f32 %v2810_v61, %v5317_v51  ;;  %3595 = vmatpush1.bf16.msra.mxu1 %v4479_v3 }
 0x434   : > { %v2812_v2 = vpop.f32.mrf.mxu0 }
 0x435   : > { %v3229_v4 = vmax.f32 %v3227_v37, %v3109_v0  ;;  %v3110_v5 = vmax.f32 %v2811_v1, 0.0  ;;  %v2813_v6 = vadd.f32 %v2812_v2, %v5313_v50  ;;  %v2537_v0 = vadd.f32 %v4378_v11, %v5224_v46 }
 0x436   : > { %v2814_v10 = vpop.f32.mrf.mxu0 }
 0x437   : > { %v3292_v12 = vmax.f32 %v3290_v49, %v3110_v5  ;;  %v3111_v13 = vmax.f32 %v2813_v6, 0.0  ;;  %v2815_v14 = vadd.f32 %v2814_v10, %v5317_v51 }
 0x438   : > { %v2818_v15 = vpop.f32.mrf.mxu0  ;;  %3057 = vmatmul.mubr.bf16.gmra.mxu0 %v2632_v9 }
 0x439   : > { %v3230_v16 = vmax.f32 %v3228_v54, %v3111_v13  ;;  %v3112_v17 = vmax.f32 %v2815_v14, 0.0  ;;  %v2819_v19 = vadd.f32 %v2818_v15, %v5313_v50  ;;  %3066 = vmatprep.mubr.bf16.mxu0 %v4599_v36  ;;  %v2601_v54 = vmax.f32 %v2529_v34, 0.0 }
 0x43a   : > { %v2820_v22 = vpop.f32.mrf.mxu0 }
 0x43b   : > { %v3293_v24 = vmax.f32 %v3291_v63, %v3112_v17  ;;  %v3113_v25 = vmax.f32 %v2819_v19, 0.0  ;;  %v2821_v26 = vadd.f32 %v2820_v22, %v5317_v51  ;;  %v2534_v63 = vadd.f32 %v5340_v48, %v5224_v46  ;;  %v4482_v48 = vld [vmem:[%s5644_s11 + $0x40] ss:$8 sps:$4 sm:$0xff]   ;;  %v4484_v46 = vld [vmem:[%s5644_s11 + $0x44] ss:$8 sps:$4 sm:$0xff]  }
 0x43c   : > { %v2822_v27 = vpop.f32.mrf.mxu0  ;;  %v2634_v1 = vpack.c.bf16 %v2601_v54, %v2600_v53  ;;  %3596 = vmatprep.subr.bf16.mxu1 %v4484_v46 }
 0x43d   : > { %v3231_v28 = vmax.f32 %v3229_v4, %v3113_v25  ;;  %v3114_v29 = vmax.f32 %v2821_v26, 0.0  ;;  %v2823_v30 = vadd.f32 %v2822_v27, %v5313_v50  ;;  %v2602_v11 = vmax.f32 %v2534_v63, 0.0  ;;  %3597 = vmatpush1.bf16.msra.mxu1 %v4482_v48  ;;  %v4493_v48 = vld [vmem:[%s5644_s11 + $0x14] ss:$8 sps:$4 sm:$0xff]  }
 0x43e   : > { %v2824_v37 = vpop.f32.mrf.mxu0 }
 0x43f   : > { %v3294_v38 = vmax.f32 %v3292_v12, %v3114_v29  ;;  %v3115_v39 = vmax.f32 %v2823_v30, 0.0  ;;  %v2825_v41 = vadd.f32 %v2824_v37, %v5317_v51  ;;  %v2603_v12 = vmax.f32 %v2537_v0, 0.0  ;;  %v4487_v29 = vld [vmem:[%s5644_s11 + $0x34] ss:$8 sps:$4 sm:$0xff]  }
 0x440   : > { %v2828_v43 = vpop.f32.mrf.mxu0  ;;  %3067 = vmatmul.mubr.bf16.gmra.mxu0 %v2633_v32  ;;  %3598 = vmatprep.subr.bf16.mxu1 %v4487_v29 }
 0x441   : > { %v3232_v44 = vmax.f32 %v3230_v16, %v3115_v39  ;;  %v3116_v47 = vmax.f32 %v2825_v41, 0.0  ;;  %v2829_v49 = vadd.f32 %v2828_v43, %v5313_v50  ;;  %3076 = vmatprep.mubr.bf16.mxu0 %v4599_v36  ;;  %v2635_v40 = vpack.c.bf16 %v2603_v12, %v2602_v11 }
 0x442   : > { %v2830_v55 = vpop.f32.mrf.mxu0 }
 0x443   : > { %v3295_v18 = vmax.f32 %v3293_v24, %v3116_v47  ;;  %v3117_v57 = vmax.f32 %v2829_v49, 0.0  ;;  %v2831_v58 = vadd.f32 %v2830_v55, %v5317_v51  ;;  %v4488_v55 = vld [vmem:[%s5644_s11 + $0x20] ss:$8 sps:$4 sm:$0xff]  }
 0x444   : > { %v2832_v59 = vpop.f32.mrf.mxu0 }
 0x445   : > { %v3233_v60 = vmax.f32 %v3231_v28, %v3117_v57  ;;  %v3118_v61 = vmax.f32 %v2831_v58, 0.0  ;;  %v2833_v62 = vadd.f32 %v2832_v59, %v5313_v50  ;;  %v4485_v28 = vld [vmem:[%s5644_s11 + $0x30] ss:$8 sps:$4 sm:$0xff]  }
 0x446   : > { %v2834_v2 = vpop.f32.mrf.mxu0  ;;  %3599 = vmatpush1.bf16.msra.mxu1 %v4485_v28 }
 0x447   : > { %v3296_v4 = vmax.f32 %v3294_v38, %v3118_v61  ;;  %v3119_v5 = vmax.f32 %v2833_v62, 0.0  ;;  %v2835_v6 = vadd.f32 %v2834_v2, %v5317_v51 }
 0x448   : > { %v2838_v7 = vpop.f32.mrf.mxu0  ;;  %3077 = vmatmul.mubr.bf16.gmra.mxu0 %v2634_v1 }
 0x449   : > { %v3234_v8 = vmax.f32 %v3232_v44, %v3119_v5  ;;  %v3120_v9 = vmax.f32 %v2835_v6, 0.0  ;;  %v2839_v10 = vadd.f32 %v2838_v7, %v5313_v50  ;;  %3086 = vmatprep.mubr.bf16.mxu0 %v4599_v36 }
 0x44a   : > { %v2840_v13 = vpop.f32.mrf.mxu0 }
 0x44b   : > { %v3297_v14 = vmax.f32 %v3295_v18, %v3120_v9  ;;  %v3121_v15 = vmax.f32 %v2839_v10, 0.0  ;;  %v2841_v16 = vadd.f32 %v2840_v13, %v5317_v51  ;;  %v4490_v18 = vld [vmem:[%s5644_s11 + $0x24] ss:$8 sps:$4 sm:$0xff]   ;;  %v4491_v10 = vld [vmem:[%s5644_s11 + $0x10] ss:$8 sps:$4 sm:$0xff]  }
 0x44c   : > { %v2842_v17 = vpop.f32.mrf.mxu0  ;;  %3600 = vmatprep.subr.bf16.mxu1 %v4490_v18 }
 0x44d   : > { %v3235_v19 = vmax.f32 %v3233_v60, %v3121_v15  ;;  %v3122_v36 = vmax.f32 %v2841_v16, 0.0  ;;  %v2843_v56 = vadd.f32 %v2842_v17, %v5313_v50  ;;  %3601 = vmatpush1.bf16.msra.mxu1 %v4488_v55 }
 0x44e   : > { %v2844_v20 = vpop.f32.mrf.mxu0  ;;  %3602 = vmatprep.subr.bf16.mxu1 %v4493_v48 }
 0x44f   : > { %v3298_v21 = vmax.f32 %v3296_v4, %v3122_v36  ;;  %v3123_v22 = vmax.f32 %v2843_v56, 0.0  ;;  %v2845_v23 = vadd.f32 %v2844_v20, %v5317_v51 }
 0x450   : > { %v2848_v24 = vpop.f32.mrf.mxu0  ;;  %3087 = vmatmul.mubr.bf16.gmra.mxu0 %v2635_v40 }
 0x451   : > { %v3236_v25 = vmax.f32 %v3234_v8, %v3123_v22  ;;  %v3124_v26 = vmax.f32 %v2845_v23, 0.0  ;;  %v2849_v27 = vadd.f32 %v2848_v24, %v5313_v50  ;;  %3603 = vmatpush1.bf16.msra.mxu1 %v4491_v10  ;;  %v4494_v24 = vld [vmem:[%s5644_s11] ss:$8 sps:$4 sm:$0xff]  }
 0x452   : > { %v2850_v30 = vpop.f32.mrf.mxu0 }
 0x453   : > { %v3299_v32 = vmax.f32 %v3297_v14, %v3124_v26  ;;  %v3125_v33 = vmax.f32 %v2849_v27, 0.0  ;;  %v2851_v34 = vadd.f32 %v2850_v30, %v5317_v51 }
 0x454   : > { %v2852_v37 = vpop.f32.mrf.mxu0 }
 0x455   : > { %v3237_v38 = vmax.f32 %v3235_v19, %v3125_v33  ;;  %v3126_v39 = vmax.f32 %v2851_v34, 0.0  ;;  %v2853_v41 = vadd.f32 %v2852_v37, %v5313_v50 }
 0x456   : > { %v2854_v43 = vpop.f32.mrf.mxu0 }
 0x457   : > { %v3300_v44 = vmax.f32 %v3298_v21, %v3126_v39  ;;  %v3127_v47 = vmax.f32 %v2853_v41, 0.0  ;;  %v2855_v49 = vadd.f32 %v2854_v43, %v5317_v51 }
 0x458   : > { %v2858_v3 = vpop.f32.mrf.mxu0 }
 0x459   : > { %v3238_v52 = vmax.f32 %v3236_v25, %v3127_v47  ;;  %v3128_v53 = vmax.f32 %v2855_v49, 0.0  ;;  %v2859_v54 = vadd.f32 %v2858_v3, %v5313_v50  ;;  %v4496_v25 = vld [vmem:[%s5644_s11 + $0x4] ss:$8 sps:$4 sm:$0xff]   ;;  %v4497_v3 = vld [vmem:[%s5644_s11 + $0xf0] ss:$8 sps:$4 sm:$0xff]  }
 0x45a   : > { %v2860_v57 = vpop.f32.mrf.mxu0  ;;  %3604 = vmatprep.subr.bf16.mxu1 %v4496_v25 }
 0x45b   : > { %v3301_v58 = vmax.f32 %v3299_v32, %v3128_v53  ;;  %v3129_v59 = vmax.f32 %v2859_v54, 0.0  ;;  %v2861_v60 = vadd.f32 %v2860_v57, %v5317_v51  ;;  %3605 = vmatpush1.bf16.msra.mxu1 %v4494_v24 }
 0x45c   : > { %v2862_v61 = vpop.f32.mrf.mxu0 }
 0x45d   : > { %v3239_v62 = vmax.f32 %v3237_v38, %v3129_v59  ;;  %v3130_v63 = vmax.f32 %v2861_v60, 0.0  ;;  %v2863_v0 = vadd.f32 %v2862_v61, %v5313_v50 }
 0x45e   : > { %v2864_v1 = vpop.f32.mrf.mxu0 }
 0x45f   : > { %v3302_v2 = vmax.f32 %v3300_v44, %v3130_v63  ;;  %v3131_v4 = vmax.f32 %v2863_v0, 0.0  ;;  %v2865_v5 = vadd.f32 %v2864_v1, %v5317_v51 }
 0x460   : > { %v2868_v6 = vpop.f32.mrf.mxu0 }
 0x461   : > { %v3240_v7 = vmax.f32 %v3238_v52, %v3131_v4  ;;  %v3132_v8 = vmax.f32 %v2865_v5, 0.0  ;;  %v2869_v9 = vadd.f32 %v2868_v6, %v5313_v50  ;;  %v4499_v52 = vld [vmem:[%s5644_s11 + $0xf4] ss:$8 sps:$4 sm:$0xff]   ;;  %v4500_v6 = vld [vmem:[%s5644_s11 + $0xe0] ss:$8 sps:$4 sm:$0xff]  }
 0x462   : > { %v2870_v46 = vpop.f32.mrf.mxu0  ;;  %3606 = vmatprep.subr.bf16.mxu1 %v4499_v52 }
 0x463   : > { %v3303_v11 = vmax.f32 %v3301_v58, %v3132_v8  ;;  %v3133_v12 = vmax.f32 %v2869_v9, 0.0  ;;  %v2871_v13 = vadd.f32 %v2870_v46, %v5317_v51  ;;  %3607 = vmatpush2.bf16.msra.mxu1 %v4497_v3 }
 0x464   : > { %v2872_v14 = vpop.f32.mrf.mxu0 }
 0x465   : > { %v3241_v15 = vmax.f32 %v3239_v62, %v3133_v12  ;;  %v3134_v16 = vmax.f32 %v2871_v13, 0.0  ;;  %v2873_v17 = vadd.f32 %v2872_v14, %v5313_v50 }
 0x466   : > { %v2874_v19 = vpop.f32.mrf.mxu0 }
 0x467   : > { %v3304_v36 = vmax.f32 %v3302_v2, %v3134_v16  ;;  %v3135_v56 = vmax.f32 %v2873_v17, 0.0  ;;  %v2875_v40 = vadd.f32 %v2874_v19, %v5317_v51 }
 0x468   : > { %v2878_v20 = vpop.f32.mrf.mxu0 }
 0x469   : > { %v3242_v21 = vmax.f32 %v3240_v7, %v3135_v56  ;;  %v3136_v22 = vmax.f32 %v2875_v40, 0.0  ;;  %v2879_v23 = vadd.f32 %v2878_v20, %v5313_v50  ;;  %v4502_v7 = vld [vmem:[%s5644_s11 + $0xe4] ss:$8 sps:$4 sm:$0xff]   ;;  %v4503_v20 = vld [vmem:[%s5644_s11 + $0xd0] ss:$8 sps:$4 sm:$0xff]  }
 0x46a   : > { %v2880_v26 = vpop.f32.mrf.mxu0  ;;  %3608 = vmatprep.subr.bf16.mxu1 %v4502_v7 }
 0x46b   : > { %v3305_v27 = vmax.f32 %v3303_v11, %v3136_v22  ;;  %v3137_v28 = vmax.f32 %v2879_v23, 0.0  ;;  %v2881_v29 = vadd.f32 %v2880_v26, %v5317_v51  ;;  %3609 = vmatpush2.bf16.msra.mxu1 %v4500_v6 }
 0x46c   : > { %v2882_v30 = vpop.f32.mrf.mxu0 }
 0x46d   : > { %v3243_v32 = vmax.f32 %v3241_v15, %v3137_v28  ;;  %v3138_v33 = vmax.f32 %v2881_v29, 0.0  ;;  %v2883_v34 = vadd.f32 %v2882_v30, %v5313_v50 }
 0x46e   : > { %v2884_v37 = vpop.f32.mrf.mxu0 }
 0x46f   : > { %v3306_v38 = vmax.f32 %v3304_v36, %v3138_v33  ;;  %v3139_v39 = vmax.f32 %v2883_v34, 0.0  ;;  %v2885_v41 = vadd.f32 %v2884_v37, %v5317_v51 }
 0x470   : > { %v2888_v43 = vpop.f32.mrf.mxu0 }
 0x471   : > { %v3244_v44 = vmax.f32 %v3242_v21, %v3139_v39  ;;  %v3140_v47 = vmax.f32 %v2885_v41, 0.0  ;;  %v2889_v49 = vadd.f32 %v2888_v43, %v5313_v50  ;;  %v4505_v21 = vld [vmem:[%s5644_s11 + $0xd4] ss:$8 sps:$4 sm:$0xff]   ;;  %v4506_v43 = vld [vmem:[%s5644_s11 + $0xc0] ss:$8 sps:$4 sm:$0xff]  }
 0x472   : > { %v2890_v53 = vpop.f32.mrf.mxu0  ;;  %3610 = vmatprep.subr.bf16.mxu1 %v4505_v21 }
 0x473   : > { %v3307_v54 = vmax.f32 %v3305_v27, %v3140_v47  ;;  %v3141_v55 = vmax.f32 %v2889_v49, 0.0  ;;  %v2891_v18 = vadd.f32 %v2890_v53, %v5317_v51  ;;  %3611 = vmatpush2.bf16.msra.mxu1 %v4503_v20 }
 0x474   : > { %v2892_v57 = vpop.f32.mrf.mxu0 }
 0x475   : > { %v3245_v58 = vmax.f32 %v3243_v32, %v3141_v55  ;;  %v3142_v59 = vmax.f32 %v2891_v18, 0.0  ;;  %v2893_v60 = vadd.f32 %v2892_v57, %v5313_v50 }
 0x476   : > { %v2894_v61 = vpop.f32.mrf.mxu0 }
 0x477   : > { %v3308_v62 = vmax.f32 %v3306_v38, %v3142_v59  ;;  %v3143_v63 = vmax.f32 %v2893_v60, 0.0  ;;  %v2895_v0 = vadd.f32 %v2894_v61, %v5317_v51 }
 0x478   : > { %v2898_v1 = vpop.f32.mrf.mxu0 }
 0x479   : > { %v3246_v2 = vmax.f32 %v3244_v44, %v3143_v63  ;;  %v3144_v4 = vmax.f32 %v2895_v0, 0.0  ;;  %v2899_v5 = vadd.f32 %v2898_v1, %v5313_v50  ;;  %v4508_v44 = vld [vmem:[%s5644_s11 + $0xc4] ss:$8 sps:$4 sm:$0xff]   ;;  %v4509_v1 = vld [vmem:[%s5644_s11 + $0xb0] ss:$8 sps:$4 sm:$0xff]  }
 0x47a   : > { %v2900_v8 = vpop.f32.mrf.mxu0  ;;  %3612 = vmatprep.subr.bf16.mxu1 %v4508_v44  ;;  %v4517_v44 = vld [vmem:[%s5644_s11 + $0x94] ss:$8 sps:$4 sm:$0xff]  }
 0x47b   : > { %v3309_v9 = vmax.f32 %v3307_v54, %v3144_v4  ;;  %v3145_v10 = vmax.f32 %v2899_v5, 0.0  ;;  %v2901_v48 = vadd.f32 %v2900_v8, %v5317_v51  ;;  %3613 = vmatpush2.bf16.msra.mxu1 %v4506_v43 }
 0x47c   : > { %v2902_v46 = vpop.f32.mrf.mxu0 }
 0x47d   : > { %v3247_v11 = vmax.f32 %v3245_v58, %v3145_v10  ;;  %v3146_v12 = vmax.f32 %v2901_v48, 0.0  ;;  %v2903_v13 = vadd.f32 %v2902_v46, %v5313_v50 }
 0x47e   : > { %v2904_v14 = vpop.f32.mrf.mxu0 }
 0x47f   : > { %v3310_v15 = vmax.f32 %v3308_v62, %v3146_v12  ;;  %v3147_v16 = vmax.f32 %v2903_v13, 0.0  ;;  %v2905_v17 = vadd.f32 %v2904_v14, %v5317_v51 }
 0x480   : > { %v2908_v19 = vpop.f32.mrf.mxu0 }
 0x481   : > { %v3248_v36 = vmax.f32 %v3246_v2, %v3147_v16  ;;  %v3148_v56 = vmax.f32 %v2905_v17, 0.0  ;;  %v2909_v40 = vadd.f32 %v2908_v19, %v5313_v50  ;;  %v4511_v2 = vld [vmem:[%s5644_s11 + $0xb4] ss:$8 sps:$4 sm:$0xff]  }
 0x482   : > { %v2910_v22 = vpop.f32.mrf.mxu0  ;;  %3614 = vmatprep.subr.bf16.mxu1 %v4511_v2 }
 0x483   : > { %v3311_v23 = vmax.f32 %v3309_v9, %v3148_v56  ;;  %v3149_v24 = vmax.f32 %v2909_v40, 0.0  ;;  %v2911_v25 = vadd.f32 %v2910_v22, %v5317_v51  ;;  %3615 = vmatpush2.bf16.msra.mxu1 %v4509_v1 }
 0x484   : > { %v2912_v26 = vpop.f32.mrf.mxu0 }
 0x485   : > { %v3249_v27 = vmax.f32 %v3247_v11, %v3149_v24  ;;  %v3150_v28 = vmax.f32 %v2911_v25, 0.0  ;;  %v2913_v29 = vadd.f32 %v2912_v26, %v5313_v50 }
 0x486   : > { %v2914_v30 = vpop.f32.mrf.mxu0 }
 0x487   : > { %v3312_v32 = vmax.f32 %v3310_v15, %v3150_v28  ;;  %v3151_v33 = vmax.f32 %v2913_v29, 0.0  ;;  %v2915_v34 = vadd.f32 %v2914_v30, %v5317_v51  ;;  %v4514_v29 = vld [vmem:[%s5644_s11 + $0xa4] ss:$8 sps:$4 sm:$0xff]  }
 0x488   : > { %v2918_v37 = vpop.f32.mrf.mxu0  ;;  %3616 = vmatprep.subr.bf16.mxu1 %v4514_v29 }
 0x489   : > { %v3250_v38 = vmax.f32 %v3248_v36, %v3151_v33  ;;  %v3152_v39 = vmax.f32 %v2915_v34, 0.0  ;;  %v2919_v41 = vadd.f32 %v2918_v37, %v5313_v50  ;;  %v4512_v34 = vld [vmem:[%s5644_s11 + $0xa0] ss:$8 sps:$4 sm:$0xff]  }
 0x48a   : > { %v2920_v47 = vpop.f32.mrf.mxu0  ;;  %3617 = vmatpush2.bf16.msra.mxu1 %v4512_v34 }
 0x48b   : > { %v3313_v49 = vmax.f32 %v3311_v23, %v3152_v39  ;;  %v3153_v3 = vmax.f32 %v2919_v41, 0.0  ;;  %v2921_v52 = vadd.f32 %v2920_v47, %v5317_v51  ;;  %3618 = vmatprep.subr.bf16.mxu1 %v4517_v44 }
 0x48c   : > { %v2922_v53 = vpop.f32.mrf.mxu0 }
 0x48d   : > { %v3251_v54 = vmax.f32 %v3249_v27, %v3153_v3  ;;  %v3154_v55 = vmax.f32 %v2921_v52, 0.0  ;;  %v2923_v18 = vadd.f32 %v2922_v53, %v5313_v50  ;;  %v4515_v52 = vld [vmem:[%s5644_s11 + $0x90] ss:$8 sps:$4 sm:$0xff]  }
 0x48e   : > { %v2924_v57 = vpop.f32.mrf.mxu0  ;;  %3619 = vmatpush2.bf16.msra.mxu1 %v4515_v52 }
 0x48f   : > { %v3314_v58 = vmax.f32 %v3312_v32, %v3154_v55  ;;  %v3155_v59 = vmax.f32 %v2923_v18, 0.0  ;;  %v2925_v60 = vadd.f32 %v2924_v57, %v5317_v51 }
 0x490   : > { %v2928_v61 = vpop.f32.mrf.mxu0 }
 0x491   : > { %v3252_v62 = vmax.f32 %v3250_v38, %v3155_v59  ;;  %v3156_v63 = vmax.f32 %v2925_v60, 0.0  ;;  %v2929_v0 = vadd.f32 %v2928_v61, %v5313_v50 }
 0x492   : > { %v2930_v4 = vpop.f32.mrf.mxu0 }
 0x493   : > { %v3315_v5 = vmax.f32 %v3313_v49, %v3156_v63  ;;  %v3157_v6 = vmax.f32 %v2929_v0, 0.0  ;;  %v2931_v7 = vadd.f32 %v2930_v4, %v5317_v51 }
 0x494   : > { %v2932_v8 = vpop.f32.mrf.mxu0 }
 0x495   : > { %v3253_v9 = vmax.f32 %v3251_v54, %v3157_v6  ;;  %v3158_v10 = vmax.f32 %v2931_v7, 0.0  ;;  %v2933_v48 = vadd.f32 %v2932_v8, %v5313_v50 }
 0x496   : > { %v2934_v46 = vpop.f32.mrf.mxu0 }
 0x497   : > { %v3316_v11 = vmax.f32 %v3314_v58, %v3158_v10  ;;  %v3159_v12 = vmax.f32 %v2933_v48, 0.0  ;;  %v2935_v13 = vadd.f32 %v2934_v46, %v5317_v51  ;;  %v4520_v58 = vld [vmem:[%s5644_s11 + $0x84] ss:$8 sps:$4 sm:$0xff]  }
 0x498   : > { %v2938_v14 = vpop.f32.mrf.mxu0  ;;  %3620 = vmatprep.subr.bf16.mxu1 %v4520_v58 }
 0x499   : > { %v3254_v15 = vmax.f32 %v3252_v62, %v3159_v12  ;;  %v3160_v16 = vmax.f32 %v2935_v13, 0.0  ;;  %v2939_v17 = vadd.f32 %v2938_v14, %v5313_v50  ;;  %v4518_v62 = vld [vmem:[%s5644_s11 + $0x80] ss:$8 sps:$4 sm:$0xff]  }
 0x49a   : > { %v2940_v19 = vpop.f32.mrf.mxu0  ;;  %3621 = vmatpush2.bf16.msra.mxu1 %v4518_v62 }
 0x49b   : > { %v3317_v36 = vmax.f32 %v3315_v5, %v3160_v16  ;;  %v3161_v56 = vmax.f32 %v2939_v17, 0.0  ;;  %v2941_v40 = vadd.f32 %v2940_v19, %v5317_v51 }
 0x49c   : > { %v2942_v20 = vpop.f32.mrf.mxu0 }
 0x49d   : > { %v3255_v21 = vmax.f32 %v3253_v9, %v3161_v56  ;;  %v3162_v22 = vmax.f32 %v2941_v40, 0.0  ;;  %v2943_v23 = vadd.f32 %v2942_v20, %v5313_v50 }
 0x49e   : > { %v2944_v24 = vpop.f32.mrf.mxu0 }
 0x49f   : > { %v3318_v25 = vmax.f32 %v3316_v11, %v3162_v22  ;;  %v3163_v26 = vmax.f32 %v2943_v23, 0.0  ;;  %v2945_v27 = vadd.f32 %v2944_v24, %v5317_v51 }
 0x4a0   : > { %v2948_v28 = vpop.f32.mrf.mxu0 }
 0x4a1   : > { %v3256_v30 = vmax.f32 %v3254_v15, %v3163_v26  ;;  %v3164_v32 = vmax.f32 %v2945_v27, 0.0  ;;  %v2949_v33 = vadd.f32 %v2948_v28, %v5313_v50 }
 0x4a2   : > { %v2950_v37 = vpop.f32.mrf.mxu0 }
 0x4a3   : > { %v3319_v38 = vmax.f32 %v3317_v36, %v3164_v32  ;;  %v3165_v39 = vmax.f32 %v2949_v33, 0.0  ;;  %v2951_v41 = vadd.f32 %v2950_v37, %v5317_v51 }
 0x4a4   : > { %v2952_v43 = vpop.f32.mrf.mxu0 }
 0x4a5   : > { %v3257_v47 = vmax.f32 %v3255_v21, %v3165_v39  ;;  %v3166_v49 = vmax.f32 %v2951_v41, 0.0  ;;  %v2953_v3 = vadd.f32 %v2952_v43, %v5313_v50 }
 0x4a6   : > { %v2954_v53 = vpop.f32.mrf.mxu0 }
 0x4a7   : > { %v3320_v54 = vmax.f32 %v3318_v25, %v3166_v49  ;;  %v3167_v55 = vmax.f32 %v2953_v3, 0.0  ;;  %v2955_v18 = vadd.f32 %v2954_v53, %v5317_v51 }
 0x4a8   : > { %v2958_v57 = vpop.f32.mrf.mxu0 }
 0x4a9   : > { %v3258_v59 = vmax.f32 %v3256_v30, %v3167_v55  ;;  %v3168_v60 = vmax.f32 %v2955_v18, 0.0  ;;  %v2959_v61 = vadd.f32 %v2958_v57, %v5313_v50 }
 0x4aa   : > { %v2960_v63 = vpop.f32.mrf.mxu0 }
 0x4ab   : > { %v3321_v0 = vmax.f32 %v3319_v38, %v3168_v60  ;;  %v3169_v1 = vmax.f32 %v2959_v61, 0.0  ;;  %v2961_v2 = vadd.f32 %v2960_v63, %v5317_v51 }
 0x4ac   : > { %v2962_v4 = vpop.f32.mrf.mxu0 }
 0x4ad   : > { %v3259_v5 = vmax.f32 %v3257_v47, %v3169_v1  ;;  %v3170_v6 = vmax.f32 %v2961_v2, 0.0  ;;  %v2963_v7 = vadd.f32 %v2962_v4, %v5313_v50 }
 0x4ae   : > { %v2964_v8 = vpop.f32.mrf.mxu0 }
 0x4af   : > { %v3322_v9 = vmax.f32 %v3320_v54, %v3170_v6  ;;  %v3171_v10 = vmax.f32 %v2963_v7, 0.0  ;;  %v2965_v48 = vadd.f32 %v2964_v8, %v5317_v51 }
 0x4b0   : > { %v2968_v46 = vpop.f32.mrf.mxu0 }
 0x4b1   : > { %v3260_v11 = vmax.f32 %v3258_v59, %v3171_v10  ;;  %v3172_v12 = vmax.f32 %v2965_v48, 0.0  ;;  %v2969_v13 = vadd.f32 %v2968_v46, %v5313_v50 }
 0x4b2   : > { %v2970_v14 = vpop.f32.mrf.mxu0 }
 0x4b3   : > { %v3323_v15 = vmax.f32 %v3321_v0, %v3172_v12  ;;  %v3173_v16 = vmax.f32 %v2969_v13, 0.0  ;;  %v2971_v17 = vadd.f32 %v2970_v14, %v5317_v51 }
 0x4b4   : > { %v2972_v19 = vpop.f32.mrf.mxu0 }
 0x4b5   : > { %v3261_v36 = vmax.f32 %v3259_v5, %v3173_v16  ;;  %v3174_v56 = vmax.f32 %v2971_v17, 0.0  ;;  %v2973_v40 = vadd.f32 %v2972_v19, %v5313_v50 }
 0x4b6   : > { %v2974_v20 = vpop.f32.mrf.mxu0 }
 0x4b7   : > { %v3324_v21 = vmax.f32 %v3322_v9, %v3174_v56  ;;  %v3175_v22 = vmax.f32 %v2973_v40, 0.0  ;;  %v2975_v23 = vadd.f32 %v2974_v20, %v5317_v51 }
 0x4b8   : > { %v2978_v24 = vpop.f32.mrf.mxu0 }
 0x4b9   : > { %v3262_v25 = vmax.f32 %v3260_v11, %v3175_v22  ;;  %v3176_v26 = vmax.f32 %v2975_v23, 0.0  ;;  %v2979_v27 = vadd.f32 %v2978_v24, %v5313_v50 }
 0x4ba   : > { %v2980_v28 = vpop.f32.mrf.mxu0 }
 0x4bb   : > { %v3325_v29 = vmax.f32 %v3323_v15, %v3176_v26  ;;  %v3177_v30 = vmax.f32 %v2979_v27, 0.0  ;;  %v2981_v32 = vadd.f32 %v2980_v28, %v5317_v51 }
 0x4bc   : > { %v2982_v33 = vpop.f32.mrf.mxu0 }
 0x4bd   : > { %v3263_v34 = vmax.f32 %v3261_v36, %v3177_v30  ;;  %v3178_v37 = vmax.f32 %v2981_v32, 0.0  ;;  %v2983_v38 = vadd.f32 %v2982_v33, %v5313_v50 }
 0x4be   : > { %v2984_v39 = vpop.f32.mrf.mxu0 }
 0x4bf   : > { %v3326_v41 = vmax.f32 %v3324_v21, %v3178_v37  ;;  %v3179_v43 = vmax.f32 %v2983_v38, 0.0  ;;  %v2985_v44 = vadd.f32 %v2984_v39, %v5317_v51 }
 0x4c0   : > { %v2988_v47 = vpop.f32.mrf.mxu0 }
 0x4c1   : > { %v3264_v49 = vmax.f32 %v3262_v25, %v3179_v43  ;;  %v3180_v3 = vmax.f32 %v2985_v44, 0.0  ;;  %v2989_v52 = vadd.f32 %v2988_v47, %v5313_v50 }
 0x4c2   : > { %v2990_v53 = vpop.f32.mrf.mxu0 }
 0x4c3   : > { %v3327_v54 = vmax.f32 %v3325_v29, %v3180_v3  ;;  %v3181_v55 = vmax.f32 %v2989_v52, 0.0  ;;  %v2991_v18 = vadd.f32 %v2990_v53, %v5317_v51 }
 0x4c4   : > { %v2992_v57 = vpop.f32.mrf.mxu0 }
 0x4c5   : > { %v3265_v58 = vmax.f32 %v3263_v34, %v3181_v55  ;;  %v3182_v59 = vmax.f32 %v2991_v18, 0.0  ;;  %v2993_v56 = vadd.f32 %v2992_v57, %v5313_v50 }
 0x4c6   : > { %v2994_v60 = vpop.f32.mrf.mxu0 }
 0x4c7   : > { %v3328_v61 = vmax.f32 %v3326_v41, %v3182_v59  ;;  %v2995_v40 = vadd.f32 %v2994_v60, %v5317_v51  ;;  %v3183_v27 = vmax.f32 %v2993_v56, 0.0 }
 0x4c8   : > { %v2998_v62 = vpop.f32.mrf.mxu0 }
 0x4c9   : > { %v2999_v20 = vadd.f32 %v2998_v62, %v5313_v50  ;;  %v3184_v28 = vmax.f32 %v2995_v40, 0.0  ;;  %v3266_v44 = vmax.f32 %v3264_v49, %v3183_v27 }
 0x4ca   : > { %v3000_v63 = vpop.f32.mrf.mxu0 }
 0x4cb   : > { %v3001_v22 = vadd.f32 %v3000_v63, %v5317_v51  ;;  %v3185_v29 = vmax.f32 %v2999_v20, 0.0  ;;  %v3329_v47 = vmax.f32 %v3327_v54, %v3184_v28 }
 0x4cc   : > { %v3002_v0 = vpop.f32.mrf.mxu0 }
 0x4cd   : > { %v3003_v23 = vadd.f32 %v3002_v0, %v5313_v50  ;;  %v3186_v32 = vmax.f32 %v3001_v22, 0.0  ;;  %v3267_v3 = vmax.f32 %v3265_v58, %v3185_v29 }
 0x4ce   : > { %v3004_v1 = vpop.f32.mrf.mxu0 }
 0x4cf   : > { %v3005_v25 = vadd.f32 %v3004_v1, %v5317_v51  ;;  %v3187_v37 = vmax.f32 %v3003_v23, 0.0  ;;  %v3330_v55 = vmax.f32 %v3328_v61, %v3186_v32 }
 0x4d0   : > { %v3008_v2 = vpop.f32.mrf.mxu0 }
 0x4d1   : > { %v3009_v26 = vadd.f32 %v3008_v2, %v5313_v50  ;;  %v3188_v39 = vmax.f32 %v3005_v25, 0.0  ;;  %v3268_v60 = vmax.f32 %v3266_v44, %v3187_v37 }
 0x4d2   : > { %v3010_v4 = vpop.f32.mrf.mxu0 }
 0x4d3   : > { %v3011_v33 = vadd.f32 %v3010_v4, %v5317_v51  ;;  %v3189_v41 = vmax.f32 %v3009_v26, 0.0  ;;  %v3331_v2 = vmax.f32 %v3329_v47, %v3188_v39 }
 0x4d4   : > { %v3012_v5 = vpop.f32.mrf.mxu0 }
 0x4d5   : > { %v3013_v34 = vadd.f32 %v3012_v5, %v5313_v50  ;;  %v3190_v18 = vmax.f32 %v3011_v33, 0.0  ;;  %v3269_v49 = vmax.f32 %v3267_v3, %v3189_v41 }
 0x4d6   : > { %v3014_v6 = vpop.f32.mrf.mxu0 }
 0x4d7   : > { %v3015_v43 = vadd.f32 %v3014_v6, %v5317_v51  ;;  %v3191_v57 = vmax.f32 %v3013_v34, 0.0 }
 0x4d8   : > { %v3018_v7 = vpop.f32.mrf.mxu0 }
 0x4d9   : > { %v3019_v52 = vadd.f32 %v3018_v7, %v5313_v50  ;;  %v3192_v54 = vmax.f32 %v3015_v43, 0.0 }
 0x4da   : > { %v3020_v8 = vpop.f32.mrf.mxu0 }
 0x4db   : > { %v3021_v59 = vadd.f32 %v3020_v8, %v5317_v51  ;;  %v3193_v4 = vmax.f32 %v3019_v52, 0.0  ;;  %v3332_v8 = vmax.f32 %v3330_v55, %v3190_v18 }
 0x4dc   : > { %v3022_v9 = vpop.f32.mrf.mxu0 }
 0x4dd   : > { %v3023_v62 = vadd.f32 %v3022_v9, %v5313_v50  ;;  %v3270_v9 = vmax.f32 %v3268_v60, %v3191_v57  ;;  %v3194_v56 = vmax.f32 %v3021_v59, 0.0  ;;  %v3271_v26 = vmax.f32 %v3269_v49, %v3193_v4 }
 0x4de   : > { %v3024_v10 = vpop.f32.mrf.mxu0 }
 0x4df   : > { %v3025_v63 = vadd.f32 %v3024_v10, %v5317_v51  ;;  %v3334_v32 = vmax.f32 %v3332_v8, %v3194_v56 }
 0x4e0   : > { %v3028_v48 = vpop.f32.mrf.mxu0 }
 0x4e1   : > { %v3029_v0 = vadd.f32 %v3028_v48, %v5313_v50  ;;  %v3195_v48 = vmax.f32 %v3023_v62, 0.0  ;;  %v3196_v40 = vmax.f32 %v3025_v63, 0.0 }
 0x4e2   : > { %v3030_v46 = vpop.f32.mrf.mxu0 }
 0x4e3   : > { %v3031_v58 = vadd.f32 %v3030_v46, %v5317_v51  ;;  %v3197_v20 = vmax.f32 %v3029_v0, 0.0  ;;  %v3333_v46 = vmax.f32 %v3331_v2, %v3192_v54  ;;  %v3272_v34 = vmax.f32 %v3270_v9, %v3195_v48 }
 0x4e4   : > { %v3032_v11 = vpop.f32.mrf.mxu0 }
 0x4e5   : > { %v3033_v61 = vadd.f32 %v3032_v11, %v5313_v50  ;;  %v3198_v25 = vmax.f32 %v3031_v58, 0.0  ;;  %v3335_v37 = vmax.f32 %v3333_v46, %v3196_v40  ;;  %v3273_v39 = vmax.f32 %v3271_v26, %v3197_v20 }
 0x4e6   : > { %v3034_v12 = vpop.f32.mrf.mxu0 }
 0x4e7   : > { %v3035_v5 = vadd.f32 %v3034_v12, %v5317_v51  ;;  %v3336_v43 = vmax.f32 %v3334_v32, %v3198_v25 }
 0x4e8   : > { %v3038_v13 = vpop.f32.mrf.mxu0 }
 0x4e9   : > { %v3039_v6 = vadd.f32 %v3038_v13, %v5313_v50  ;;  %v3199_v13 = vmax.f32 %v3033_v61, 0.0  ;;  %v3200_v27 = vmax.f32 %v3035_v5, 0.0 }
 0x4ea   : > { %v3040_v14 = vpop.f32.mrf.mxu0 }
 0x4eb   : > { %v3041_v10 = vadd.f32 %v3040_v14, %v5317_v51  ;;  %v3201_v28 = vmax.f32 %v3039_v6, 0.0  ;;  %v3274_v3 = vmax.f32 %v3272_v34, %v3199_v13  ;;  %v3337_v52 = vmax.f32 %v3335_v37, %v3200_v27 }
 0x4ec   : > { %v3042_v15 = vpop.f32.mrf.mxu0 }
 0x4ed   : > { %v3043_v22 = vadd.f32 %v3042_v15, %v5313_v50  ;;  %v3202_v33 = vmax.f32 %v3041_v10, 0.0  ;;  %v3275_v55 = vmax.f32 %v3273_v39, %v3201_v28 }
 0x4ee   : > { %v3044_v16 = vpop.f32.mrf.mxu0 }
 0x4ef   : > { %v3045_v11 = vadd.f32 %v3044_v16, %v5317_v51  ;;  %v3203_v41 = vmax.f32 %v3043_v22, 0.0  ;;  %v3338_v57 = vmax.f32 %v3336_v43, %v3202_v33 }
 0x4f0   : > { %v3048_v17 = vpop.f32.mrf.mxu0 }
 0x4f1   : > { %v3049_v12 = vadd.f32 %v3048_v17, %v5313_v50  ;;  %v3204_v17 = vmax.f32 %v3045_v11, 0.0  ;;  %v3276_v62 = vmax.f32 %v3274_v3, %v3203_v41 }
 0x4f2   : > { %v5525_v19 = vpop.f32.mrf.mxu0 }
 0x4f3   : > { %v3051_v14 = vadd.f32 %v5525_v19, %v5317_v51  ;;  %v3205_v44 = vmax.f32 %v3049_v12, 0.0  ;;  %v3339_v49 = vmax.f32 %v3337_v52, %v3204_v17 }
 0x4f4   : > { %v5527_v36 = vpop.f32.mrf.mxu0 }
 0x4f5   : > { %v3053_v15 = vadd.f32 %v5527_v36, %v5313_v50  ;;  %v3206_v36 = vmax.f32 %v3051_v14, 0.0  ;;  %v3277_v54 = vmax.f32 %v3275_v55, %v3205_v44 }
 0x4f6   : > { %v5532_v21 = vpop.f32.mrf.mxu0 }
 0x4f7   : > { %v3055_v47 = vadd.f32 %v5532_v21, %v5317_v51  ;;  %v3207_v59 = vmax.f32 %v3053_v15, 0.0  ;;  %v3340_v8 = vmax.f32 %v3338_v57, %v3206_v36 }
 0x4f8   : > { %v5536_v24 = vpop.f32.mrf.mxu0 }
 0x4f9   : > { %v3059_v19 = vadd.f32 %v5536_v24, %v5313_v50  ;;  %v3208_v58 = vmax.f32 %v3055_v47, 0.0 }
 0x4fa   : > { %v5540_v30 = vpop.f32.mrf.mxu0 }
 0x4fb   : > { %v3061_v63 = vadd.f32 %v5540_v30, %v5317_v51  ;;  %v3209_v4 = vmax.f32 %v3059_v19, 0.0  ;;  %v3278_v30 = vmax.f32 %v3276_v62, %v3207_v59  ;;  %v3341_v20 = vmax.f32 %v3339_v49, %v3208_v58 }
 0x4fc   : > { %v5544_v38 = vpop.f32.mrf.mxu0 }
 0x4fd   : > { %v3063_v60 = vadd.f32 %v5544_v38, %v5313_v50  ;;  %v3279_v46 = vmax.f32 %v3277_v54, %v3209_v4 }
 0x4fe   : > { %v3064_v53 = vpop.f32.mrf.mxu0 }
 0x4ff   : > { %v3065_v0 = vadd.f32 %v3064_v53, %v5317_v51  ;;  %v3211_v9 = vmax.f32 %v3063_v60, 0.0 }
 0x500   : > { %v3068_v1 = vpop.f32.mrf.mxu0 }
 0x501   : > { %v3069_v21 = vadd.f32 %v3068_v1, %v5313_v50  ;;  %v3210_v1 = vmax.f32 %v3061_v63, 0.0  ;;  %v3212_v56 = vmax.f32 %v3065_v0, 0.0  ;;  %v3280_v13 = vmax.f32 %v3278_v30, %v3211_v9  ;;  %v3418_v30 = vld [vmem:[%s5645_s12] sm:$0x3] }
 0x502   : > { %v3070_v7 = vpop.f32.mrf.mxu0  ;;  %v3583_v9 = vrot.slane %v3418_v30, %v2656_v42 }
 0x503   : > { %v3071_v61 = vadd.f32 %v3070_v7, %v5317_v51  ;;  %v3213_v10 = vmax.f32 %v3069_v21, 0.0  ;;  %v3343_v32 = vmax.f32 %v3341_v20, %v3212_v56  ;;  %v3587_v56 = vrot.slane %v3418_v30, %v2660_v45 }
 0x504   : > { %v3072_v23 = vpop.f32.mrf.mxu0 }
 0x505   : > { %v3073_v24 = vadd.f32 %v3072_v23, %v5313_v50  ;;  %v3214_v25 = vmax.f32 %v3071_v61, 0.0  ;;  %v3281_v33 = vmax.f32 %v3279_v46, %v3213_v10 }
 0x506   : > { %v3074_v29 = vpop.f32.mrf.mxu0 }
 0x507   : > { %v3075_v5 = vadd.f32 %v3074_v29, %v5317_v51  ;;  %v3215_v22 = vmax.f32 %v3073_v24, 0.0  ;;  %v3342_v29 = vmax.f32 %v3340_v8, %v3210_v1 }
 0x508   : > { %v3078_v16 = vpop.f32.mrf.mxu0 }
 0x509   : > { %v3079_v38 = vadd.f32 %v3078_v16, %v5313_v50  ;;  %v3216_v11 = vmax.f32 %v3075_v5, 0.0  ;;  %v3282_v34 = vmax.f32 %v3280_v13, %v3215_v22  ;;  %v3344_v16 = vmax.f32 %v3342_v29, %v3214_v25 }
 0x50a   : > { %v3080_v18 = vpop.f32.mrf.mxu0 }
 0x50b   : > { %v3081_v48 = vadd.f32 %v3080_v18, %v5317_v51  ;;  %v3217_v12 = vmax.f32 %v3079_v38, 0.0  ;;  %v3345_v43 = vmax.f32 %v3343_v32, %v3216_v11 }
 0x50c   : > { %v3082_v2 = vpop.f32.mrf.mxu0 }
 0x50d   : > { %v3083_v53 = vadd.f32 %v3082_v2, %v5313_v50  ;;  %v3218_v14 = vmax.f32 %v3081_v48, 0.0  ;;  %v3283_v17 = vmax.f32 %v3281_v33, %v3217_v12 }
 0x50e   : > { %v3084_v6 = vpop.f32.mrf.mxu0 }
 0x50f   : > { %v3085_v7 = vadd.f32 %v3084_v6, %v5317_v51  ;;  %v3219_v27 = vmax.f32 %v3083_v53, 0.0  ;;  %v3346_v19 = vmax.f32 %v3344_v16, %v3218_v14  ;;  %v4600_v53 = vmov 1966171168  }
 0x510   : > { %v3088_v40 = vpop.f32.mrf.mxu0  ;;  %v3637_v1 = vunpack.c.l.s4 %v4600_v53 }
 0x511   : > { %v3089_v23 = vadd.f32 %v3088_v40, %v5313_v50  ;;  %v3220_v37 = vmax.f32 %v3085_v7, 0.0  ;;  %v3284_v47 = vmax.f32 %v3282_v34, %v3219_v27 }
 0x512   : > { %v3090_v26 = vpop.f32.mrf.mxu0  ;;  %v3638_v40 = vunpack.c.0.s8 %v3637_v1 }
 0x513   : > { %v3091_v28 = vadd.f32 %v3090_v26, %v5317_v51  ;;  %v3221_v39 = vmax.f32 %v3089_v23, 0.0  ;;  %v3347_v18 = vmax.f32 %v3345_v43, %v3220_v37 }
 0x514   : > { %v3092_v15 = vpop.f32.mrf.mxu0  ;;  %v3641_v25 = vsub.s32 %v3638_v40, %v5301_v35 }
 0x515   : > { %v3093_v41 = vadd.f32 %v3092_v15, %v5313_v50  ;;  %v3222_v3 = vmax.f32 %v3091_v28, 0.0  ;;  %v3285_v57 = vmax.f32 %v3283_v17, %v3221_v39 }
 0x516   : > { %v3094_v44 = vpop.f32.mrf.mxu0 }
 0x517   : > { %v3223_v52 = vmax.f32 %v3093_v41, 0.0  ;;  %v3095_v55 = vadd.f32 %v3094_v44, %v5317_v51  ;;  %v3348_v60 = vmax.f32 %v3346_v19, %v3222_v3 }
 0x519   : > { %v3286_v36 = vmax.f32 %v3284_v47, %v3223_v52  ;;  %v3224_v59 = vmax.f32 %v3095_v55, 0.0 }
 0x51b   : > { %v3287_v62 = vmax.f32 %v3285_v57, %v3286_v36  ;;  %v3349_v63 = vmax.f32 %v3347_v18, %v3224_v59 }
 0x51d   : > { %v3372_v0 = vrot.slane %v3287_v62, 4  ;;  %v3350_v21 = vmax.f32 %v3348_v60, %v3349_v63 }
 0x51f   : > { %v3373_v50 = vmax.f32 %v3287_v62, %v3372_v0  ;;  %v3378_v2 = vrot.slane %v3350_v21, 4 }
 0x521   : > { %v3374_v49 = vrot.slane %v3373_v50, 2  ;;  %v3379_v54 = vmax.f32 %v3350_v21, %v3378_v2 }
 0x523   : > { %v3375_v58 = vmax.f32 %v3373_v50, %v3374_v49  ;;  %v3380_v24 = vrot.slane %v3379_v54, 2 }
 0x525   : > { %v3376_v4 = vrot.slane %v3375_v58, 1  ;;  %v3381_v61 = vmax.f32 %v3379_v54, %v3380_v24 }
 0x527   : > { %v3382_v51 = vrot.slane %v3381_v61, 1  ;;  %v3377_v5 = vmax.f32 %v3375_v58, %v3376_v4 }
 0x529   : > { %v3383_v38 = vmax.f32 %v3381_v61, %v3382_v51  ;;  %v3384_v8 = vpack.c.bf16 %v3377_v5, %v3377_v5 }
 0x52b   : > { %v3385_v6 = vpack.c.bf16 %v3383_v38, %v3383_v38 }
 0x52d   : > { %3622 = vmatprep.mubr.bf16.mxu1 %v3385_v6 }
 0x52e   : > { %3623 = vmatmul.mubr.bf16.vlgmr.msra.gmra.mxu1 %v3384_v8 }
 0x5ee   : > { %v3624_v10 = vpop.f32.mrf.mxu1 }
 0x5ef   : > { %v3625_v48 = vadd.f32 %v3624_v10, %v3583_v9 }
 0x5f0   : > { %v3626_v20 = vpop.f32.mrf.mxu1 }
 0x5f1   : > { %v3627_v22 = vadd.f32 %v3626_v20, %v3587_v56  ;;  %v3631_v23 = vmax.f32 %v3625_v48, 0.0 }
 0x5f2   : > { %v3628_v7 = vpop.f32.mrf.mxu1 }
 0x5f3   : > { %v3632_v46 = vmax.f32 %v3627_v22, 0.0 }
 0x5f4   : > { %v3629_v42 = vpop.f32.mrf.mxu1 }
 0x5f5   : > { %v3635_v11 = vcombine.low %v3631_v23, %v3632_v46 }
 0x5f7   : > { %v3642_v12 = vrot.slane %v3635_v11, %v3641_v25 }
 0x5f9   : > { %v3649_v45 = vrot.slane %v3642_v12, %v3641_v25 }
 0x5fb   : > { %3655 = vst.msk [vmem:[%s470_s17] sm:$0x3] %vm3653_vm3, %v3649_v45 }
 0x5fc   : > { %4534 = shalt.err (!%p4531_p5)
}
 0x5fd   : > { %s4535_s2 = scalar_lea.hbm %s3670_s29, 32  ;;  %s4539_s17 = scalar_lea.hbm %s5646_s13, 64 }
 0x5fe   : > { %p4536_p6 = scmp.ne.s32.totalorder %s3670_s29, %s4535_s2  ;;  %p4540_p10 = scmp.lt.s32.totalorder %s3670_s29, %s5646_s13 }
 0x5ff   : > { %p4541_p11 = scmp.lt.s32.totalorder %s4539_s17, %s4535_s2 }
 0x600   : > { %p4537_p7 = pnand %p4536_p6, %p4712_p4 }
 0x601   : > { %p4542_p12 = por %p4541_p11, %p4540_p10 }
 0x602   : > { %p4538_p9 = pneg %p4537_p7 }
 0x604   : > { %p4543_p13 = pnand %p4542_p12, %p4538_p9 }
 0x606   : > { %4546 = shalt.err (!%p4543_p13)
}
 0x607   : > { %4380 = dma.vmem_to_hbm [thread:$0]  (%p4712_p4), %s3673_s0, 32, %s3670_s29, %s3657_s22  }
 0x608 PF: > { %p4386_p0 = scmp.ge.s32.totalorder %s4597_s30, 2  ;;  %s3684_s1 = sand.u32 1, %s4577_s25  }
 0x609   : > { %s3685_s23 = scalar_lea.sflag [#allocation4], %s3684_s1 }
 0x60a   : > { %p4383_p1 = pnand %p4386_p0, %p4719_p8 }
 0x60c   : > { %p4384_p2 = pneg %p4383_p1 }
 0x60e   : > { %4572 = dma.done.wait (%p4384_p2), %s3685_s23, 32  }
 0x60f   : > { %4574 = vsyncadd (%p4384_p2), %s3685_s23, 4294967264  ;;  %s26_s30 = sadd.s32 1, %s4597_s30   ;;  %s5659_s28 = sld [smem:[#allocation6_spill]] }
 0x610   : > { %p23_p3 = scmp.ge.s32.totalorder %s26_s30, 4   ;;  %s5660_s29 = sld [smem:[#allocation7_spill]] }
 0x611   : > { %s5661_s25 = smov %s4581_s26  ;;  %s5662_s26 = smov %s4585_s27 }
 0x612   : > { %s5663_s27 = smov %s4725_s21  ;;  %25 = sbr.rel (!%p23_p3) target bundleno = 8 (0x8), region = 119 }
 0x617   :  { %3690 = vsyncpa [#allocation4], 1 }
 0x618   :  { %3692 = vsyncpa [#allocation4 + $0x1], 1 }

</bundles_post_ra>
